<compile_context>
chip_gen: v7x
topology: tpu7x:2x2x1
jax: 0.10.0
libtpu: 0.0.40
codegen_flags: <defaults>
</compile_context>

<pallas_src>
import functools

import jax
import jax.numpy as jnp
from jax.experimental import pallas as pl
from jax.experimental.pallas import tpu as pltpu

KS = 7          # kernel_size
PAD = 3         # padding for kernel_size == 7
N_ACC = 4       # independent accumulators for the tap loop


def _spatial_attention_kernel(wa_ref, wm_ref, x_ref, o_ref, sum_ref, max_ref,
                              *, H, W):
    """One (batch-block, channel-tile) grid step.

    wa_ref: (KS*KS,) f32 SMEM   avg-branch taps, 1/C pre-folded
    wm_ref: (KS*KS,) f32 SMEM   max-branch taps
    x_ref : (nb, ct, H*W) VMEM  input tile (lane-dense spatial)
    o_ref : (nb, 1, H*W)  VMEM  sigmoid(conv) output
    sum_ref/max_ref: (nb, H*W) f32 VMEM scratch (running channel sum / max)
    """
    HW = H * W
    c = pl.program_id(1)

    # ---- init running reductions on the first channel tile -----------------
    @pl.when(c == 0)
    def _init():
        sum_ref[...] = jnp.zeros_like(sum_ref)
        max_ref[...] = jnp.full_like(max_ref, -jnp.inf)

    # ---- channel reduction for this tile (lane-dense, VPU) -----------------
    xb = x_ref[...]                                            # (nb, ct, HW)
    sum_ref[...] += jnp.sum(xb.astype(jnp.float32), axis=1)
    max_ref[...] = jnp.maximum(max_ref[...],
                               jnp.max(xb, axis=1).astype(jnp.float32))

    # ---- on the last channel tile: 7x7 conv (roll + mask) + sigmoid --------
    @pl.when(c == pl.num_programs(1) - 1)
    def _finalize():
        s = sum_ref[...]                                       # (nb, HW)
        m = max_ref[...]                                       # (nb, HW)
        nb = s.shape[0]

        # Flat spatial index (built once, hoisted out of the tap loop).
        # Row checks use the flat index directly: p // W >= k  <=>  p >= k*W.
        p = jax.lax.broadcasted_iota(jnp.int32, (nb, HW), 1)
        col = p % W

        row_masks = {}
        col_masks = {}
        for o in range(-PAD, PAD + 1):
            if o == 0:
                row_masks[o] = None
                col_masks[o] = None
            elif o < 0:
                row_masks[o] = p >= (-o) * W
                col_masks[o] = col >= -o
            else:
                row_masks[o] = p < (H - o) * W
                col_masks[o] = col < W - o

        # Unrolled 7x7 taps over the 2 channels [avg(sum), max], with 4
        # independent accumulators to break the dependency chain.
        accs = [jnp.zeros((nb, HW), jnp.float32) for _ in range(N_ACC)]
        for kh in range(KS):
            oh = kh - PAD
            for kw in range(KS):
                ow = kw - PAD
                t = kh * KS + kw
                off = oh * W + ow
                if off == 0:
                    ss, sm = s, m
                else:
                    shift = (-off) % HW
                    ss = pltpu.roll(s, shift, 1)
                    sm = pltpu.roll(m, shift, 1)
                term = wa_ref[t] * ss + wm_ref[t] * sm
                rm, cm = row_masks[oh], col_masks[ow]
                mask = rm if cm is None else (cm if rm is None else rm & cm)
                if mask is not None:
                    term = jnp.where(mask, term, 0.0)
                accs[t % N_ACC] = accs[t % N_ACC] + term

        total = (accs[0] + accs[1]) + (accs[2] + accs[3])
        o_ref[:, 0, :] = jax.nn.sigmoid(total).astype(o_ref.dtype)


def spatial_attention(x, weight, *, vmem_budget_bytes=8 << 20):
    """x: (N, C, H, W); weight: (1, 2, KS, KS) OIHW. Returns (N, 1, H, W)."""
    N, C, H, W = x.shape
    HW = H * W
    assert weight.shape == (1, 2, KS, KS), weight.shape

    # Fold the 1/C of the channel mean into the avg-branch taps.
    w = weight.astype(jnp.float32)
    wa = (w[0, 0] / C).reshape(-1)            # (KS*KS,)
    wm = w[0, 1].reshape(-1)                  # (KS*KS,)

    # Lane-dense spatial layout.
    x_flat = x.reshape(N, C, HW)
    itemsize = x.dtype.itemsize

    # Batch blocking: amortize per-grid-step overhead on tiny maps, but keep
    # at least 2 grid steps so both v7x TensorCores get work.
    nb = 1
    while (N % (nb * 2) == 0 and N // (nb * 2) >= 2
           and nb * C * HW * itemsize < (1 << 20)):
        nb *= 2

    # Channel tiling: largest divisor of C (full C, or a multiple of 8 to keep
    # the sublane tiling legal) whose double-buffered block fits the budget.
    divisors = [d for d in range(1, C + 1) if C % d == 0]
    cands = [d for d in divisors if d == C or d % 8 == 0]
    fitting = [d for d in cands if 2 * nb * d * HW * itemsize <= vmem_budget_bytes]
    ct = max(fitting) if fitting else min(cands)

    kernel = functools.partial(_spatial_attention_kernel, H=H, W=W)

    out = pl.pallas_call(
        kernel,
        out_shape=jax.ShapeDtypeStruct((N, 1, HW), x.dtype),
        grid_spec=pltpu.PrefetchScalarGridSpec(
            num_scalar_prefetch=0,
            grid=(N // nb, C // ct),
            in_specs=[
                pl.BlockSpec(memory_space=pltpu.MemorySpace.SMEM),     # wa taps
                pl.BlockSpec(memory_space=pltpu.MemorySpace.SMEM),     # wm taps
                pl.BlockSpec((nb, ct, HW), lambda n, c: (n, c, 0)),    # x tile
            ],
            out_specs=pl.BlockSpec((nb, 1, HW), lambda n, c: (n, 0, 0)),
            scratch_shapes=[
                pltpu.VMEM((nb, HW), jnp.float32),                     # running sum
                pltpu.VMEM((nb, HW), jnp.float32),                     # running max
            ],
        ),
        compiler_params=pltpu.CompilerParams(
            dimension_semantics=("parallel", "arbitrary")),
    )(wa, wm, x_flat)

    return out.reshape(N, 1, H, W)


def ref_forward(x, weight):
    """Plain-JAX reference matching the PyTorch module exactly."""
    avg = jnp.mean(x, axis=1, keepdims=True)
    mx = jnp.max(x, axis=1, keepdims=True)
    cat = jnp.concatenate([avg, mx], axis=1)          # (N, 2, H, W)
    out = jax.lax.conv_general_dilated(
        cat, weight, window_strides=(1, 1),
        padding=((PAD, PAD), (PAD, PAD)),
        dimension_numbers=("NCHW", "OIHW", "NCHW"))
    return jax.nn.sigmoid(out)


if __name__ == "__main__":
    key = jax.random.PRNGKey(0)
    kx, kw = jax.random.split(key)

    # Small shapes consistent with the module: batch=2, channels=4, spatial=16.
    x = jax.random.normal(kx, (2, 4, 16, 16), dtype=jnp.float32)
    # Deterministic conv weight (nn.Conv2d(2, 1, 7, bias=False) shape).
    weight = jax.random.normal(kw, (1, 2, KS, KS), dtype=jnp.float32)
    weight = weight * (1.0 / (2 * KS * KS) ** 0.5)

    out = spatial_attention(x, weight)
    out = jax.block_until_ready(out)

    ref = ref_forward(x, weight)
    assert out.shape == (2, 1, 16, 16), out.shape
    assert jnp.allclose(out, ref, atol=1e-5, rtol=1e-5), "mismatch vs reference"

    print("KERNEL_OK")
</pallas_src>

<mosaic_0001>
module attributes {stable_mosaic.version = 11 : i64} {
  func.func @_spatial_attention_kernel(%arg0: i32, %arg1: i32, %arg2: memref<49xf32, #tpu.memory_space<smem>>, %arg3: memref<49xf32, #tpu.memory_space<smem>>, %arg4: memref<1x4x256xf32, #tpu.memory_space<vmem>>, %arg5: memref<1x1x256xf32, #tpu.memory_space<vmem>>, %arg6: memref<1x256xf32, #tpu.memory_space<vmem>>, %arg7: memref<1x256xf32, #tpu.memory_space<vmem>>) attributes {dimension_semantics = [#tpu.dimension_semantics<parallel>, #tpu.dimension_semantics<arbitrary>], iteration_bounds = array<i64: 2, 1>, scalar_prefetch = 0 : i64, scratch_operands = 2 : i64, tpu.core_type = #tpu.core_type<tc>, window_params = [{transform_indices = @transform_0, window_bounds = array<i64: 49>}, {transform_indices = @transform_1, window_bounds = array<i64: 49>}, {transform_indices = @transform_2, window_bounds = array<i64: 1, 4, 256>}, {transform_indices = @transform_3, window_bounds = array<i64: 1, 1, 256>}]} {
    %c0_i32 = arith.constant 0 : i32
    %0 = arith.cmpi eq, %arg1, %c0_i32 : i32
    %1 = arith.extui %0 : i1 to i32
    %c0_i32_0 = arith.constant 0 : i32
    %2 = arith.cmpi ne, %1, %c0_i32_0 : i32
    scf.if %2 {
      %cst_14 = arith.constant 0.000000e+00 : f32
      %15 = vector.broadcast %cst_14 : f32 to vector<1x256xf32>
      %c0_15 = arith.constant 0 : index
      %c0_16 = arith.constant 0 : index
      %16 = vector.load %arg6[%c0_15, %c0_16] : memref<1x256xf32, #tpu.memory_space<vmem>>, vector<1x256xf32>
      tpu.vector_store %arg6[%c0_15, %c0_16], %15 {strides = array<i32>} : memref<1x256xf32, #tpu.memory_space<vmem>>, vector<1x256xf32>,
      %cst_17 = arith.constant 0xFF800000 : f32
      %17 = vector.broadcast %cst_17 : f32 to vector<1x256xf32>
      %c0_18 = arith.constant 0 : index
      %c0_19 = arith.constant 0 : index
      %18 = vector.load %arg7[%c0_18, %c0_19] : memref<1x256xf32, #tpu.memory_space<vmem>>, vector<1x256xf32>
      tpu.vector_store %arg7[%c0_18, %c0_19], %17 {strides = array<i32>} : memref<1x256xf32, #tpu.memory_space<vmem>>, vector<1x256xf32>,
    } else {
    }
    %c0 = arith.constant 0 : index
    %c0_1 = arith.constant 0 : index
    %c0_2 = arith.constant 0 : index
    %3 = vector.load %arg4[%c0, %c0_1, %c0_2] : memref<1x4x256xf32, #tpu.memory_space<vmem>>, vector<1x4x256xf32>
    %c0_3 = arith.constant 0 : index
    %c0_4 = arith.constant 0 : index
    %4 = vector.load %arg6[%c0_3, %c0_4] : memref<1x256xf32, #tpu.memory_space<vmem>>, vector<1x256xf32>
    %cst = arith.constant dense<0.000000e+00> : vector<1x256xf32>
    %5 = vector.multi_reduction <add>, %3, %cst [1] : vector<1x4x256xf32> to vector<1x256xf32>
    %6 = arith.addf %4, %5 : vector<1x256xf32>
    %c0_5 = arith.constant 0 : index
    %c0_6 = arith.constant 0 : index
    %7 = vector.load %arg6[%c0_5, %c0_6] : memref<1x256xf32, #tpu.memory_space<vmem>>, vector<1x256xf32>
    tpu.vector_store %arg6[%c0_5, %c0_6], %6 {strides = array<i32>} : memref<1x256xf32, #tpu.memory_space<vmem>>, vector<1x256xf32>,
    %c0_7 = arith.constant 0 : index
    %c0_8 = arith.constant 0 : index
    %8 = vector.load %arg7[%c0_7, %c0_8] : memref<1x256xf32, #tpu.memory_space<vmem>>, vector<1x256xf32>
    %cst_9 = arith.constant dense<0xFF800000> : vector<1x256xf32>
    %9 = vector.multi_reduction <maximumf>, %3, %cst_9 [1] : vector<1x4x256xf32> to vector<1x256xf32>
    %10 = arith.maximumf %8, %9 : vector<1x256xf32>
    %c0_10 = arith.constant 0 : index
    %c0_11 = arith.constant 0 : index
    %11 = vector.load %arg7[%c0_10, %c0_11] : memref<1x256xf32, #tpu.memory_space<vmem>>, vector<1x256xf32>
    tpu.vector_store %arg7[%c0_10, %c0_11], %10 {strides = array<i32>} : memref<1x256xf32, #tpu.memory_space<vmem>>, vector<1x256xf32>,
    %c0_i32_12 = arith.constant 0 : i32
    %12 = arith.cmpi eq, %arg1, %c0_i32_12 : i32
    %13 = arith.extui %12 : i1 to i32
    %c0_i32_13 = arith.constant 0 : i32
    %14 = arith.cmpi ne, %13, %c0_i32_13 : i32
    scf.if %14 {
      %c0_14 = arith.constant 0 : index
      %c0_15 = arith.constant 0 : index
      %15 = vector.load %arg6[%c0_14, %c0_15] : memref<1x256xf32, #tpu.memory_space<vmem>>, vector<1x256xf32>
      %c0_16 = arith.constant 0 : index
      %c0_17 = arith.constant 0 : index
      %16 = vector.load %arg7[%c0_16, %c0_17] : memref<1x256xf32, #tpu.memory_space<vmem>>, vector<1x256xf32>
      %17 = tpu.iota {dimensions = array<i32: 1>} : vector<1x256xi32>
      %c16_i32 = arith.constant 16 : i32
      %c0_i32_18 = arith.constant 0 : i32
      %18 = arith.cmpi eq, %c16_i32, %c0_i32_18 : i32
      %c1_i32 = arith.constant 1 : i32
      %19 = arith.select %18, %c1_i32, %c16_i32 : i32
      %20 = vector.broadcast %19 : i32 to vector<1x256xi32>
      %21 = arith.remsi %17, %20 : vector<1x256xi32>
      %c0_i32_19 = arith.constant 0 : i32
      %22 = vector.broadcast %c0_i32_19 : i32 to vector<1x256xi32>
      %23 = arith.cmpi ne, %21, %22 : vector<1x256xi32>
      %c0_i32_20 = arith.constant 0 : i32
      %24 = vector.broadcast %c0_i32_20 : i32 to vector<1x256xi32>
      %25 = arith.cmpi slt, %21, %24 : vector<1x256xi32>
      %c0_i32_21 = arith.constant 0 : i32
      %26 = arith.cmpi slt, %19, %c0_i32_21 : i32
      %27 = vector.broadcast %26 : i1 to vector<1x256xi1>
      %28 = vector.broadcast %27 : vector<1x256xi1> to vector<1x256xi1>
      %29 = arith.xori %25, %28 : vector<1x256xi1>
      %30 = arith.andi %29, %23 : vector<1x256xi1>
      %31 = vector.broadcast %19 : i32 to vector<1x256xi32>
      %32 = arith.addi %21, %31 : vector<1x256xi32>
      %33 = arith.select %30, %32, %21 : vector<1x256xi1>, vector<1x256xi32>
      %c48_i32 = arith.constant 48 : i32
      %34 = vector.broadcast %c48_i32 : i32 to vector<1x256xi32>
      %35 = arith.cmpi sge, %17, %34 : vector<1x256xi32>
      %c3_i32 = arith.constant 3 : i32
      %36 = vector.broadcast %c3_i32 : i32 to vector<1x256xi32>
      %37 = arith.cmpi sge, %33, %36 : vector<1x256xi32>
      %c32_i32 = arith.constant 32 : i32
      %38 = vector.broadcast %c32_i32 : i32 to vector<1x256xi32>
      %39 = arith.cmpi sge, %17, %38 : vector<1x256xi32>
      %c2_i32 = arith.constant 2 : i32
      %40 = vector.broadcast %c2_i32 : i32 to vector<1x256xi32>
      %41 = arith.cmpi sge, %33, %40 : vector<1x256xi32>
      %c16_i32_22 = arith.constant 16 : i32
      %42 = vector.broadcast %c16_i32_22 : i32 to vector<1x256xi32>
      %43 = arith.cmpi sge, %17, %42 : vector<1x256xi32>
      %c1_i32_23 = arith.constant 1 : i32
      %44 = vector.broadcast %c1_i32_23 : i32 to vector<1x256xi32>
      %45 = arith.cmpi sge, %33, %44 : vector<1x256xi32>
      %c240_i32 = arith.constant 240 : i32
      %46 = vector.broadcast %c240_i32 : i32 to vector<1x256xi32>
      %47 = arith.cmpi slt, %17, %46 : vector<1x256xi32>
      %c15_i32 = arith.constant 15 : i32
      %48 = vector.broadcast %c15_i32 : i32 to vector<1x256xi32>
      %49 = arith.cmpi slt, %33, %48 : vector<1x256xi32>
      %c224_i32 = arith.constant 224 : i32
      %50 = vector.broadcast %c224_i32 : i32 to vector<1x256xi32>
      %51 = arith.cmpi slt, %17, %50 : vector<1x256xi32>
      %c14_i32 = arith.constant 14 : i32
      %52 = vector.broadcast %c14_i32 : i32 to vector<1x256xi32>
      %53 = arith.cmpi slt, %33, %52 : vector<1x256xi32>
      %c208_i32 = arith.constant 208 : i32
      %54 = vector.broadcast %c208_i32 : i32 to vector<1x256xi32>
      %55 = arith.cmpi slt, %17, %54 : vector<1x256xi32>
      %c13_i32 = arith.constant 13 : i32
      %56 = vector.broadcast %c13_i32 : i32 to vector<1x256xi32>
      %57 = arith.cmpi slt, %33, %56 : vector<1x256xi32>
      %cst_24 = arith.constant 0.000000e+00 : f32
      %58 = vector.broadcast %cst_24 : f32 to vector<1x256xf32>
      %cst_25 = arith.constant 0.000000e+00 : f32
      %59 = vector.broadcast %cst_25 : f32 to vector<1x256xf32>
      %cst_26 = arith.constant 0.000000e+00 : f32
      %60 = vector.broadcast %cst_26 : f32 to vector<1x256xf32>
      %cst_27 = arith.constant 0.000000e+00 : f32
      %61 = vector.broadcast %cst_27 : f32 to vector<1x256xf32>
      %c51_i32 = arith.constant 51 : i32
      %62 = tpu.dynamic_rotate %15 by %c51_i32 dim 1 : vector<1x256xf32>, i32 -> vector<1x256xf32>
      %c51_i32_28 = arith.constant 51 : i32
      %63 = tpu.dynamic_rotate %16 by %c51_i32_28 dim 1 : vector<1x256xf32>, i32 -> vector<1x256xf32>
      %c0_29 = arith.constant 0 : index
      %64 = memref.load %arg2[%c0_29] : memref<49xf32, #tpu.memory_space<smem>>
      %65 = vector.broadcast %64 : f32 to vector<1x256xf32>
      %66 = arith.mulf %65, %62 : vector<1x256xf32>
      %c0_30 = arith.constant 0 : index
      %67 = memref.load %arg3[%c0_30] : memref<49xf32, #tpu.memory_space<smem>>
      %68 = vector.broadcast %67 : f32 to vector<1x256xf32>
      %69 = arith.mulf %68, %63 : vector<1x256xf32>
      %70 = arith.addf %66, %69 : vector<1x256xf32>
      %71 = arith.andi %35, %37 : vector<1x256xi1>
      %cst_31 = arith.constant 0.000000e+00 : f32
      %72 = vector.broadcast %cst_31 : f32 to vector<1x256xf32>
      %73 = arith.select %71, %70, %72 : vector<1x256xi1>, vector<1x256xf32>
      %74 = arith.addf %58, %73 : vector<1x256xf32>
      %c50_i32 = arith.constant 50 : i32
      %75 = tpu.dynamic_rotate %15 by %c50_i32 dim 1 : vector<1x256xf32>, i32 -> vector<1x256xf32>
      %c50_i32_32 = arith.constant 50 : i32
      %76 = tpu.dynamic_rotate %16 by %c50_i32_32 dim 1 : vector<1x256xf32>, i32 -> vector<1x256xf32>
      %c1 = arith.constant 1 : index
      %77 = memref.load %arg2[%c1] : memref<49xf32, #tpu.memory_space<smem>>
      %78 = vector.broadcast %77 : f32 to vector<1x256xf32>
      %79 = arith.mulf %78, %75 : vector<1x256xf32>
      %c1_33 = arith.constant 1 : index
      %80 = memref.load %arg3[%c1_33] : memref<49xf32, #tpu.memory_space<smem>>
      %81 = vector.broadcast %80 : f32 to vector<1x256xf32>
      %82 = arith.mulf %81, %76 : vector<1x256xf32>
      %83 = arith.addf %79, %82 : vector<1x256xf32>
      %84 = arith.andi %35, %41 : vector<1x256xi1>
      %cst_34 = arith.constant 0.000000e+00 : f32
      %85 = vector.broadcast %cst_34 : f32 to vector<1x256xf32>
      %86 = arith.select %84, %83, %85 : vector<1x256xi1>, vector<1x256xf32>
      %87 = arith.addf %59, %86 : vector<1x256xf32>
      %c49_i32 = arith.constant 49 : i32
      %88 = tpu.dynamic_rotate %15 by %c49_i32 dim 1 : vector<1x256xf32>, i32 -> vector<1x256xf32>
      %c49_i32_35 = arith.constant 49 : i32
      %89 = tpu.dynamic_rotate %16 by %c49_i32_35 dim 1 : vector<1x256xf32>, i32 -> vector<1x256xf32>
      %c2 = arith.constant 2 : index
      %90 = memref.load %arg2[%c2] : memref<49xf32, #tpu.memory_space<smem>>
      %91 = vector.broadcast %90 : f32 to vector<1x256xf32>
      %92 = arith.mulf %91, %88 : vector<1x256xf32>
      %c2_36 = arith.constant 2 : index
      %93 = memref.load %arg3[%c2_36] : memref<49xf32, #tpu.memory_space<smem>>
      %94 = vector.broadcast %93 : f32 to vector<1x256xf32>
      %95 = arith.mulf %94, %89 : vector<1x256xf32>
      %96 = arith.addf %92, %95 : vector<1x256xf32>
      %97 = arith.andi %35, %45 : vector<1x256xi1>
      %cst_37 = arith.constant 0.000000e+00 : f32
      %98 = vector.broadcast %cst_37 : f32 to vector<1x256xf32>
      %99 = arith.select %97, %96, %98 : vector<1x256xi1>, vector<1x256xf32>
      %100 = arith.addf %60, %99 : vector<1x256xf32>
      %c48_i32_38 = arith.constant 48 : i32
      %101 = tpu.dynamic_rotate %15 by %c48_i32_38 dim 1 : vector<1x256xf32>, i32 -> vector<1x256xf32>
      %c48_i32_39 = arith.constant 48 : i32
      %102 = tpu.dynamic_rotate %16 by %c48_i32_39 dim 1 : vector<1x256xf32>, i32 -> vector<1x256xf32>
      %c3 = arith.constant 3 : index
      %103 = memref.load %arg2[%c3] : memref<49xf32, #tpu.memory_space<smem>>
      %104 = vector.broadcast %103 : f32 to vector<1x256xf32>
      %105 = arith.mulf %104, %101 : vector<1x256xf32>
      %c3_40 = arith.constant 3 : index
      %106 = memref.load %arg3[%c3_40] : memref<49xf32, #tpu.memory_space<smem>>
      %107 = vector.broadcast %106 : f32 to vector<1x256xf32>
      %108 = arith.mulf %107, %102 : vector<1x256xf32>
      %109 = arith.addf %105, %108 : vector<1x256xf32>
      %cst_41 = arith.constant 0.000000e+00 : f32
      %110 = vector.broadcast %cst_41 : f32 to vector<1x256xf32>
      %111 = arith.select %35, %109, %110 : vector<1x256xi1>, vector<1x256xf32>
      %112 = arith.addf %61, %111 : vector<1x256xf32>
      %c47_i32 = arith.constant 47 : i32
      %113 = tpu.dynamic_rotate %15 by %c47_i32 dim 1 : vector<1x256xf32>, i32 -> vector<1x256xf32>
      %c47_i32_42 = arith.constant 47 : i32
      %114 = tpu.dynamic_rotate %16 by %c47_i32_42 dim 1 : vector<1x256xf32>, i32 -> vector<1x256xf32>
      %c4 = arith.constant 4 : index
      %115 = memref.load %arg2[%c4] : memref<49xf32, #tpu.memory_space<smem>>
      %116 = vector.broadcast %115 : f32 to vector<1x256xf32>
      %117 = arith.mulf %116, %113 : vector<1x256xf32>
      %c4_43 = arith.constant 4 : index
      %118 = memref.load %arg3[%c4_43] : memref<49xf32, #tpu.memory_space<smem>>
      %119 = vector.broadcast %118 : f32 to vector<1x256xf32>
      %120 = arith.mulf %119, %114 : vector<1x256xf32>
      %121 = arith.addf %117, %120 : vector<1x256xf32>
      %122 = arith.andi %35, %49 : vector<1x256xi1>
      %cst_44 = arith.constant 0.000000e+00 : f32
      %123 = vector.broadcast %cst_44 : f32 to vector<1x256xf32>
      %124 = arith.select %122, %121, %123 : vector<1x256xi1>, vector<1x256xf32>
      %125 = arith.addf %74, %124 : vector<1x256xf32>
      %c46_i32 = arith.constant 46 : i32
      %126 = tpu.dynamic_rotate %15 by %c46_i32 dim 1 : vector<1x256xf32>, i32 -> vector<1x256xf32>
      %c46_i32_45 = arith.constant 46 : i32
      %127 = tpu.dynamic_rotate %16 by %c46_i32_45 dim 1 : vector<1x256xf32>, i32 -> vector<1x256xf32>
      %c5 = arith.constant 5 : index
      %128 = memref.load %arg2[%c5] : memref<49xf32, #tpu.memory_space<smem>>
      %129 = vector.broadcast %128 : f32 to vector<1x256xf32>
      %130 = arith.mulf %129, %126 : vector<1x256xf32>
      %c5_46 = arith.constant 5 : index
      %131 = memref.load %arg3[%c5_46] : memref<49xf32, #tpu.memory_space<smem>>
      %132 = vector.broadcast %131 : f32 to vector<1x256xf32>
      %133 = arith.mulf %132, %127 : vector<1x256xf32>
      %134 = arith.addf %130, %133 : vector<1x256xf32>
      %135 = arith.andi %35, %53 : vector<1x256xi1>
      %cst_47 = arith.constant 0.000000e+00 : f32
      %136 = vector.broadcast %cst_47 : f32 to vector<1x256xf32>
      %137 = arith.select %135, %134, %136 : vector<1x256xi1>, vector<1x256xf32>
      %138 = arith.addf %87, %137 : vector<1x256xf32>
      %c45_i32 = arith.constant 45 : i32
      %139 = tpu.dynamic_rotate %15 by %c45_i32 dim 1 : vector<1x256xf32>, i32 -> vector<1x256xf32>
      %c45_i32_48 = arith.constant 45 : i32
      %140 = tpu.dynamic_rotate %16 by %c45_i32_48 dim 1 : vector<1x256xf32>, i32 -> vector<1x256xf32>
      %c6 = arith.constant 6 : index
      %141 = memref.load %arg2[%c6] : memref<49xf32, #tpu.memory_space<smem>>
      %142 = vector.broadcast %141 : f32 to vector<1x256xf32>
      %143 = arith.mulf %142, %139 : vector<1x256xf32>
      %c6_49 = arith.constant 6 : index
      %144 = memref.load %arg3[%c6_49] : memref<49xf32, #tpu.memory_space<smem>>
      %145 = vector.broadcast %144 : f32 to vector<1x256xf32>
      %146 = arith.mulf %145, %140 : vector<1x256xf32>
      %147 = arith.addf %143, %146 : vector<1x256xf32>
      %148 = arith.andi %35, %57 : vector<1x256xi1>
      %cst_50 = arith.constant 0.000000e+00 : f32
      %149 = vector.broadcast %cst_50 : f32 to vector<1x256xf32>
      %150 = arith.select %148, %147, %149 : vector<1x256xi1>, vector<1x256xf32>
      %151 = arith.addf %100, %150 : vector<1x256xf32>
      %c35_i32 = arith.constant 35 : i32
      %152 = tpu.dynamic_rotate %15 by %c35_i32 dim 1 : vector<1x256xf32>, i32 -> vector<1x256xf32>
      %c35_i32_51 = arith.constant 35 : i32
      %153 = tpu.dynamic_rotate %16 by %c35_i32_51 dim 1 : vector<1x256xf32>, i32 -> vector<1x256xf32>
      %c7 = arith.constant 7 : index
      %154 = memref.load %arg2[%c7] : memref<49xf32, #tpu.memory_space<smem>>
      %155 = vector.broadcast %154 : f32 to vector<1x256xf32>
      %156 = arith.mulf %155, %152 : vector<1x256xf32>
      %c7_52 = arith.constant 7 : index
      %157 = memref.load %arg3[%c7_52] : memref<49xf32, #tpu.memory_space<smem>>
      %158 = vector.broadcast %157 : f32 to vector<1x256xf32>
      %159 = arith.mulf %158, %153 : vector<1x256xf32>
      %160 = arith.addf %156, %159 : vector<1x256xf32>
      %161 = arith.andi %39, %37 : vector<1x256xi1>
      %cst_53 = arith.constant 0.000000e+00 : f32
      %162 = vector.broadcast %cst_53 : f32 to vector<1x256xf32>
      %163 = arith.select %161, %160, %162 : vector<1x256xi1>, vector<1x256xf32>
      %164 = arith.addf %112, %163 : vector<1x256xf32>
      %c34_i32 = arith.constant 34 : i32
      %165 = tpu.dynamic_rotate %15 by %c34_i32 dim 1 : vector<1x256xf32>, i32 -> vector<1x256xf32>
      %c34_i32_54 = arith.constant 34 : i32
      %166 = tpu.dynamic_rotate %16 by %c34_i32_54 dim 1 : vector<1x256xf32>, i32 -> vector<1x256xf32>
      %c8 = arith.constant 8 : index
      %167 = memref.load %arg2[%c8] : memref<49xf32, #tpu.memory_space<smem>>
      %168 = vector.broadcast %167 : f32 to vector<1x256xf32>
      %169 = arith.mulf %168, %165 : vector<1x256xf32>
      %c8_55 = arith.constant 8 : index
      %170 = memref.load %arg3[%c8_55] : memref<49xf32, #tpu.memory_space<smem>>
      %171 = vector.broadcast %170 : f32 to vector<1x256xf32>
      %172 = arith.mulf %171, %166 : vector<1x256xf32>
      %173 = arith.addf %169, %172 : vector<1x256xf32>
      %174 = arith.andi %39, %41 : vector<1x256xi1>
      %cst_56 = arith.constant 0.000000e+00 : f32
      %175 = vector.broadcast %cst_56 : f32 to vector<1x256xf32>
      %176 = arith.select %174, %173, %175 : vector<1x256xi1>, vector<1x256xf32>
      %177 = arith.addf %125, %176 : vector<1x256xf32>
      %c33_i32 = arith.constant 33 : i32
      %178 = tpu.dynamic_rotate %15 by %c33_i32 dim 1 : vector<1x256xf32>, i32 -> vector<1x256xf32>
      %c33_i32_57 = arith.constant 33 : i32
      %179 = tpu.dynamic_rotate %16 by %c33_i32_57 dim 1 : vector<1x256xf32>, i32 -> vector<1x256xf32>
      %c9 = arith.constant 9 : index
      %180 = memref.load %arg2[%c9] : memref<49xf32, #tpu.memory_space<smem>>
      %181 = vector.broadcast %180 : f32 to vector<1x256xf32>
      %182 = arith.mulf %181, %178 : vector<1x256xf32>
      %c9_58 = arith.constant 9 : index
      %183 = memref.load %arg3[%c9_58] : memref<49xf32, #tpu.memory_space<smem>>
      %184 = vector.broadcast %183 : f32 to vector<1x256xf32>
      %185 = arith.mulf %184, %179 : vector<1x256xf32>
      %186 = arith.addf %182, %185 : vector<1x256xf32>
      %187 = arith.andi %39, %45 : vector<1x256xi1>
      %cst_59 = arith.constant 0.000000e+00 : f32
      %188 = vector.broadcast %cst_59 : f32 to vector<1x256xf32>
      %189 = arith.select %187, %186, %188 : vector<1x256xi1>, vector<1x256xf32>
      %190 = arith.addf %138, %189 : vector<1x256xf32>
      %c32_i32_60 = arith.constant 32 : i32
      %191 = tpu.dynamic_rotate %15 by %c32_i32_60 dim 1 : vector<1x256xf32>, i32 -> vector<1x256xf32>
      %c32_i32_61 = arith.constant 32 : i32
      %192 = tpu.dynamic_rotate %16 by %c32_i32_61 dim 1 : vector<1x256xf32>, i32 -> vector<1x256xf32>
      %c10 = arith.constant 10 : index
      %193 = memref.load %arg2[%c10] : memref<49xf32, #tpu.memory_space<smem>>
      %194 = vector.broadcast %193 : f32 to vector<1x256xf32>
      %195 = arith.mulf %194, %191 : vector<1x256xf32>
      %c10_62 = arith.constant 10 : index
      %196 = memref.load %arg3[%c10_62] : memref<49xf32, #tpu.memory_space<smem>>
      %197 = vector.broadcast %196 : f32 to vector<1x256xf32>
      %198 = arith.mulf %197, %192 : vector<1x256xf32>
      %199 = arith.addf %195, %198 : vector<1x256xf32>
      %cst_63 = arith.constant 0.000000e+00 : f32
      %200 = vector.broadcast %cst_63 : f32 to vector<1x256xf32>
      %201 = arith.select %39, %199, %200 : vector<1x256xi1>, vector<1x256xf32>
      %202 = arith.addf %151, %201 : vector<1x256xf32>
      %c31_i32 = arith.constant 31 : i32
      %203 = tpu.dynamic_rotate %15 by %c31_i32 dim 1 : vector<1x256xf32>, i32 -> vector<1x256xf32>
      %c31_i32_64 = arith.constant 31 : i32
      %204 = tpu.dynamic_rotate %16 by %c31_i32_64 dim 1 : vector<1x256xf32>, i32 -> vector<1x256xf32>
      %c11 = arith.constant 11 : index
      %205 = memref.load %arg2[%c11] : memref<49xf32, #tpu.memory_space<smem>>
      %206 = vector.broadcast %205 : f32 to vector<1x256xf32>
      %207 = arith.mulf %206, %203 : vector<1x256xf32>
      %c11_65 = arith.constant 11 : index
      %208 = memref.load %arg3[%c11_65] : memref<49xf32, #tpu.memory_space<smem>>
      %209 = vector.broadcast %208 : f32 to vector<1x256xf32>
      %210 = arith.mulf %209, %204 : vector<1x256xf32>
      %211 = arith.addf %207, %210 : vector<1x256xf32>
      %212 = arith.andi %39, %49 : vector<1x256xi1>
      %cst_66 = arith.constant 0.000000e+00 : f32
      %213 = vector.broadcast %cst_66 : f32 to vector<1x256xf32>
      %214 = arith.select %212, %211, %213 : vector<1x256xi1>, vector<1x256xf32>
      %215 = arith.addf %164, %214 : vector<1x256xf32>
      %c30_i32 = arith.constant 30 : i32
      %216 = tpu.dynamic_rotate %15 by %c30_i32 dim 1 : vector<1x256xf32>, i32 -> vector<1x256xf32>
      %c30_i32_67 = arith.constant 30 : i32
      %217 = tpu.dynamic_rotate %16 by %c30_i32_67 dim 1 : vector<1x256xf32>, i32 -> vector<1x256xf32>
      %c12 = arith.constant 12 : index
      %218 = memref.load %arg2[%c12] : memref<49xf32, #tpu.memory_space<smem>>
      %219 = vector.broadcast %218 : f32 to vector<1x256xf32>
      %220 = arith.mulf %219, %216 : vector<1x256xf32>
      %c12_68 = arith.constant 12 : index
      %221 = memref.load %arg3[%c12_68] : memref<49xf32, #tpu.memory_space<smem>>
      %222 = vector.broadcast %221 : f32 to vector<1x256xf32>
      %223 = arith.mulf %222, %217 : vector<1x256xf32>
      %224 = arith.addf %220, %223 : vector<1x256xf32>
      %225 = arith.andi %39, %53 : vector<1x256xi1>
      %cst_69 = arith.constant 0.000000e+00 : f32
      %226 = vector.broadcast %cst_69 : f32 to vector<1x256xf32>
      %227 = arith.select %225, %224, %226 : vector<1x256xi1>, vector<1x256xf32>
      %228 = arith.addf %177, %227 : vector<1x256xf32>
      %c29_i32 = arith.constant 29 : i32
      %229 = tpu.dynamic_rotate %15 by %c29_i32 dim 1 : vector<1x256xf32>, i32 -> vector<1x256xf32>
      %c29_i32_70 = arith.constant 29 : i32
      %230 = tpu.dynamic_rotate %16 by %c29_i32_70 dim 1 : vector<1x256xf32>, i32 -> vector<1x256xf32>
      %c13 = arith.constant 13 : index
      %231 = memref.load %arg2[%c13] : memref<49xf32, #tpu.memory_space<smem>>
      %232 = vector.broadcast %231 : f32 to vector<1x256xf32>
      %233 = arith.mulf %232, %229 : vector<1x256xf32>
      %c13_71 = arith.constant 13 : index
      %234 = memref.load %arg3[%c13_71] : memref<49xf32, #tpu.memory_space<smem>>
      %235 = vector.broadcast %234 : f32 to vector<1x256xf32>
      %236 = arith.mulf %235, %230 : vector<1x256xf32>
      %237 = arith.addf %233, %236 : vector<1x256xf32>
      %238 = arith.andi %39, %57 : vector<1x256xi1>
      %cst_72 = arith.constant 0.000000e+00 : f32
      %239 = vector.broadcast %cst_72 : f32 to vector<1x256xf32>
      %240 = arith.select %238, %237, %239 : vector<1x256xi1>, vector<1x256xf32>
      %241 = arith.addf %190, %240 : vector<1x256xf32>
      %c19_i32 = arith.constant 19 : i32
      %242 = tpu.dynamic_rotate %15 by %c19_i32 dim 1 : vector<1x256xf32>, i32 -> vector<1x256xf32>
      %c19_i32_73 = arith.constant 19 : i32
      %243 = tpu.dynamic_rotate %16 by %c19_i32_73 dim 1 : vector<1x256xf32>, i32 -> vector<1x256xf32>
      %c14 = arith.constant 14 : index
      %244 = memref.load %arg2[%c14] : memref<49xf32, #tpu.memory_space<smem>>
      %245 = vector.broadcast %244 : f32 to vector<1x256xf32>
      %246 = arith.mulf %245, %242 : vector<1x256xf32>
      %c14_74 = arith.constant 14 : index
      %247 = memref.load %arg3[%c14_74] : memref<49xf32, #tpu.memory_space<smem>>
      %248 = vector.broadcast %247 : f32 to vector<1x256xf32>
      %249 = arith.mulf %248, %243 : vector<1x256xf32>
      %250 = arith.addf %246, %249 : vector<1x256xf32>
      %251 = arith.andi %43, %37 : vector<1x256xi1>
      %cst_75 = arith.constant 0.000000e+00 : f32
      %252 = vector.broadcast %cst_75 : f32 to vector<1x256xf32>
      %253 = arith.select %251, %250, %252 : vector<1x256xi1>, vector<1x256xf32>
      %254 = arith.addf %202, %253 : vector<1x256xf32>
      %c18_i32 = arith.constant 18 : i32
      %255 = tpu.dynamic_rotate %15 by %c18_i32 dim 1 : vector<1x256xf32>, i32 -> vector<1x256xf32>
      %c18_i32_76 = arith.constant 18 : i32
      %256 = tpu.dynamic_rotate %16 by %c18_i32_76 dim 1 : vector<1x256xf32>, i32 -> vector<1x256xf32>
      %c15 = arith.constant 15 : index
      %257 = memref.load %arg2[%c15] : memref<49xf32, #tpu.memory_space<smem>>
      %258 = vector.broadcast %257 : f32 to vector<1x256xf32>
      %259 = arith.mulf %258, %255 : vector<1x256xf32>
      %c15_77 = arith.constant 15 : index
      %260 = memref.load %arg3[%c15_77] : memref<49xf32, #tpu.memory_space<smem>>
      %261 = vector.broadcast %260 : f32 to vector<1x256xf32>
      %262 = arith.mulf %261, %256 : vector<1x256xf32>
      %263 = arith.addf %259, %262 : vector<1x256xf32>
      %264 = arith.andi %43, %41 : vector<1x256xi1>
      %cst_78 = arith.constant 0.000000e+00 : f32
      %265 = vector.broadcast %cst_78 : f32 to vector<1x256xf32>
      %266 = arith.select %264, %263, %265 : vector<1x256xi1>, vector<1x256xf32>
      %267 = arith.addf %215, %266 : vector<1x256xf32>
      %c17_i32 = arith.constant 17 : i32
      %268 = tpu.dynamic_rotate %15 by %c17_i32 dim 1 : vector<1x256xf32>, i32 -> vector<1x256xf32>
      %c17_i32_79 = arith.constant 17 : i32
      %269 = tpu.dynamic_rotate %16 by %c17_i32_79 dim 1 : vector<1x256xf32>, i32 -> vector<1x256xf32>
      %c16 = arith.constant 16 : index
      %270 = memref.load %arg2[%c16] : memref<49xf32, #tpu.memory_space<smem>>
      %271 = vector.broadcast %270 : f32 to vector<1x256xf32>
      %272 = arith.mulf %271, %268 : vector<1x256xf32>
      %c16_80 = arith.constant 16 : index
      %273 = memref.load %arg3[%c16_80] : memref<49xf32, #tpu.memory_space<smem>>
      %274 = vector.broadcast %273 : f32 to vector<1x256xf32>
      %275 = arith.mulf %274, %269 : vector<1x256xf32>
      %276 = arith.addf %272, %275 : vector<1x256xf32>
      %277 = arith.andi %43, %45 : vector<1x256xi1>
      %cst_81 = arith.constant 0.000000e+00 : f32
      %278 = vector.broadcast %cst_81 : f32 to vector<1x256xf32>
      %279 = arith.select %277, %276, %278 : vector<1x256xi1>, vector<1x256xf32>
      %280 = arith.addf %228, %279 : vector<1x256xf32>
      %c16_i32_82 = arith.constant 16 : i32
      %281 = tpu.dynamic_rotate %15 by %c16_i32_82 dim 1 : vector<1x256xf32>, i32 -> vector<1x256xf32>
      %c16_i32_83 = arith.constant 16 : i32
      %282 = tpu.dynamic_rotate %16 by %c16_i32_83 dim 1 : vector<1x256xf32>, i32 -> vector<1x256xf32>
      %c17 = arith.constant 17 : index
      %283 = memref.load %arg2[%c17] : memref<49xf32, #tpu.memory_space<smem>>
      %284 = vector.broadcast %283 : f32 to vector<1x256xf32>
      %285 = arith.mulf %284, %281 : vector<1x256xf32>
      %c17_84 = arith.constant 17 : index
      %286 = memref.load %arg3[%c17_84] : memref<49xf32, #tpu.memory_space<smem>>
      %287 = vector.broadcast %286 : f32 to vector<1x256xf32>
      %288 = arith.mulf %287, %282 : vector<1x256xf32>
      %289 = arith.addf %285, %288 : vector<1x256xf32>
      %cst_85 = arith.constant 0.000000e+00 : f32
      %290 = vector.broadcast %cst_85 : f32 to vector<1x256xf32>
      %291 = arith.select %43, %289, %290 : vector<1x256xi1>, vector<1x256xf32>
      %292 = arith.addf %241, %291 : vector<1x256xf32>
      %c15_i32_86 = arith.constant 15 : i32
      %293 = tpu.dynamic_rotate %15 by %c15_i32_86 dim 1 : vector<1x256xf32>, i32 -> vector<1x256xf32>
      %c15_i32_87 = arith.constant 15 : i32
      %294 = tpu.dynamic_rotate %16 by %c15_i32_87 dim 1 : vector<1x256xf32>, i32 -> vector<1x256xf32>
      %c18 = arith.constant 18 : index
      %295 = memref.load %arg2[%c18] : memref<49xf32, #tpu.memory_space<smem>>
      %296 = vector.broadcast %295 : f32 to vector<1x256xf32>
      %297 = arith.mulf %296, %293 : vector<1x256xf32>
      %c18_88 = arith.constant 18 : index
      %298 = memref.load %arg3[%c18_88] : memref<49xf32, #tpu.memory_space<smem>>
      %299 = vector.broadcast %298 : f32 to vector<1x256xf32>
      %300 = arith.mulf %299, %294 : vector<1x256xf32>
      %301 = arith.addf %297, %300 : vector<1x256xf32>
      %302 = arith.andi %43, %49 : vector<1x256xi1>
      %cst_89 = arith.constant 0.000000e+00 : f32
      %303 = vector.broadcast %cst_89 : f32 to vector<1x256xf32>
      %304 = arith.select %302, %301, %303 : vector<1x256xi1>, vector<1x256xf32>
      %305 = arith.addf %254, %304 : vector<1x256xf32>
      %c14_i32_90 = arith.constant 14 : i32
      %306 = tpu.dynamic_rotate %15 by %c14_i32_90 dim 1 : vector<1x256xf32>, i32 -> vector<1x256xf32>
      %c14_i32_91 = arith.constant 14 : i32
      %307 = tpu.dynamic_rotate %16 by %c14_i32_91 dim 1 : vector<1x256xf32>, i32 -> vector<1x256xf32>
      %c19 = arith.constant 19 : index
      %308 = memref.load %arg2[%c19] : memref<49xf32, #tpu.memory_space<smem>>
      %309 = vector.broadcast %308 : f32 to vector<1x256xf32>
      %310 = arith.mulf %309, %306 : vector<1x256xf32>
      %c19_92 = arith.constant 19 : index
      %311 = memref.load %arg3[%c19_92] : memref<49xf32, #tpu.memory_space<smem>>
      %312 = vector.broadcast %311 : f32 to vector<1x256xf32>
      %313 = arith.mulf %312, %307 : vector<1x256xf32>
      %314 = arith.addf %310, %313 : vector<1x256xf32>
      %315 = arith.andi %43, %53 : vector<1x256xi1>
      %cst_93 = arith.constant 0.000000e+00 : f32
      %316 = vector.broadcast %cst_93 : f32 to vector<1x256xf32>
      %317 = arith.select %315, %314, %316 : vector<1x256xi1>, vector<1x256xf32>
      %318 = arith.addf %267, %317 : vector<1x256xf32>
      %c13_i32_94 = arith.constant 13 : i32
      %319 = tpu.dynamic_rotate %15 by %c13_i32_94 dim 1 : vector<1x256xf32>, i32 -> vector<1x256xf32>
      %c13_i32_95 = arith.constant 13 : i32
      %320 = tpu.dynamic_rotate %16 by %c13_i32_95 dim 1 : vector<1x256xf32>, i32 -> vector<1x256xf32>
      %c20 = arith.constant 20 : index
      %321 = memref.load %arg2[%c20] : memref<49xf32, #tpu.memory_space<smem>>
      %322 = vector.broadcast %321 : f32 to vector<1x256xf32>
      %323 = arith.mulf %322, %319 : vector<1x256xf32>
      %c20_96 = arith.constant 20 : index
      %324 = memref.load %arg3[%c20_96] : memref<49xf32, #tpu.memory_space<smem>>
      %325 = vector.broadcast %324 : f32 to vector<1x256xf32>
      %326 = arith.mulf %325, %320 : vector<1x256xf32>
      %327 = arith.addf %323, %326 : vector<1x256xf32>
      %328 = arith.andi %43, %57 : vector<1x256xi1>
      %cst_97 = arith.constant 0.000000e+00 : f32
      %329 = vector.broadcast %cst_97 : f32 to vector<1x256xf32>
      %330 = arith.select %328, %327, %329 : vector<1x256xi1>, vector<1x256xf32>
      %331 = arith.addf %280, %330 : vector<1x256xf32>
      %c3_i32_98 = arith.constant 3 : i32
      %332 = tpu.dynamic_rotate %15 by %c3_i32_98 dim 1 : vector<1x256xf32>, i32 -> vector<1x256xf32>
      %c3_i32_99 = arith.constant 3 : i32
      %333 = tpu.dynamic_rotate %16 by %c3_i32_99 dim 1 : vector<1x256xf32>, i32 -> vector<1x256xf32>
      %c21 = arith.constant 21 : index
      %334 = memref.load %arg2[%c21] : memref<49xf32, #tpu.memory_space<smem>>
      %335 = vector.broadcast %334 : f32 to vector<1x256xf32>
      %336 = arith.mulf %335, %332 : vector<1x256xf32>
      %c21_100 = arith.constant 21 : index
      %337 = memref.load %arg3[%c21_100] : memref<49xf32, #tpu.memory_space<smem>>
      %338 = vector.broadcast %337 : f32 to vector<1x256xf32>
      %339 = arith.mulf %338, %333 : vector<1x256xf32>
      %340 = arith.addf %336, %339 : vector<1x256xf32>
      %cst_101 = arith.constant 0.000000e+00 : f32
      %341 = vector.broadcast %cst_101 : f32 to vector<1x256xf32>
      %342 = arith.select %37, %340, %341 : vector<1x256xi1>, vector<1x256xf32>
      %343 = arith.addf %292, %342 : vector<1x256xf32>
      %c2_i32_102 = arith.constant 2 : i32
      %344 = tpu.dynamic_rotate %15 by %c2_i32_102 dim 1 : vector<1x256xf32>, i32 -> vector<1x256xf32>
      %c2_i32_103 = arith.constant 2 : i32
      %345 = tpu.dynamic_rotate %16 by %c2_i32_103 dim 1 : vector<1x256xf32>, i32 -> vector<1x256xf32>
      %c22 = arith.constant 22 : index
      %346 = memref.load %arg2[%c22] : memref<49xf32, #tpu.memory_space<smem>>
      %347 = vector.broadcast %346 : f32 to vector<1x256xf32>
      %348 = arith.mulf %347, %344 : vector<1x256xf32>
      %c22_104 = arith.constant 22 : index
      %349 = memref.load %arg3[%c22_104] : memref<49xf32, #tpu.memory_space<smem>>
      %350 = vector.broadcast %349 : f32 to vector<1x256xf32>
      %351 = arith.mulf %350, %345 : vector<1x256xf32>
      %352 = arith.addf %348, %351 : vector<1x256xf32>
      %cst_105 = arith.constant 0.000000e+00 : f32
      %353 = vector.broadcast %cst_105 : f32 to vector<1x256xf32>
      %354 = arith.select %41, %352, %353 : vector<1x256xi1>, vector<1x256xf32>
      %355 = arith.addf %305, %354 : vector<1x256xf32>
      %c1_i32_106 = arith.constant 1 : i32
      %356 = tpu.dynamic_rotate %15 by %c1_i32_106 dim 1 : vector<1x256xf32>, i32 -> vector<1x256xf32>
      %c1_i32_107 = arith.constant 1 : i32
      %357 = tpu.dynamic_rotate %16 by %c1_i32_107 dim 1 : vector<1x256xf32>, i32 -> vector<1x256xf32>
      %c23 = arith.constant 23 : index
      %358 = memref.load %arg2[%c23] : memref<49xf32, #tpu.memory_space<smem>>
      %359 = vector.broadcast %358 : f32 to vector<1x256xf32>
      %360 = arith.mulf %359, %356 : vector<1x256xf32>
      %c23_108 = arith.constant 23 : index
      %361 = memref.load %arg3[%c23_108] : memref<49xf32, #tpu.memory_space<smem>>
      %362 = vector.broadcast %361 : f32 to vector<1x256xf32>
      %363 = arith.mulf %362, %357 : vector<1x256xf32>
      %364 = arith.addf %360, %363 : vector<1x256xf32>
      %cst_109 = arith.constant 0.000000e+00 : f32
      %365 = vector.broadcast %cst_109 : f32 to vector<1x256xf32>
      %366 = arith.select %45, %364, %365 : vector<1x256xi1>, vector<1x256xf32>
      %367 = arith.addf %318, %366 : vector<1x256xf32>
      %c24 = arith.constant 24 : index
      %368 = memref.load %arg2[%c24] : memref<49xf32, #tpu.memory_space<smem>>
      %369 = vector.broadcast %368 : f32 to vector<1x256xf32>
      %370 = arith.mulf %369, %15 : vector<1x256xf32>
      %c24_110 = arith.constant 24 : index
      %371 = memref.load %arg3[%c24_110] : memref<49xf32, #tpu.memory_space<smem>>
      %372 = vector.broadcast %371 : f32 to vector<1x256xf32>
      %373 = arith.mulf %372, %16 : vector<1x256xf32>
      %374 = arith.addf %370, %373 : vector<1x256xf32>
      %375 = arith.addf %331, %374 : vector<1x256xf32>
      %c255_i32 = arith.constant 255 : i32
      %376 = tpu.dynamic_rotate %15 by %c255_i32 dim 1 : vector<1x256xf32>, i32 -> vector<1x256xf32>
      %c255_i32_111 = arith.constant 255 : i32
      %377 = tpu.dynamic_rotate %16 by %c255_i32_111 dim 1 : vector<1x256xf32>, i32 -> vector<1x256xf32>
      %c25 = arith.constant 25 : index
      %378 = memref.load %arg2[%c25] : memref<49xf32, #tpu.memory_space<smem>>
      %379 = vector.broadcast %378 : f32 to vector<1x256xf32>
      %380 = arith.mulf %379, %376 : vector<1x256xf32>
      %c25_112 = arith.constant 25 : index
      %381 = memref.load %arg3[%c25_112] : memref<49xf32, #tpu.memory_space<smem>>
      %382 = vector.broadcast %381 : f32 to vector<1x256xf32>
      %383 = arith.mulf %382, %377 : vector<1x256xf32>
      %384 = arith.addf %380, %383 : vector<1x256xf32>
      %cst_113 = arith.constant 0.000000e+00 : f32
      %385 = vector.broadcast %cst_113 : f32 to vector<1x256xf32>
      %386 = arith.select %49, %384, %385 : vector<1x256xi1>, vector<1x256xf32>
      %387 = arith.addf %343, %386 : vector<1x256xf32>
      %c254_i32 = arith.constant 254 : i32
      %388 = tpu.dynamic_rotate %15 by %c254_i32 dim 1 : vector<1x256xf32>, i32 -> vector<1x256xf32>
      %c254_i32_114 = arith.constant 254 : i32
      %389 = tpu.dynamic_rotate %16 by %c254_i32_114 dim 1 : vector<1x256xf32>, i32 -> vector<1x256xf32>
      %c26 = arith.constant 26 : index
      %390 = memref.load %arg2[%c26] : memref<49xf32, #tpu.memory_space<smem>>
      %391 = vector.broadcast %390 : f32 to vector<1x256xf32>
      %392 = arith.mulf %391, %388 : vector<1x256xf32>
      %c26_115 = arith.constant 26 : index
      %393 = memref.load %arg3[%c26_115] : memref<49xf32, #tpu.memory_space<smem>>
      %394 = vector.broadcast %393 : f32 to vector<1x256xf32>
      %395 = arith.mulf %394, %389 : vector<1x256xf32>
      %396 = arith.addf %392, %395 : vector<1x256xf32>
      %cst_116 = arith.constant 0.000000e+00 : f32
      %397 = vector.broadcast %cst_116 : f32 to vector<1x256xf32>
      %398 = arith.select %53, %396, %397 : vector<1x256xi1>, vector<1x256xf32>
      %399 = arith.addf %355, %398 : vector<1x256xf32>
      %c253_i32 = arith.constant 253 : i32
      %400 = tpu.dynamic_rotate %15 by %c253_i32 dim 1 : vector<1x256xf32>, i32 -> vector<1x256xf32>
      %c253_i32_117 = arith.constant 253 : i32
      %401 = tpu.dynamic_rotate %16 by %c253_i32_117 dim 1 : vector<1x256xf32>, i32 -> vector<1x256xf32>
      %c27 = arith.constant 27 : index
      %402 = memref.load %arg2[%c27] : memref<49xf32, #tpu.memory_space<smem>>
      %403 = vector.broadcast %402 : f32 to vector<1x256xf32>
      %404 = arith.mulf %403, %400 : vector<1x256xf32>
      %c27_118 = arith.constant 27 : index
      %405 = memref.load %arg3[%c27_118] : memref<49xf32, #tpu.memory_space<smem>>
      %406 = vector.broadcast %405 : f32 to vector<1x256xf32>
      %407 = arith.mulf %406, %401 : vector<1x256xf32>
      %408 = arith.addf %404, %407 : vector<1x256xf32>
      %cst_119 = arith.constant 0.000000e+00 : f32
      %409 = vector.broadcast %cst_119 : f32 to vector<1x256xf32>
      %410 = arith.select %57, %408, %409 : vector<1x256xi1>, vector<1x256xf32>
      %411 = arith.addf %367, %410 : vector<1x256xf32>
      %c243_i32 = arith.constant 243 : i32
      %412 = tpu.dynamic_rotate %15 by %c243_i32 dim 1 : vector<1x256xf32>, i32 -> vector<1x256xf32>
      %c243_i32_120 = arith.constant 243 : i32
      %413 = tpu.dynamic_rotate %16 by %c243_i32_120 dim 1 : vector<1x256xf32>, i32 -> vector<1x256xf32>
      %c28 = arith.constant 28 : index
      %414 = memref.load %arg2[%c28] : memref<49xf32, #tpu.memory_space<smem>>
      %415 = vector.broadcast %414 : f32 to vector<1x256xf32>
      %416 = arith.mulf %415, %412 : vector<1x256xf32>
      %c28_121 = arith.constant 28 : index
      %417 = memref.load %arg3[%c28_121] : memref<49xf32, #tpu.memory_space<smem>>
      %418 = vector.broadcast %417 : f32 to vector<1x256xf32>
      %419 = arith.mulf %418, %413 : vector<1x256xf32>
      %420 = arith.addf %416, %419 : vector<1x256xf32>
      %421 = arith.andi %47, %37 : vector<1x256xi1>
      %cst_122 = arith.constant 0.000000e+00 : f32
      %422 = vector.broadcast %cst_122 : f32 to vector<1x256xf32>
      %423 = arith.select %421, %420, %422 : vector<1x256xi1>, vector<1x256xf32>
      %424 = arith.addf %375, %423 : vector<1x256xf32>
      %c242_i32 = arith.constant 242 : i32
      %425 = tpu.dynamic_rotate %15 by %c242_i32 dim 1 : vector<1x256xf32>, i32 -> vector<1x256xf32>
      %c242_i32_123 = arith.constant 242 : i32
      %426 = tpu.dynamic_rotate %16 by %c242_i32_123 dim 1 : vector<1x256xf32>, i32 -> vector<1x256xf32>
      %c29 = arith.constant 29 : index
      %427 = memref.load %arg2[%c29] : memref<49xf32, #tpu.memory_space<smem>>
      %428 = vector.broadcast %427 : f32 to vector<1x256xf32>
      %429 = arith.mulf %428, %425 : vector<1x256xf32>
      %c29_124 = arith.constant 29 : index
      %430 = memref.load %arg3[%c29_124] : memref<49xf32, #tpu.memory_space<smem>>
      %431 = vector.broadcast %430 : f32 to vector<1x256xf32>
      %432 = arith.mulf %431, %426 : vector<1x256xf32>
      %433 = arith.addf %429, %432 : vector<1x256xf32>
      %434 = arith.andi %47, %41 : vector<1x256xi1>
      %cst_125 = arith.constant 0.000000e+00 : f32
      %435 = vector.broadcast %cst_125 : f32 to vector<1x256xf32>
      %436 = arith.select %434, %433, %435 : vector<1x256xi1>, vector<1x256xf32>
      %437 = arith.addf %387, %436 : vector<1x256xf32>
      %c241_i32 = arith.constant 241 : i32
      %438 = tpu.dynamic_rotate %15 by %c241_i32 dim 1 : vector<1x256xf32>, i32 -> vector<1x256xf32>
      %c241_i32_126 = arith.constant 241 : i32
      %439 = tpu.dynamic_rotate %16 by %c241_i32_126 dim 1 : vector<1x256xf32>, i32 -> vector<1x256xf32>
      %c30 = arith.constant 30 : index
      %440 = memref.load %arg2[%c30] : memref<49xf32, #tpu.memory_space<smem>>
      %441 = vector.broadcast %440 : f32 to vector<1x256xf32>
      %442 = arith.mulf %441, %438 : vector<1x256xf32>
      %c30_127 = arith.constant 30 : index
      %443 = memref.load %arg3[%c30_127] : memref<49xf32, #tpu.memory_space<smem>>
      %444 = vector.broadcast %443 : f32 to vector<1x256xf32>
      %445 = arith.mulf %444, %439 : vector<1x256xf32>
      %446 = arith.addf %442, %445 : vector<1x256xf32>
      %447 = arith.andi %47, %45 : vector<1x256xi1>
      %cst_128 = arith.constant 0.000000e+00 : f32
      %448 = vector.broadcast %cst_128 : f32 to vector<1x256xf32>
      %449 = arith.select %447, %446, %448 : vector<1x256xi1>, vector<1x256xf32>
      %450 = arith.addf %399, %449 : vector<1x256xf32>
      %c240_i32_129 = arith.constant 240 : i32
      %451 = tpu.dynamic_rotate %15 by %c240_i32_129 dim 1 : vector<1x256xf32>, i32 -> vector<1x256xf32>
      %c240_i32_130 = arith.constant 240 : i32
      %452 = tpu.dynamic_rotate %16 by %c240_i32_130 dim 1 : vector<1x256xf32>, i32 -> vector<1x256xf32>
      %c31 = arith.constant 31 : index
      %453 = memref.load %arg2[%c31] : memref<49xf32, #tpu.memory_space<smem>>
      %454 = vector.broadcast %453 : f32 to vector<1x256xf32>
      %455 = arith.mulf %454, %451 : vector<1x256xf32>
      %c31_131 = arith.constant 31 : index
      %456 = memref.load %arg3[%c31_131] : memref<49xf32, #tpu.memory_space<smem>>
      %457 = vector.broadcast %456 : f32 to vector<1x256xf32>
      %458 = arith.mulf %457, %452 : vector<1x256xf32>
      %459 = arith.addf %455, %458 : vector<1x256xf32>
      %cst_132 = arith.constant 0.000000e+00 : f32
      %460 = vector.broadcast %cst_132 : f32 to vector<1x256xf32>
      %461 = arith.select %47, %459, %460 : vector<1x256xi1>, vector<1x256xf32>
      %462 = arith.addf %411, %461 : vector<1x256xf32>
      %c239_i32 = arith.constant 239 : i32
      %463 = tpu.dynamic_rotate %15 by %c239_i32 dim 1 : vector<1x256xf32>, i32 -> vector<1x256xf32>
      %c239_i32_133 = arith.constant 239 : i32
      %464 = tpu.dynamic_rotate %16 by %c239_i32_133 dim 1 : vector<1x256xf32>, i32 -> vector<1x256xf32>
      %c32 = arith.constant 32 : index
      %465 = memref.load %arg2[%c32] : memref<49xf32, #tpu.memory_space<smem>>
      %466 = vector.broadcast %465 : f32 to vector<1x256xf32>
      %467 = arith.mulf %466, %463 : vector<1x256xf32>
      %c32_134 = arith.constant 32 : index
      %468 = memref.load %arg3[%c32_134] : memref<49xf32, #tpu.memory_space<smem>>
      %469 = vector.broadcast %468 : f32 to vector<1x256xf32>
      %470 = arith.mulf %469, %464 : vector<1x256xf32>
      %471 = arith.addf %467, %470 : vector<1x256xf32>
      %472 = arith.andi %47, %49 : vector<1x256xi1>
      %cst_135 = arith.constant 0.000000e+00 : f32
      %473 = vector.broadcast %cst_135 : f32 to vector<1x256xf32>
      %474 = arith.select %472, %471, %473 : vector<1x256xi1>, vector<1x256xf32>
      %475 = arith.addf %424, %474 : vector<1x256xf32>
      %c238_i32 = arith.constant 238 : i32
      %476 = tpu.dynamic_rotate %15 by %c238_i32 dim 1 : vector<1x256xf32>, i32 -> vector<1x256xf32>
      %c238_i32_136 = arith.constant 238 : i32
      %477 = tpu.dynamic_rotate %16 by %c238_i32_136 dim 1 : vector<1x256xf32>, i32 -> vector<1x256xf32>
      %c33 = arith.constant 33 : index
      %478 = memref.load %arg2[%c33] : memref<49xf32, #tpu.memory_space<smem>>
      %479 = vector.broadcast %478 : f32 to vector<1x256xf32>
      %480 = arith.mulf %479, %476 : vector<1x256xf32>
      %c33_137 = arith.constant 33 : index
      %481 = memref.load %arg3[%c33_137] : memref<49xf32, #tpu.memory_space<smem>>
      %482 = vector.broadcast %481 : f32 to vector<1x256xf32>
      %483 = arith.mulf %482, %477 : vector<1x256xf32>
      %484 = arith.addf %480, %483 : vector<1x256xf32>
      %485 = arith.andi %47, %53 : vector<1x256xi1>
      %cst_138 = arith.constant 0.000000e+00 : f32
      %486 = vector.broadcast %cst_138 : f32 to vector<1x256xf32>
      %487 = arith.select %485, %484, %486 : vector<1x256xi1>, vector<1x256xf32>
      %488 = arith.addf %437, %487 : vector<1x256xf32>
      %c237_i32 = arith.constant 237 : i32
      %489 = tpu.dynamic_rotate %15 by %c237_i32 dim 1 : vector<1x256xf32>, i32 -> vector<1x256xf32>
      %c237_i32_139 = arith.constant 237 : i32
      %490 = tpu.dynamic_rotate %16 by %c237_i32_139 dim 1 : vector<1x256xf32>, i32 -> vector<1x256xf32>
      %c34 = arith.constant 34 : index
      %491 = memref.load %arg2[%c34] : memref<49xf32, #tpu.memory_space<smem>>
      %492 = vector.broadcast %491 : f32 to vector<1x256xf32>
      %493 = arith.mulf %492, %489 : vector<1x256xf32>
      %c34_140 = arith.constant 34 : index
      %494 = memref.load %arg3[%c34_140] : memref<49xf32, #tpu.memory_space<smem>>
      %495 = vector.broadcast %494 : f32 to vector<1x256xf32>
      %496 = arith.mulf %495, %490 : vector<1x256xf32>
      %497 = arith.addf %493, %496 : vector<1x256xf32>
      %498 = arith.andi %47, %57 : vector<1x256xi1>
      %cst_141 = arith.constant 0.000000e+00 : f32
      %499 = vector.broadcast %cst_141 : f32 to vector<1x256xf32>
      %500 = arith.select %498, %497, %499 : vector<1x256xi1>, vector<1x256xf32>
      %501 = arith.addf %450, %500 : vector<1x256xf32>
      %c227_i32 = arith.constant 227 : i32
      %502 = tpu.dynamic_rotate %15 by %c227_i32 dim 1 : vector<1x256xf32>, i32 -> vector<1x256xf32>
      %c227_i32_142 = arith.constant 227 : i32
      %503 = tpu.dynamic_rotate %16 by %c227_i32_142 dim 1 : vector<1x256xf32>, i32 -> vector<1x256xf32>
      %c35 = arith.constant 35 : index
      %504 = memref.load %arg2[%c35] : memref<49xf32, #tpu.memory_space<smem>>
      %505 = vector.broadcast %504 : f32 to vector<1x256xf32>
      %506 = arith.mulf %505, %502 : vector<1x256xf32>
      %c35_143 = arith.constant 35 : index
      %507 = memref.load %arg3[%c35_143] : memref<49xf32, #tpu.memory_space<smem>>
      %508 = vector.broadcast %507 : f32 to vector<1x256xf32>
      %509 = arith.mulf %508, %503 : vector<1x256xf32>
      %510 = arith.addf %506, %509 : vector<1x256xf32>
      %511 = arith.andi %51, %37 : vector<1x256xi1>
      %cst_144 = arith.constant 0.000000e+00 : f32
      %512 = vector.broadcast %cst_144 : f32 to vector<1x256xf32>
      %513 = arith.select %511, %510, %512 : vector<1x256xi1>, vector<1x256xf32>
      %514 = arith.addf %462, %513 : vector<1x256xf32>
      %c226_i32 = arith.constant 226 : i32
      %515 = tpu.dynamic_rotate %15 by %c226_i32 dim 1 : vector<1x256xf32>, i32 -> vector<1x256xf32>
      %c226_i32_145 = arith.constant 226 : i32
      %516 = tpu.dynamic_rotate %16 by %c226_i32_145 dim 1 : vector<1x256xf32>, i32 -> vector<1x256xf32>
      %c36 = arith.constant 36 : index
      %517 = memref.load %arg2[%c36] : memref<49xf32, #tpu.memory_space<smem>>
      %518 = vector.broadcast %517 : f32 to vector<1x256xf32>
      %519 = arith.mulf %518, %515 : vector<1x256xf32>
      %c36_146 = arith.constant 36 : index
      %520 = memref.load %arg3[%c36_146] : memref<49xf32, #tpu.memory_space<smem>>
      %521 = vector.broadcast %520 : f32 to vector<1x256xf32>
      %522 = arith.mulf %521, %516 : vector<1x256xf32>
      %523 = arith.addf %519, %522 : vector<1x256xf32>
      %524 = arith.andi %51, %41 : vector<1x256xi1>
      %cst_147 = arith.constant 0.000000e+00 : f32
      %525 = vector.broadcast %cst_147 : f32 to vector<1x256xf32>
      %526 = arith.select %524, %523, %525 : vector<1x256xi1>, vector<1x256xf32>
      %527 = arith.addf %475, %526 : vector<1x256xf32>
      %c225_i32 = arith.constant 225 : i32
      %528 = tpu.dynamic_rotate %15 by %c225_i32 dim 1 : vector<1x256xf32>, i32 -> vector<1x256xf32>
      %c225_i32_148 = arith.constant 225 : i32
      %529 = tpu.dynamic_rotate %16 by %c225_i32_148 dim 1 : vector<1x256xf32>, i32 -> vector<1x256xf32>
      %c37 = arith.constant 37 : index
      %530 = memref.load %arg2[%c37] : memref<49xf32, #tpu.memory_space<smem>>
      %531 = vector.broadcast %530 : f32 to vector<1x256xf32>
      %532 = arith.mulf %531, %528 : vector<1x256xf32>
      %c37_149 = arith.constant 37 : index
      %533 = memref.load %arg3[%c37_149] : memref<49xf32, #tpu.memory_space<smem>>
      %534 = vector.broadcast %533 : f32 to vector<1x256xf32>
      %535 = arith.mulf %534, %529 : vector<1x256xf32>
      %536 = arith.addf %532, %535 : vector<1x256xf32>
      %537 = arith.andi %51, %45 : vector<1x256xi1>
      %cst_150 = arith.constant 0.000000e+00 : f32
      %538 = vector.broadcast %cst_150 : f32 to vector<1x256xf32>
      %539 = arith.select %537, %536, %538 : vector<1x256xi1>, vector<1x256xf32>
      %540 = arith.addf %488, %539 : vector<1x256xf32>
      %c224_i32_151 = arith.constant 224 : i32
      %541 = tpu.dynamic_rotate %15 by %c224_i32_151 dim 1 : vector<1x256xf32>, i32 -> vector<1x256xf32>
      %c224_i32_152 = arith.constant 224 : i32
      %542 = tpu.dynamic_rotate %16 by %c224_i32_152 dim 1 : vector<1x256xf32>, i32 -> vector<1x256xf32>
      %c38 = arith.constant 38 : index
      %543 = memref.load %arg2[%c38] : memref<49xf32, #tpu.memory_space<smem>>
      %544 = vector.broadcast %543 : f32 to vector<1x256xf32>
      %545 = arith.mulf %544, %541 : vector<1x256xf32>
      %c38_153 = arith.constant 38 : index
      %546 = memref.load %arg3[%c38_153] : memref<49xf32, #tpu.memory_space<smem>>
      %547 = vector.broadcast %546 : f32 to vector<1x256xf32>
      %548 = arith.mulf %547, %542 : vector<1x256xf32>
      %549 = arith.addf %545, %548 : vector<1x256xf32>
      %cst_154 = arith.constant 0.000000e+00 : f32
      %550 = vector.broadcast %cst_154 : f32 to vector<1x256xf32>
      %551 = arith.select %51, %549, %550 : vector<1x256xi1>, vector<1x256xf32>
      %552 = arith.addf %501, %551 : vector<1x256xf32>
      %c223_i32 = arith.constant 223 : i32
      %553 = tpu.dynamic_rotate %15 by %c223_i32 dim 1 : vector<1x256xf32>, i32 -> vector<1x256xf32>
      %c223_i32_155 = arith.constant 223 : i32
      %554 = tpu.dynamic_rotate %16 by %c223_i32_155 dim 1 : vector<1x256xf32>, i32 -> vector<1x256xf32>
      %c39 = arith.constant 39 : index
      %555 = memref.load %arg2[%c39] : memref<49xf32, #tpu.memory_space<smem>>
      %556 = vector.broadcast %555 : f32 to vector<1x256xf32>
      %557 = arith.mulf %556, %553 : vector<1x256xf32>
      %c39_156 = arith.constant 39 : index
      %558 = memref.load %arg3[%c39_156] : memref<49xf32, #tpu.memory_space<smem>>
      %559 = vector.broadcast %558 : f32 to vector<1x256xf32>
      %560 = arith.mulf %559, %554 : vector<1x256xf32>
      %561 = arith.addf %557, %560 : vector<1x256xf32>
      %562 = arith.andi %51, %49 : vector<1x256xi1>
      %cst_157 = arith.constant 0.000000e+00 : f32
      %563 = vector.broadcast %cst_157 : f32 to vector<1x256xf32>
      %564 = arith.select %562, %561, %563 : vector<1x256xi1>, vector<1x256xf32>
      %565 = arith.addf %514, %564 : vector<1x256xf32>
      %c222_i32 = arith.constant 222 : i32
      %566 = tpu.dynamic_rotate %15 by %c222_i32 dim 1 : vector<1x256xf32>, i32 -> vector<1x256xf32>
      %c222_i32_158 = arith.constant 222 : i32
      %567 = tpu.dynamic_rotate %16 by %c222_i32_158 dim 1 : vector<1x256xf32>, i32 -> vector<1x256xf32>
      %c40 = arith.constant 40 : index
      %568 = memref.load %arg2[%c40] : memref<49xf32, #tpu.memory_space<smem>>
      %569 = vector.broadcast %568 : f32 to vector<1x256xf32>
      %570 = arith.mulf %569, %566 : vector<1x256xf32>
      %c40_159 = arith.constant 40 : index
      %571 = memref.load %arg3[%c40_159] : memref<49xf32, #tpu.memory_space<smem>>
      %572 = vector.broadcast %571 : f32 to vector<1x256xf32>
      %573 = arith.mulf %572, %567 : vector<1x256xf32>
      %574 = arith.addf %570, %573 : vector<1x256xf32>
      %575 = arith.andi %51, %53 : vector<1x256xi1>
      %cst_160 = arith.constant 0.000000e+00 : f32
      %576 = vector.broadcast %cst_160 : f32 to vector<1x256xf32>
      %577 = arith.select %575, %574, %576 : vector<1x256xi1>, vector<1x256xf32>
      %578 = arith.addf %527, %577 : vector<1x256xf32>
      %c221_i32 = arith.constant 221 : i32
      %579 = tpu.dynamic_rotate %15 by %c221_i32 dim 1 : vector<1x256xf32>, i32 -> vector<1x256xf32>
      %c221_i32_161 = arith.constant 221 : i32
      %580 = tpu.dynamic_rotate %16 by %c221_i32_161 dim 1 : vector<1x256xf32>, i32 -> vector<1x256xf32>
      %c41 = arith.constant 41 : index
      %581 = memref.load %arg2[%c41] : memref<49xf32, #tpu.memory_space<smem>>
      %582 = vector.broadcast %581 : f32 to vector<1x256xf32>
      %583 = arith.mulf %582, %579 : vector<1x256xf32>
      %c41_162 = arith.constant 41 : index
      %584 = memref.load %arg3[%c41_162] : memref<49xf32, #tpu.memory_space<smem>>
      %585 = vector.broadcast %584 : f32 to vector<1x256xf32>
      %586 = arith.mulf %585, %580 : vector<1x256xf32>
      %587 = arith.addf %583, %586 : vector<1x256xf32>
      %588 = arith.andi %51, %57 : vector<1x256xi1>
      %cst_163 = arith.constant 0.000000e+00 : f32
      %589 = vector.broadcast %cst_163 : f32 to vector<1x256xf32>
      %590 = arith.select %588, %587, %589 : vector<1x256xi1>, vector<1x256xf32>
      %591 = arith.addf %540, %590 : vector<1x256xf32>
      %c211_i32 = arith.constant 211 : i32
      %592 = tpu.dynamic_rotate %15 by %c211_i32 dim 1 : vector<1x256xf32>, i32 -> vector<1x256xf32>
      %c211_i32_164 = arith.constant 211 : i32
      %593 = tpu.dynamic_rotate %16 by %c211_i32_164 dim 1 : vector<1x256xf32>, i32 -> vector<1x256xf32>
      %c42 = arith.constant 42 : index
      %594 = memref.load %arg2[%c42] : memref<49xf32, #tpu.memory_space<smem>>
      %595 = vector.broadcast %594 : f32 to vector<1x256xf32>
      %596 = arith.mulf %595, %592 : vector<1x256xf32>
      %c42_165 = arith.constant 42 : index
      %597 = memref.load %arg3[%c42_165] : memref<49xf32, #tpu.memory_space<smem>>
      %598 = vector.broadcast %597 : f32 to vector<1x256xf32>
      %599 = arith.mulf %598, %593 : vector<1x256xf32>
      %600 = arith.addf %596, %599 : vector<1x256xf32>
      %601 = arith.andi %55, %37 : vector<1x256xi1>
      %cst_166 = arith.constant 0.000000e+00 : f32
      %602 = vector.broadcast %cst_166 : f32 to vector<1x256xf32>
      %603 = arith.select %601, %600, %602 : vector<1x256xi1>, vector<1x256xf32>
      %604 = arith.addf %552, %603 : vector<1x256xf32>
      %c210_i32 = arith.constant 210 : i32
      %605 = tpu.dynamic_rotate %15 by %c210_i32 dim 1 : vector<1x256xf32>, i32 -> vector<1x256xf32>
      %c210_i32_167 = arith.constant 210 : i32
      %606 = tpu.dynamic_rotate %16 by %c210_i32_167 dim 1 : vector<1x256xf32>, i32 -> vector<1x256xf32>
      %c43 = arith.constant 43 : index
      %607 = memref.load %arg2[%c43] : memref<49xf32, #tpu.memory_space<smem>>
      %608 = vector.broadcast %607 : f32 to vector<1x256xf32>
      %609 = arith.mulf %608, %605 : vector<1x256xf32>
      %c43_168 = arith.constant 43 : index
      %610 = memref.load %arg3[%c43_168] : memref<49xf32, #tpu.memory_space<smem>>
      %611 = vector.broadcast %610 : f32 to vector<1x256xf32>
      %612 = arith.mulf %611, %606 : vector<1x256xf32>
      %613 = arith.addf %609, %612 : vector<1x256xf32>
      %614 = arith.andi %55, %41 : vector<1x256xi1>
      %cst_169 = arith.constant 0.000000e+00 : f32
      %615 = vector.broadcast %cst_169 : f32 to vector<1x256xf32>
      %616 = arith.select %614, %613, %615 : vector<1x256xi1>, vector<1x256xf32>
      %617 = arith.addf %565, %616 : vector<1x256xf32>
      %c209_i32 = arith.constant 209 : i32
      %618 = tpu.dynamic_rotate %15 by %c209_i32 dim 1 : vector<1x256xf32>, i32 -> vector<1x256xf32>
      %c209_i32_170 = arith.constant 209 : i32
      %619 = tpu.dynamic_rotate %16 by %c209_i32_170 dim 1 : vector<1x256xf32>, i32 -> vector<1x256xf32>
      %c44 = arith.constant 44 : index
      %620 = memref.load %arg2[%c44] : memref<49xf32, #tpu.memory_space<smem>>
      %621 = vector.broadcast %620 : f32 to vector<1x256xf32>
      %622 = arith.mulf %621, %618 : vector<1x256xf32>
      %c44_171 = arith.constant 44 : index
      %623 = memref.load %arg3[%c44_171] : memref<49xf32, #tpu.memory_space<smem>>
      %624 = vector.broadcast %623 : f32 to vector<1x256xf32>
      %625 = arith.mulf %624, %619 : vector<1x256xf32>
      %626 = arith.addf %622, %625 : vector<1x256xf32>
      %627 = arith.andi %55, %45 : vector<1x256xi1>
      %cst_172 = arith.constant 0.000000e+00 : f32
      %628 = vector.broadcast %cst_172 : f32 to vector<1x256xf32>
      %629 = arith.select %627, %626, %628 : vector<1x256xi1>, vector<1x256xf32>
      %630 = arith.addf %578, %629 : vector<1x256xf32>
      %c208_i32_173 = arith.constant 208 : i32
      %631 = tpu.dynamic_rotate %15 by %c208_i32_173 dim 1 : vector<1x256xf32>, i32 -> vector<1x256xf32>
      %c208_i32_174 = arith.constant 208 : i32
      %632 = tpu.dynamic_rotate %16 by %c208_i32_174 dim 1 : vector<1x256xf32>, i32 -> vector<1x256xf32>
      %c45 = arith.constant 45 : index
      %633 = memref.load %arg2[%c45] : memref<49xf32, #tpu.memory_space<smem>>
      %634 = vector.broadcast %633 : f32 to vector<1x256xf32>
      %635 = arith.mulf %634, %631 : vector<1x256xf32>
      %c45_175 = arith.constant 45 : index
      %636 = memref.load %arg3[%c45_175] : memref<49xf32, #tpu.memory_space<smem>>
      %637 = vector.broadcast %636 : f32 to vector<1x256xf32>
      %638 = arith.mulf %637, %632 : vector<1x256xf32>
      %639 = arith.addf %635, %638 : vector<1x256xf32>
      %cst_176 = arith.constant 0.000000e+00 : f32
      %640 = vector.broadcast %cst_176 : f32 to vector<1x256xf32>
      %641 = arith.select %55, %639, %640 : vector<1x256xi1>, vector<1x256xf32>
      %642 = arith.addf %591, %641 : vector<1x256xf32>
      %c207_i32 = arith.constant 207 : i32
      %643 = tpu.dynamic_rotate %15 by %c207_i32 dim 1 : vector<1x256xf32>, i32 -> vector<1x256xf32>
      %c207_i32_177 = arith.constant 207 : i32
      %644 = tpu.dynamic_rotate %16 by %c207_i32_177 dim 1 : vector<1x256xf32>, i32 -> vector<1x256xf32>
      %c46 = arith.constant 46 : index
      %645 = memref.load %arg2[%c46] : memref<49xf32, #tpu.memory_space<smem>>
      %646 = vector.broadcast %645 : f32 to vector<1x256xf32>
      %647 = arith.mulf %646, %643 : vector<1x256xf32>
      %c46_178 = arith.constant 46 : index
      %648 = memref.load %arg3[%c46_178] : memref<49xf32, #tpu.memory_space<smem>>
      %649 = vector.broadcast %648 : f32 to vector<1x256xf32>
      %650 = arith.mulf %649, %644 : vector<1x256xf32>
      %651 = arith.addf %647, %650 : vector<1x256xf32>
      %652 = arith.andi %55, %49 : vector<1x256xi1>
      %cst_179 = arith.constant 0.000000e+00 : f32
      %653 = vector.broadcast %cst_179 : f32 to vector<1x256xf32>
      %654 = arith.select %652, %651, %653 : vector<1x256xi1>, vector<1x256xf32>
      %655 = arith.addf %604, %654 : vector<1x256xf32>
      %c206_i32 = arith.constant 206 : i32
      %656 = tpu.dynamic_rotate %15 by %c206_i32 dim 1 : vector<1x256xf32>, i32 -> vector<1x256xf32>
      %c206_i32_180 = arith.constant 206 : i32
      %657 = tpu.dynamic_rotate %16 by %c206_i32_180 dim 1 : vector<1x256xf32>, i32 -> vector<1x256xf32>
      %c47 = arith.constant 47 : index
      %658 = memref.load %arg2[%c47] : memref<49xf32, #tpu.memory_space<smem>>
      %659 = vector.broadcast %658 : f32 to vector<1x256xf32>
      %660 = arith.mulf %659, %656 : vector<1x256xf32>
      %c47_181 = arith.constant 47 : index
      %661 = memref.load %arg3[%c47_181] : memref<49xf32, #tpu.memory_space<smem>>
      %662 = vector.broadcast %661 : f32 to vector<1x256xf32>
      %663 = arith.mulf %662, %657 : vector<1x256xf32>
      %664 = arith.addf %660, %663 : vector<1x256xf32>
      %665 = arith.andi %55, %53 : vector<1x256xi1>
      %cst_182 = arith.constant 0.000000e+00 : f32
      %666 = vector.broadcast %cst_182 : f32 to vector<1x256xf32>
      %667 = arith.select %665, %664, %666 : vector<1x256xi1>, vector<1x256xf32>
      %668 = arith.addf %617, %667 : vector<1x256xf32>
      %c205_i32 = arith.constant 205 : i32
      %669 = tpu.dynamic_rotate %15 by %c205_i32 dim 1 : vector<1x256xf32>, i32 -> vector<1x256xf32>
      %c205_i32_183 = arith.constant 205 : i32
      %670 = tpu.dynamic_rotate %16 by %c205_i32_183 dim 1 : vector<1x256xf32>, i32 -> vector<1x256xf32>
      %c48 = arith.constant 48 : index
      %671 = memref.load %arg2[%c48] : memref<49xf32, #tpu.memory_space<smem>>
      %672 = vector.broadcast %671 : f32 to vector<1x256xf32>
      %673 = arith.mulf %672, %669 : vector<1x256xf32>
      %c48_184 = arith.constant 48 : index
      %674 = memref.load %arg3[%c48_184] : memref<49xf32, #tpu.memory_space<smem>>
      %675 = vector.broadcast %674 : f32 to vector<1x256xf32>
      %676 = arith.mulf %675, %670 : vector<1x256xf32>
      %677 = arith.addf %673, %676 : vector<1x256xf32>
      %678 = arith.andi %55, %57 : vector<1x256xi1>
      %cst_185 = arith.constant 0.000000e+00 : f32
      %679 = vector.broadcast %cst_185 : f32 to vector<1x256xf32>
      %680 = arith.select %678, %677, %679 : vector<1x256xi1>, vector<1x256xf32>
      %681 = arith.addf %630, %680 : vector<1x256xf32>
      %682 = arith.addf %681, %642 : vector<1x256xf32>
      %683 = arith.addf %655, %668 : vector<1x256xf32>
      %684 = arith.addf %682, %683 : vector<1x256xf32>
      %685 = arith.negf %684 : vector<1x256xf32>
      %686 = math.exp %685 : vector<1x256xf32>
      %cst_186 = arith.constant 1.000000e+00 : f32
      %687 = vector.broadcast %cst_186 : f32 to vector<1x256xf32>
      %688 = arith.addf %687, %686 : vector<1x256xf32>
      %689 = arith.divf %687, %688 : vector<1x256xf32>
      %c0_187 = arith.constant 0 : index
      %c0_188 = arith.constant 0 : index
      %c0_189 = arith.constant 0 : index
      %690 = vector.load %arg5[%c0_187, %c0_188, %c0_189] : memref<1x1x256xf32, #tpu.memory_space<vmem>>, vector<1x1x256xf32>
      %691 = vector.shape_cast %690 : vector<1x1x256xf32> to vector<1x256xf32>
      %692 = vector.shape_cast %689 : vector<1x256xf32> to vector<1x1x256xf32>
      tpu.vector_store %arg5[%c0_187, %c0_188, %c0_189], %692 {strides = array<i32>} : memref<1x1x256xf32, #tpu.memory_space<vmem>>, vector<1x1x256xf32>,
    } else {
    }
    return
  }
  func.func @transform_0(%arg0: i32, %arg1: i32) -> i32 {
    %c0_i32 = arith.constant 0 : i32
    %c0_i32_0 = arith.constant 0 : i32
    return %c0_i32 : i32
  }
  func.func @transform_1(%arg0: i32, %arg1: i32) -> i32 {
    %c0_i32 = arith.constant 0 : i32
    %c0_i32_0 = arith.constant 0 : i32
    return %c0_i32 : i32
  }
  func.func @transform_2(%arg0: i32, %arg1: i32) -> (i32, i32, i32) {
    %c0_i32 = arith.constant 0 : i32
    %c0_i32_0 = arith.constant 0 : i32
    return %arg0, %arg1, %c0_i32 : i32, i32, i32
  }
  func.func @transform_3(%arg0: i32, %arg1: i32) -> (i32, i32, i32) {
    %c0_i32 = arith.constant 0 : i32
    %c0_i32_0 = arith.constant 0 : i32
    %c0_i32_1 = arith.constant 0 : i32
    return %arg0, %c0_i32, %c0_i32_0 : i32, i32, i32
  }
}

</mosaic_0001>

<bundles_post_ra>
// kernel: tpu_custom_call.1
= control target key start
LH: loop header
LB: loop body
LE: loop exit
PB: predicated region body
PF: predicated region fallthrough
CT: control target
= control target key end

     0   :  { %s4780_s0 = inlined_call_operand.hbm [shape: f32[49], index: 0, kind: input, shape index: {}]   ;;  %s4781_s1 = inlined_call_operand.vmem [shape: f32[49], index: 1, kind: input, shape index: {}]   ;;  %s4782_s2 = inlined_call_operand.hbm [shape: f32[2,4,256], index: 2, kind: input, shape index: {}]   ;;  %s4783_s3 = inlined_call_operand.hbm [shape: f32[2,1,256], index: 3, kind: output, shape index: {}]  }
   0x1   :  { %4863 = sst [smem:[#allocation66_spill]] %s4780_s0 }
   0x2   :  { %4864 = sst [smem:[#allocation67_spill]] %s4781_s1 }
   0x3   :  { %4865 = sst [smem:[#allocation68_spill]] %s4782_s2 }
   0x4   :  { %4866 = sst [smem:[#allocation69_spill]] %s4783_s3 }
   0x5   :  { %8 = vsyncpa [#allocation7], 0 }
   0x6   :  { %9 = vsyncpa [#allocation8], 0 }
   0x7   :  { %10 = vsyncpa [#allocation5], 0 }
   0x8   :  { %12 = vsyncpa [#allocation5 + $0x1], 0 }
   0x9   :  { %13 = vsyncpa [#allocation6], 0 }
   0xa   :  { %15 = vsyncpa [#allocation6 + $0x1], 0  ;;  %s2427_s12 = smov 0   ;;  %s2429_s13 = smov 0  }
   0xb   :  { %s2431_s14 = smov 0   ;;  %s2433_s15 = smov 0  }
   0xc   :  { %s2435_s16 = smov 0   ;;  %s2437_s17 = smov 0  }
   0xd LB: > { %4867 = sst [smem:[#allocation16_spill]] %s2330_s12  ;;  %s1940_s18 = sadd.s32 4294967295, %s2350_s17   ;;  %s2350_s17 = sphi %s2437_s17, %s21_s17   ;;  %s2346_s16 = sphi %s2435_s16, %s5192_s16   ;;  %s2342_s15 = sphi %s2433_s15, %s5191_s15   ;;  %s2338_s14 = sphi %s2431_s14, %s5190_s14   ;;  %s2334_s13 = sphi %s2429_s13, %s5189_s13   ;;  %s2330_s12 = sphi %s2427_s12, %s5188_s12  }
   0xe   : > { %4868 = sst [smem:[#allocation17_spill]] %s2334_s13  ;;  %s1941_s19 = sadd.s32 4294967294, %s2350_s17  }
   0xf   : > { %4869 = sst [smem:[#allocation18_spill]] %s2338_s14  ;;  %p97_p0 = scmp.ne.s32.totalorder %s2334_s13, %s2330_s12 }
  0x10   : > { %4870 = sst [smem:[#allocation19_spill]] %s2342_s15  ;;  %p2461_p1 = scmp.eq.s32.totalorder %s1940_s18, 0 }
  0x11   : > { %4871 = sst [smem:[#allocation20_spill]] %s2346_s16  ;;  %p2465_p2 = scmp.eq.s32.totalorder %s1940_s18, 1 }
  0x12   : > { %4872 = sst [smem:[#allocation21_spill]] %s2350_s17  ;;  %p127_p3 = scmp.eq.s32.totalorder %s1941_s19, 1 }
  0x13   : > { %s4873_s20 = scalar_select %p2461_p1, 1, 0 }
  0x14   : > { %p2471_p4 = por %p2461_p1, %p97_p0  ;;  %p1942_p5 = scmp.ge.s32.totalorder %s2350_s17, 1 }
  0x15   : > { %p2476_p6 = por %p127_p3, %p97_p0  ;;  %p134_p7 = scmp.lt.s32.totalorder %s2350_s17, 3 }
  0x16   : > { %s4875_s22 = scalar_select %p2471_p4, 1, 0 }
  0x17   : > { %s4876_s23 = scalar_select %p2476_p6, 1, 0 }
  0x18   : > { %p2481_p8 = pnand %p1942_p5, %p134_p7  ;;  %s4879_s1 = sld [smem:[#allocation67_spill]] }
  0x19   : > { %4877 = sst [smem:[#allocation22_spill]] %s4876_s23  ;;  %s33_s29 = sadd.s32 1, %s2346_s16 }
  0x1a   : > { %s4878_s24 = scalar_select %p2481_p8, 1, 0 }
  0x1b   : > { %p2071_p10 = pneg %p2481_p8  ;;  %p2498_p12 = scmp.ge.s32.totalorder %s33_s29, 2 }
  0x1c   : > { %s4882_s0 = sld [smem:[#allocation66_spill]] }
  0x1d   : > { %p2493_p11 = pnand %p2071_p10, %p2461_p1 }
  0x1e   : > { %s156_s27 = sshll.u32 %s4879_s1, 4  ;;  %s157_s27 = int_to_ptr.vmem [resolvable:$true] %s156_s27 }
  0x1f   : > { %p2204_p0 = pneg %p2493_p11 }
  0x22   : > { %s2202_s6 = scalar_lea.hbm %s4882_s0, 16 }
  0x23   : > { %p2203_p13 = scmp.ne.s32.totalorder %s4882_s0, %s2202_s6  ;;  %p2209_p7 = scmp.lt.u32.totalorder %s2202_s6, %s4882_s0 }
  0x25   : > { %p2205_p3 = pnand %p2204_p0, %p2203_p13 }
  0x27   : > { %p2206_p5 = pneg %p2205_p3 }
  0x29   : > { %p2211_p10 = pnand %p2209_p7, %p2206_p5 }
  0x2b   : > { %2214 = shalt.err (!%p2211_p10)
}
  0x2c   : > { %s2352_s11 = smov [#allocation4]   ;;  %s2215_s25 = scalar_lea.vmem %s157_s27, 16 }
  0x2d   : > { %2074 = dma.hbm_to_smem (!%p2493_p11), %s4882_s0, 16, %s2352_s11, [#allocation7]  }
  0x2e   : > { %p2216_p9 = scmp.ne.s32.totalorder %s157_s27, %s2215_s25  ;;  %p2223_p1 = scmp.lt.s32.totalorder %s157_s27, %s157_s27 }
  0x2f   : > { %p2224_p13 = scmp.lt.s32.totalorder %s2215_s25, %s2215_s25 }
  0x30   : > { %p2218_p6 = pnand %p2216_p9, %p2204_p0 }
  0x31   : > { %p2225_p3 = por %p2224_p13, %p2223_p1 }
  0x32   : > { %p2219_p4 = pneg %p2218_p6 }
  0x34   : > { %p2226_p8 = pnand %p2225_p3, %p2219_p4 }
  0x36   : > { %2229 = shalt.err (!%p2226_p8)
}
  0x37   : > { %s2353_s26 = smov [#allocation9]   ;;  %s5194_s29 = smov (%p2498_p12, %s33_s29), 0 }
  0x38   : > { %2077 = dma.vmem_to_smem (!%p2493_p11), %s157_s27, 16, %s2353_s26, [#allocation8]  }
  0x39   : > { %4883 = sst [smem:[#allocation23_spill]] %s5194_s29  ;;  %s84_s4 = sadd.s32 1, %s2338_s14 }
  0x3a   : > { %p91_p1 = scmp.ne.s32.totalorder %s2338_s14, %s2334_s13  ;;  %s79_s5 = ssub.s32 %s2346_s16, %s5194_s29 }
  0x3b   : > { %p92_p4 = scmp.eq.s32.totalorder %s2350_s17, 0  ;;  %p82_p6 = scmp.eq.s32.totalorder %s79_s5, 0 }
  0x3c   : > { %p2532_p8 = por %p2465_p2, %p91_p1  ;;  %p2088_p0 = scmp.lt.s32.totalorder %s2350_s17, 2 }
  0x3d   : > { %p93_p9 = por %p92_p4, %p91_p1  ;;  %s167_s7 = sand.u32 1, %s2338_s14  }
  0x3e   : > { %s4884_s28 = scalar_select %p2532_p8, 1, 0 }
  0x3f   : > { %s2538_s6 = scalar_select %p82_p6, %s2338_s14, %s84_s4  }
  0x40   : > { %4885 = sst [smem:[#allocation24_spill]] %s4884_s28  ;;  %s2057_s27 = sshll.u32 %s2346_s16, 7 }
  0x41   : > { %4886 = sst [smem:[#allocation25_spill]] %s2538_s6  ;;  %s1946_s30 = sshll.u32 %s167_s7, 3 }
  0x42   : > { %s4887_s2 = sld [smem:[#allocation68_spill]]  ;;  %s171_s21 = scalar_lea.vmem [#allocation10], %s1946_s30 }
  0x43   : > { %s181_s11 = sshll.u32 %s171_s21, 4  ;;  %p2547_p2 = pnand %p2088_p0, %p93_p9  ;;  %s2551_s11 = int_to_ptr.vmem [resolvable:$true] %s181_s11 }
  0x44   : > { %s168_s19 = scalar_lea.sflag [#allocation5], %s167_s7 }
  0x45   : > { %p2232_p12 = pneg %p2547_p2 }
  0x48   : > { %s2545_s10 = scalar_lea.hbm %s4887_s2, %s2057_s27  ;;  %s2235_s5 = scalar_lea.hbm %s4887_s2, 256 }
  0x49   : > { %s2230_s25 = scalar_lea.hbm %s2545_s10, 128  ;;  %p2236_p10 = scmp.lt.u32.totalorder %s2545_s10, %s4887_s2 }
  0x4a   : > { %p2231_p11 = scmp.ne.s32.totalorder %s2545_s10, %s2230_s25  ;;  %p2237_p13 = scmp.lt.u32.totalorder %s2235_s5, %s2230_s25 }
  0x4b   : > { %p2239_p1 = scmp.lt.u32.totalorder %s2230_s25, %s2545_s10 }
  0x4c   : > { %p2233_p5 = pnand %p2232_p12, %p2231_p11  ;;  %p2238_p3 = por %p2237_p13, %p2236_p10 }
  0x4e   : > { %p2234_p7 = pneg %p2233_p5  ;;  %p2240_p4 = por %p2239_p1, %p2238_p3 }
  0x50   : > { %p2241_p6 = pnand %p2240_p4, %p2234_p7 }
  0x52   : > { %2244 = shalt.err (!%p2241_p6)
}
  0x53   : > { %s2245_s7 = scalar_lea.vmem %s2551_s11, 128  ;;  %s2354_s8 = smov [#allocation10]  }
  0x54   : > { %p2246_p9 = scmp.ne.s32.totalorder %s2551_s11, %s2245_s7  ;;  %s2250_s9 = sshll.u32 %s2354_s8, 4  ;;  %s2251_s9 = int_to_ptr.vmem [resolvable:$false] %s2250_s9 }
  0x55   : > { %s2252_s21 = scalar_lea.vmem %s2251_s9, 256  ;;  %p2253_p5 = scmp.lt.s32.totalorder %s2551_s11, %s2251_s9 }
  0x56   : > { %p2248_p0 = pnand %p2246_p9, %p2232_p12  ;;  %p2254_p10 = scmp.lt.s32.totalorder %s2252_s21, %s2245_s7 }
  0x58   : > { %p2249_p11 = pneg %p2248_p0  ;;  %p2255_p13 = por %p2254_p10, %p2253_p5 }
  0x5a   : > { %p2256_p3 = pnand %p2255_p13, %p2249_p11 }
  0x5c   : > { %2259 = shalt.err (!%p2256_p3)
}
  0x5d   : > { %2081 = dma.hbm_to_vmem [thread:$0]  (!%p2547_p2), %s2545_s10, 128, %s2551_s11, %s168_s19  }
  0x5e   : > { %p4889_p7 = scmp.ne.s32.totalorder %s4878_s24, 0 }
  0x60   : > { %190 = sbr.rel (%p4889_p7) target bundleno = 726 (0x2d6), region = 32 }
  0x67   : > { %p4890_p12 = scmp.ne.s32.totalorder %s4873_s20, 0 }
  0x69   : > { %2313 = dma.done.wait (%p4890_p12), [#allocation7], 16  }
  0x6a   : > { %2315 = vsyncadd (%p4890_p12), [#allocation7], 4294967280 }
  0x6b   : > { %2317 = dma.done.wait (%p4890_p12), [#allocation8], 16  }
  0x6c   : > { %2319 = vsyncadd (%p4890_p12), [#allocation8], 4294967280  ;;  %s2589_s18 = sand.u32 1, %s2334_s13   ;;  %p4892_p2 = scmp.ne.s32.totalorder %s4875_s22, 0 }
  0x6d   : > { %4891 = sst [smem:[#allocation26_spill]] %s2589_s18  ;;  %s1952_s24 = sshll.u32 %s2589_s18, 3 }
  0x6e   : > { %s201_s10 = scalar_lea.sflag [#allocation5], %s2589_s18  ;;  %s204_s11 = scalar_lea.vmem [#allocation10], %s1952_s24 }
  0x6f   : > { %2321 = dma.done.wait (%p4892_p2), %s201_s10, 128  }
  0x70   : > { %2323 = vsyncadd (%p4892_p2), %s201_s10, 4294967168 }
  0x71   : > { %209 = sfence }
  0x72   : > { %v4788_v0 = vlaneseq  ;;  %v238_v1 = vld [vmem:[%s204_s11] sm:$0xff]  ;;  %vm243_vm0 = vcmask 1043456   ;;  %v4893_v5 = vmov 0  ;;  %v2355_v7 = vmov -inf   ;;  %s2358_s20 = smov 51   ;;  %s2359_s22 = smov 50  }
  0x73   : > { %v241_v2 = vcombine.high %v238_v1, %v238_v1  ;;  %v244_v3 = vsel %vm243_vm0, %v238_v1, 0.0  ;;  %v283_v4 = vsel %vm243_vm0, %v238_v1, -inf  ;;  %v2356_v11 = vmov 0.0   ;;  %s2360_s19 = smov 49   ;;  %s2361_s25 = smov 48  }
  0x74   : > { %vm2598_vm1 = vcmp.lt.s32.totalorder %v4788_v0, 256  ;;  %v245_v6 = vrot.slane %v244_v3, 4  ;;  %v284_v9 = vrot.slane %v283_v4, 4  ;;  %v2357_v18 = vmov 1966171168   ;;  %s2362_s26 = smov 47  }
  0x75   : > { %v4894_v5 = vsel %vm2598_vm1, 4294967295, %v4893_v5  ;;  %237 = vst.msk [vmem:[#allocation3] sm:$0x3] %vm2598_vm1, %v2355_v7  ;;  %v251_v8 = vsel %vm243_vm0, %v241_v2, 0.0  ;;  %v290_v10 = vsel %vm243_vm0, %v241_v2, -inf  ;;  %v262_v19 = vunpack.c.l.s4 %v2357_v18  ;;  %s2363_s4 = smov 46  }
  0x76   : > { %4895 = vst [vmem:[#allocation27_spill] sm:$0xff] %v4894_v5  ;;  %236 = vst.msk [vmem:[#allocation2] sm:$0x3] %vm2598_vm1, %v2356_v11  ;;  %v246_v12 = vadd.f32 %v245_v6, %v244_v3  ;;  %v252_v13 = vrot.slane %v251_v8, 4  ;;  %v291_v14 = vrot.slane %v290_v10, 4  ;;  %v285_v15 = vmax.f32 %v283_v4, %v284_v9  ;;  %s2364_s5 = smov 45  }
  0x77   : > { %v265_v25 = vshrl.u32 %v4788_v0, 7  ;;  %v263_v29 = vunpack.c.0.s8 %v262_v19  ;;  %s2365_s27 = smov 35   ;;  %s2366_s30 = smov 34   ;;  %v4908_v5 = vlaneseq }
  0x78   : > { %v247_v16 = vrot.slane %v246_v12, 2  ;;  %v253_v17 = vadd.f32 %v252_v13, %v251_v8  ;;  %v292_v20 = vmax.f32 %v290_v10, %v291_v14  ;;  %v286_v21 = vrot.slane %v285_v15, 2  ;;  %s2367_s7 = smov 33   ;;  %s2368_s8 = smov 32  }
  0x79   : > { %v2607_v37 = vsub.s32 %v263_v29, %v265_v25  ;;  %v2617_v49 = vsub.s32 0, %v265_v25  ;;  %v2619_v50 = vsub.s32 1, %v265_v25  ;;  %s2369_s9 = smov 31   ;;  %s2370_s21 = smov 30  }
  0x7a   : > { %v248_v22 = vadd.f32 %v247_v16, %v246_v12  ;;  %v254_v23 = vrot.slane %v253_v17, 2  ;;  %v293_v24 = vrot.slane %v292_v20, 2  ;;  %v287_v26 = vmax.f32 %v285_v15, %v286_v21  ;;  %s2371_s24 = smov 29   ;;  %s2372_s10 = smov 19  }
  0x7b   : > { %4896 = vst [vmem:[#allocation28_spill] sm:$0xff] %v2607_v37  ;;  %4897 = vst [vmem:[#allocation29_spill] sm:$0xff] %v2617_v49  ;;  %s2373_s11 = smov 18   ;;  %s2901_s0 = sld [smem:[#allocation9 + $0x7]] }
  0x7c   : > { %v249_v27 = vrot.slane %v248_v22, 1  ;;  %v255_v28 = vadd.f32 %v254_v23, %v253_v17  ;;  %v294_v30 = vmax.f32 %v292_v20, %v293_v24  ;;  %v288_v31 = vrot.slane %v287_v26, 1  ;;  %v282_v43 = vld [vmem:[#allocation3] sm:$0x3]  ;;  %4898 = vst [vmem:[#allocation30_spill] sm:$0xff] %v2619_v50  ;;  %s2903_s1 = sld [smem:[#allocation4 + $0x8]] }
  0x7d   : > { %v239_v44 = vld [vmem:[#allocation2] sm:$0x3]  ;;  %s2386_s2 = smov 114   ;;  %s2911_s29 = sld [smem:[#allocation4 + $0x9]] }
  0x7e   : > { %v250_v32 = vadd.f32 %v249_v27, %v248_v22  ;;  %v256_v33 = vrot.slane %v255_v28, 1  ;;  %v295_v34 = vrot.slane %v294_v30, 1  ;;  %v289_v35 = vmax.f32 %v287_v26, %v288_v31  ;;  %s2913_s16 = sld [smem:[#allocation9 + $0x9]]  ;;  %s2916_s6 = sld [smem:[#allocation4 + $0xa]] }
  0x7f   : > { %s2928_s14 = sld [smem:[#allocation9 + $0xa]]  ;;  %s2930_s13 = sld [smem:[#allocation4 + $0xb]] }
  0x80   : > { %v257_v36 = vadd.f32 %v256_v33, %v255_v28  ;;  %v296_v38 = vmax.f32 %v294_v30, %v295_v34  ;;  %s2952_s17 = sld [smem:[#allocation9 + $0xc]]  ;;  %s2978_s23 = sld [smem:[#allocation9 + $0xd]] }
  0x81   : > { %s4822_s12 = smov 113   ;;  %s2991_s3 = sld [smem:[#allocation4 + $0xe]] }
  0x82   : > { %v260_v39 = vcombine.low %v250_v32, %v257_v36  ;;  %v299_v40 = vcombine.low %v289_v35, %v296_v38  ;;  %s2993_s28 = sld [smem:[#allocation9 + $0xe]]  ;;  %s3009_s15 = sld [smem:[#allocation4 + $0xf]] }
  0x83   : > { %4912 = sst [smem:[#allocation43_spill]] %s2911_s29  ;;  %s3018_s18 = sld [smem:[#allocation4 + $0x10]] }
  0x84   : > { %v267_v41 = vrot.slane %v260_v39, %v2607_v37  ;;  %v306_v42 = vrot.slane %v299_v40, %v2607_v37  ;;  %4913 = sst [smem:[#allocation44_spill]] %s2916_s6  ;;  %s3020_s29 = sld [smem:[#allocation9 + $0x10]] }
  0x85   : > { %4916 = sst [smem:[#allocation47_spill]] %s2928_s14  ;;  %s3037_s6 = sld [smem:[#allocation4 + $0x11]] }
  0x86   : > { %v274_v45 = vrot.slane %v267_v41, %v2607_v37  ;;  %v313_v46 = vrot.slane %v306_v42, %v2607_v37  ;;  %v2874_v37 = vand.u32 127, %v4908_v5  ;;  %4917 = sst [smem:[#allocation48_spill]] %s2930_s13  ;;  %s4925_s13 = smov 113  }
  0x87   : > { %s3039_s14 = sld [smem:[#allocation9 + $0x11]] }
  0x88   : > { %v315_v47 = vmax.f32 %v282_v43, %v313_v46  ;;  %v276_v48 = vadd.f32 %v274_v45, %v239_v44  ;;  %vm388_vm2 = vcmp.lt.s32.totalorder %v2874_v37, 51  ;;  %vm428_vm3 = vcmp.lt.s32.totalorder %v2874_v37, 50 }
  0x89   : > { %vm349_vm4 = vcmp.ge.s32.totalorder %v2874_v37, 48  ;;  %vm457_vm6 = vcmp.lt.s32.totalorder %v2874_v37, 49  ;;  %vm486_vm11 = vcmp.lt.s32.totalorder %v2874_v37, 48  ;;  %4923 = sst [smem:[#allocation54_spill]] %s3018_s18  ;;  %vm513_vm12 = vcmp.lt.s32.totalorder %v2874_v37, 47  ;;  %s2389_s18 = smov 111  }
  0x8a   : > { %316 = vst.msk [vmem:[#allocation3] sm:$0x3] %vm2598_vm1, %v315_v47  ;;  %281 = vst.msk [vmem:[#allocation2] sm:$0x3] %vm2598_vm1, %v276_v48  ;;  %4924 = sst [smem:[#allocation55_spill]] %s3020_s29  ;;  %vm542_vm15 = vcmp.lt.s32.totalorder %v2874_v37, 46 }
  0x8b   : > { %s5005_s29 = sld [smem:[#allocation48_spill]] }
  0x91   : > { %v2621_v51 = vld [vmem:[#allocation3] sm:$0x3]  ;;  %v2623_v52 = vld [vmem:[#allocation2] sm:$0x3] }
  0x92   : > { %v2627_v53 = vrot.slane %v2621_v51, %v2617_v49  ;;  %v2631_v54 = vrot.slane %v2623_v52, %v2617_v49  ;;  %v2637_v55 = vrot.slane %v2621_v51, %v2619_v50  ;;  %v2641_v56 = vrot.slane %v2623_v52, %v2619_v50 }
  0x93   : > { %v2897_v49 = vadd.s32 128, %v2874_v37 }
  0x94   : > { %402 = vrot.lane.b32.xlu1 %v2627_v53, %s2358_s20  ;;  %384 = vrot.lane.b32.xlu0 %v2631_v54, %s2358_s20 }
  0x95   : > { %4911 = vst [vmem:[#allocation42_spill] sm:$0xff] %v2897_v49 }
  0x98   : > { %404 = vrot.lane.b32.xlu1 %v2637_v55, %s2358_s20  ;;  %386 = vrot.lane.b32.xlu0 %v2641_v56, %s2358_s20  ;;  %s2374_s20 = smov 17  }
  0x9c   : > { %426 = vrot.lane.b32.xlu1 %v2641_v56, %s2359_s22  ;;  %424 = vrot.lane.b32.xlu0 %v2631_v54, %s2359_s22 }
  0xa0   : > { %433 = vrot.lane.b32.xlu1 %v2637_v55, %s2359_s22  ;;  %431 = vrot.lane.b32.xlu0 %v2627_v53, %s2359_s22  ;;  %s2375_s22 = smov 16  }
  0xa4   : > { %455 = vrot.lane.b32.xlu1 %v2641_v56, %s2360_s19  ;;  %453 = vrot.lane.b32.xlu0 %v2631_v54, %s2360_s19 }
  0xa8   : > { %462 = vrot.lane.b32.xlu1 %v2637_v55, %s2360_s19  ;;  %460 = vrot.lane.b32.xlu0 %v2627_v53, %s2360_s19  ;;  %s2376_s19 = smov 15  }
  0xac   : > { %484 = vrot.lane.b32.xlu1 %v2641_v56, %s2361_s25  ;;  %482 = vrot.lane.b32.xlu0 %v2631_v54, %s2361_s25 }
  0xb0   : > { %491 = vrot.lane.b32.xlu1 %v2637_v55, %s2361_s25  ;;  %489 = vrot.lane.b32.xlu0 %v2627_v53, %s2361_s25  ;;  %s2377_s25 = smov 14  }
  0xb4   : > { %511 = vrot.lane.b32.xlu1 %v2641_v56, %s2362_s26  ;;  %509 = vrot.lane.b32.xlu0 %v2631_v54, %s2362_s26 }
  0xb8   : > { %518 = vrot.lane.b32.xlu1 %v2637_v55, %s2362_s26  ;;  %516 = vrot.lane.b32.xlu0 %v2627_v53, %s2362_s26  ;;  %s2378_s26 = smov 13  }
  0xbc   : > { %540 = vrot.lane.b32.xlu1 %v2641_v56, %s2363_s4  ;;  %538 = vrot.lane.b32.xlu0 %v2631_v54, %s2363_s4 }
  0xc0   : > { %547 = vrot.lane.b32.xlu1 %v2637_v55, %s2363_s4  ;;  %545 = vrot.lane.b32.xlu0 %v2627_v53, %s2363_s4  ;;  %s2379_s4 = smov 3  }
  0xc4   : > { %569 = vrot.lane.b32.xlu1 %v2641_v56, %s2364_s5  ;;  %567 = vrot.lane.b32.xlu0 %v2631_v54, %s2364_s5 }
  0xc8   : > { %576 = vrot.lane.b32.xlu1 %v2637_v55, %s2364_s5  ;;  %574 = vrot.lane.b32.xlu0 %v2627_v53, %s2364_s5  ;;  %s2380_s5 = smov 2  }
  0xcc   : > { %598 = vrot.lane.b32.xlu1 %v2641_v56, %s2365_s27  ;;  %596 = vrot.lane.b32.xlu0 %v2631_v54, %s2365_s27 }
  0xd0   : > { %605 = vrot.lane.b32.xlu1 %v2637_v55, %s2365_s27  ;;  %603 = vrot.lane.b32.xlu0 %v2627_v53, %s2365_s27  ;;  %s2381_s27 = smov 1  }
  0xd4   : > { %627 = vrot.lane.b32.xlu1 %v2641_v56, %s2366_s30  ;;  %625 = vrot.lane.b32.xlu0 %v2631_v54, %s2366_s30 }
  0xd8   : > { %634 = vrot.lane.b32.xlu1 %v2637_v55, %s2366_s30  ;;  %632 = vrot.lane.b32.xlu0 %v2627_v53, %s2366_s30  ;;  %s2382_s30 = smov 127  }
  0xdc   : > { %656 = vrot.lane.b32.xlu1 %v2641_v56, %s2367_s7  ;;  %654 = vrot.lane.b32.xlu0 %v2631_v54, %s2367_s7 }
  0xe0   : > { %663 = vrot.lane.b32.xlu1 %v2637_v55, %s2367_s7  ;;  %661 = vrot.lane.b32.xlu0 %v2627_v53, %s2367_s7  ;;  %s2383_s7 = smov 126  }
  0xe4   : > { %685 = vrot.lane.b32.xlu1 %v2641_v56, %s2368_s8  ;;  %683 = vrot.lane.b32.xlu0 %v2631_v54, %s2368_s8 }
  0xe8   : > { %692 = vrot.lane.b32.xlu1 %v2637_v55, %s2368_s8  ;;  %690 = vrot.lane.b32.xlu0 %v2627_v53, %s2368_s8  ;;  %s2384_s8 = smov 125  }
  0xec   : > { %712 = vrot.lane.b32.xlu1 %v2641_v56, %s2369_s9  ;;  %710 = vrot.lane.b32.xlu0 %v2631_v54, %s2369_s9 }
  0xf0   : > { %719 = vrot.lane.b32.xlu1 %v2637_v55, %s2369_s9  ;;  %717 = vrot.lane.b32.xlu0 %v2627_v53, %s2369_s9  ;;  %s2853_s9 = sld [smem:[#allocation9]] }
  0xf4   : > { %741 = vrot.lane.b32.xlu1 %v2641_v56, %s2370_s21  ;;  %739 = vrot.lane.b32.xlu0 %v2631_v54, %s2370_s21 }
  0xf8   : > { %748 = vrot.lane.b32.xlu1 %v2637_v55, %s2370_s21  ;;  %746 = vrot.lane.b32.xlu0 %v2627_v53, %s2370_s21  ;;  %s2855_s21 = sld [smem:[#allocation4]] }
  0xfc   : > { %770 = vrot.lane.b32.xlu1 %v2641_v56, %s2371_s24  ;;  %768 = vrot.lane.b32.xlu0 %v2631_v54, %s2371_s24 }
 0x100   : > { %777 = vrot.lane.b32.xlu1 %v2637_v55, %s2371_s24  ;;  %775 = vrot.lane.b32.xlu0 %v2627_v53, %s2371_s24  ;;  %s2857_s24 = sld [smem:[#allocation4 + $0x1]] }
 0x104   : > { %799 = vrot.lane.b32.xlu1 %v2641_v56, %s2372_s10  ;;  %797 = vrot.lane.b32.xlu0 %v2631_v54, %s2372_s10 }
 0x106   : > { %v2699_v57 = vpop.permute.xlu1 %402  ;;  %v2701_v58 = vpop.permute.xlu0 %384 }
 0x108   : > { %806 = vrot.lane.b32.xlu1 %v2637_v55, %s2372_s10  ;;  %804 = vrot.lane.b32.xlu0 %v2627_v53, %s2372_s10  ;;  %s2385_s10 = smov 115  }
 0x10a   : > { %v2705_v59 = vpop.permute.xlu1 %404  ;;  %v2707_v60 = vpop.permute.xlu0 %386 }
 0x10c   : > { %828 = vrot.lane.b32.xlu1 %v2641_v56, %s2373_s11  ;;  %826 = vrot.lane.b32.xlu0 %v2631_v54, %s2373_s11 }
 0x10e   : > { %v2711_v61 = vpop.permute.xlu1 %426  ;;  %v2713_v62 = vpop.permute.xlu0 %424 }
 0x110   : > { %835 = vrot.lane.b32.xlu1 %v2637_v55, %s2373_s11  ;;  %833 = vrot.lane.b32.xlu0 %v2627_v53, %s2373_s11  ;;  %s2860_s11 = sld [smem:[#allocation9 + $0x1]] }
 0x112   : > { %v2717_v63 = vpop.permute.xlu1 %433  ;;  %v2719_v1 = vpop.permute.xlu0 %431 }
 0x114   : > { %857 = vrot.lane.b32.xlu1 %v2641_v56, %s2374_s20  ;;  %855 = vrot.lane.b32.xlu0 %v2631_v54, %s2374_s20 }
 0x116   : > { %v2723_v2 = vpop.permute.xlu1 %455  ;;  %v2725_v3 = vpop.permute.xlu0 %453 }
 0x118   : > { %864 = vrot.lane.b32.xlu1 %v2637_v55, %s2374_s20  ;;  %862 = vrot.lane.b32.xlu0 %v2627_v53, %s2374_s20  ;;  %s2862_s20 = sld [smem:[#allocation4 + $0x2]] }
 0x11a   : > { %v2729_v4 = vpop.permute.xlu1 %462  ;;  %v2731_v6 = vpop.permute.xlu0 %460 }
 0x11c   : > { %886 = vrot.lane.b32.xlu1 %v2641_v56, %s2375_s22  ;;  %884 = vrot.lane.b32.xlu0 %v2631_v54, %s2375_s22 }
 0x11e   : > { %v2735_v7 = vpop.permute.xlu1 %484  ;;  %v2737_v8 = vpop.permute.xlu0 %482 }
 0x120   : > { %893 = vrot.lane.b32.xlu1 %v2637_v55, %s2375_s22  ;;  %891 = vrot.lane.b32.xlu0 %v2627_v53, %s2375_s22  ;;  %s2865_s22 = sld [smem:[#allocation9 + $0x2]] }
 0x122   : > { %v2741_v9 = vpop.permute.xlu1 %491  ;;  %v2743_v10 = vpop.permute.xlu0 %489 }
 0x124   : > { %913 = vrot.lane.b32.xlu1 %v2641_v56, %s2376_s19  ;;  %911 = vrot.lane.b32.xlu0 %v2631_v54, %s2376_s19 }
 0x126   : > { %v2747_v11 = vpop.permute.xlu1 %511  ;;  %v2749_v12 = vpop.permute.xlu0 %509 }
 0x128   : > { %920 = vrot.lane.b32.xlu1 %v2637_v55, %s2376_s19  ;;  %918 = vrot.lane.b32.xlu0 %v2627_v53, %s2376_s19  ;;  %s2867_s19 = sld [smem:[#allocation4 + $0x3]] }
 0x12a   : > { %v2753_v13 = vpop.permute.xlu1 %518  ;;  %v2755_v14 = vpop.permute.xlu0 %516 }
 0x12c   : > { %942 = vrot.lane.b32.xlu1 %v2641_v56, %s2377_s25  ;;  %940 = vrot.lane.b32.xlu0 %v2631_v54, %s2377_s25 }
 0x12e   : > { %v2759_v15 = vpop.permute.xlu1 %540  ;;  %v2761_v16 = vpop.permute.xlu0 %538 }
 0x130   : > { %949 = vrot.lane.b32.xlu1 %v2637_v55, %s2377_s25  ;;  %947 = vrot.lane.b32.xlu0 %v2627_v53, %s2377_s25  ;;  %s2876_s25 = sld [smem:[#allocation9 + $0x3]] }
 0x132   : > { %v2765_v17 = vpop.permute.xlu1 %547  ;;  %v2767_v18 = vpop.permute.xlu0 %545 }
 0x134   : > { %971 = vrot.lane.b32.xlu1 %v2641_v56, %s2378_s26  ;;  %969 = vrot.lane.b32.xlu0 %v2631_v54, %s2378_s26 }
 0x136   : > { %v2771_v19 = vpop.permute.xlu1 %569  ;;  %v2773_v20 = vpop.permute.xlu0 %567 }
 0x138   : > { %978 = vrot.lane.b32.xlu1 %v2637_v55, %s2378_s26  ;;  %976 = vrot.lane.b32.xlu0 %v2627_v53, %s2378_s26  ;;  %s2878_s26 = sld [smem:[#allocation4 + $0x4]] }
 0x13a   : > { %v2777_v21 = vpop.permute.xlu1 %576  ;;  %v2779_v22 = vpop.permute.xlu0 %574 }
 0x13c   : > { %1000 = vrot.lane.b32.xlu1 %v2641_v56, %s2379_s4  ;;  %998 = vrot.lane.b32.xlu0 %v2631_v54, %s2379_s4 }
 0x13e   : > { %v2783_v23 = vpop.permute.xlu1 %598  ;;  %v2785_v24 = vpop.permute.xlu0 %596 }
 0x140   : > { %1007 = vrot.lane.b32.xlu1 %v2637_v55, %s2379_s4  ;;  %1005 = vrot.lane.b32.xlu0 %v2627_v53, %s2379_s4  ;;  %s2880_s4 = sld [smem:[#allocation9 + $0x4]] }
 0x142   : > { %v2789_v25 = vpop.permute.xlu1 %605  ;;  %v2791_v26 = vpop.permute.xlu0 %603 }
 0x144   : > { %1027 = vrot.lane.b32.xlu1 %v2641_v56, %s2380_s5  ;;  %1025 = vrot.lane.b32.xlu0 %v2631_v54, %s2380_s5 }
 0x146   : > { %v2795_v27 = vpop.permute.xlu1 %627  ;;  %v2797_v28 = vpop.permute.xlu0 %625 }
 0x148   : > { %1034 = vrot.lane.b32.xlu1 %v2637_v55, %s2380_s5  ;;  %1032 = vrot.lane.b32.xlu0 %v2627_v53, %s2380_s5  ;;  %s2882_s5 = sld [smem:[#allocation4 + $0x5]] }
 0x14a   : > { %v2801_v29 = vpop.permute.xlu1 %634  ;;  %v2803_v30 = vpop.permute.xlu0 %632 }
 0x14c   : > { %1054 = vrot.lane.b32.xlu1 %v2641_v56, %s2381_s27  ;;  %1052 = vrot.lane.b32.xlu0 %v2631_v54, %s2381_s27 }
 0x14e   : > { %v2807_v31 = vpop.permute.xlu1 %656  ;;  %v2809_v32 = vpop.permute.xlu0 %654 }
 0x150   : > { %1061 = vrot.lane.b32.xlu1 %v2637_v55, %s2381_s27  ;;  %1059 = vrot.lane.b32.xlu0 %v2627_v53, %s2381_s27  ;;  %s2885_s27 = sld [smem:[#allocation9 + $0x5]] }
 0x152   : > { %v2813_v33 = vpop.permute.xlu1 %663  ;;  %v2815_v34 = vpop.permute.xlu0 %661 }
 0x154   : > { %1101 = vrot.lane.b32.xlu1 %v2641_v56, %s2382_s30  ;;  %1099 = vrot.lane.b32.xlu0 %v2631_v54, %s2382_s30 }
 0x156   : > { %v2819_v35 = vpop.permute.xlu1 %685  ;;  %v2821_v36 = vpop.permute.xlu0 %683 }
 0x158   : > { %1108 = vrot.lane.b32.xlu1 %v2637_v55, %s2382_s30  ;;  %1106 = vrot.lane.b32.xlu0 %v2627_v53, %s2382_s30  ;;  %s2888_s30 = sld [smem:[#allocation4 + $0x6]] }
 0x15a   : > { %v2825_v38 = vpop.permute.xlu1 %692  ;;  %v2827_v39 = vpop.permute.xlu0 %690 }
 0x15c   : > { %1128 = vrot.lane.b32.xlu1 %v2641_v56, %s2383_s7  ;;  %1126 = vrot.lane.b32.xlu0 %v2631_v54, %s2383_s7 }
 0x15e   : > { %v2831_v40 = vpop.permute.xlu1 %712  ;;  %v2833_v41 = vpop.permute.xlu0 %710 }
 0x15f   : > { %4899 = vst [vmem:[#allocation31_spill] sm:$0xff] %v2831_v40  ;;  %4900 = vst [vmem:[#allocation32_spill] sm:$0xff] %v2833_v41  ;;  %v407_v40 = vsel %vm388_vm2, %v2705_v59, %v2699_v57  ;;  %v389_v41 = vsel %vm388_vm2, %v2701_v58, %v2707_v60 }
 0x160   : > { %1135 = vrot.lane.b32.xlu1 %v2637_v55, %s2383_s7  ;;  %1133 = vrot.lane.b32.xlu0 %v2627_v53, %s2383_s7  ;;  %s2890_s7 = sld [smem:[#allocation9 + $0x6]] }
 0x162   : > { %v2837_v42 = vpop.permute.xlu1 %719  ;;  %v2839_v43 = vpop.permute.xlu0 %717 }
 0x163   : > { %4901 = vst [vmem:[#allocation33_spill] sm:$0xff] %v2837_v42 }
 0x164   : > { %1155 = vrot.lane.b32.xlu1 %v2641_v56, %s2384_s8  ;;  %1153 = vrot.lane.b32.xlu0 %v2631_v54, %s2384_s8 }
 0x166   : > { %v2843_v44 = vpop.permute.xlu1 %741  ;;  %v2845_v45 = vpop.permute.xlu0 %739 }
 0x167   : > { %4902 = vst [vmem:[#allocation34_spill] sm:$0xff] %v2843_v44  ;;  %4903 = vst [vmem:[#allocation35_spill] sm:$0xff] %v2845_v45 }
 0x168   : > { %1162 = vrot.lane.b32.xlu1 %v2637_v55, %s2384_s8  ;;  %1160 = vrot.lane.b32.xlu0 %v2627_v53, %s2384_s8  ;;  %s2899_s8 = sld [smem:[#allocation4 + $0x7]] }
 0x16a   : > { %v2849_v46 = vpop.permute.xlu1 %748  ;;  %v2851_v47 = vpop.permute.xlu0 %746 }
 0x16b   : > { %4904 = vst [vmem:[#allocation36_spill] sm:$0xff] %v2849_v46  ;;  %4905 = vst [vmem:[#allocation37_spill] sm:$0xff] %v2851_v47  ;;  %v2909_v46 = vand.u32 15, %v2874_v37 }
 0x16c   : > { %1182 = vrot.lane.b32.xlu1 %v2641_v56, %s2385_s10  ;;  %1180 = vrot.lane.b32.xlu0 %v2631_v54, %s2385_s10 }
 0x16d   : > { %vm4851_vm5 = vcmp.ge.s32.totalorder %v2909_v46, 3  ;;  %vm4840_vm7 = vcmp.ge.s32.totalorder %v2909_v46, 2  ;;  %vm4841_vm9 = vcmp.ge.s32.totalorder %v2909_v46, 1 }
 0x16e   : > { %v2869_v48 = vpop.permute.xlu1 %770  ;;  %v2871_v0 = vpop.permute.xlu0 %768  ;;  %vm3083_vm14 = vmand %vm349_vm4, %vm4851_vm5 }
 0x16f   : > { %4906 = vst [vmem:[#allocation38_spill] sm:$0xff] %v2869_v48  ;;  %4907 = vst [vmem:[#allocation39_spill] sm:$0xff] %v2871_v0  ;;  %v413_v0 = vstv %s2853_s9  ;;  %s2943_s9 = sld [smem:[#allocation9 + $0xb]] }
 0x170   : > { %1189 = vrot.lane.b32.xlu1 %v2637_v55, %s2385_s10  ;;  %1187 = vrot.lane.b32.xlu0 %v2627_v53, %s2385_s10  ;;  %s2905_s10 = sld [smem:[#allocation9 + $0x8]]  ;;  %vm3105_vm0 = vmand %vm349_vm4, %vm4840_vm7 }
 0x172   : > { %v2892_v5 = vpop.permute.xlu1 %777  ;;  %v2894_v50 = vpop.permute.xlu0 %775 }
 0x173   : > { %4909 = vst [vmem:[#allocation40_spill] sm:$0xff] %v2892_v5  ;;  %4910 = vst [vmem:[#allocation41_spill] sm:$0xff] %v2894_v50  ;;  %v2925_v5 = vand.u32 15, %v2897_v49  ;;  %v409_v50 = vstv %s2855_s21  ;;  %s2950_s21 = sld [smem:[#allocation4 + $0xc]] }
 0x174   : > { %1211 = vrot.lane.b32.xlu1 %v2641_v56, %s2386_s2  ;;  %1209 = vrot.lane.b32.xlu0 %v2631_v54, %s2386_s2 }
 0x175   : > { %4918 = sst [smem:[#allocation49_spill]] %s2943_s9  ;;  %vm4850_vm8 = vcmp.ge.s32.totalorder %v2925_v5, 3  ;;  %vm4839_vm10 = vcmp.ge.s32.totalorder %v2925_v5, 2  ;;  %vm4845_vm13 = vcmp.ge.s32.totalorder %v2925_v5, 1  ;;  %s3065_s9 = sld [smem:[#allocation9 + $0x12]]  ;;  %vm364_vm7 = vcmp.lt.s32.totalorder %v2925_v5, 15 }
 0x176   : > { %v2918_v47 = vpop.permute.xlu1 %799  ;;  %v2920_v48 = vpop.permute.xlu0 %797 }
 0x177   : > { %4914 = vst [vmem:[#allocation45_spill] sm:$0xff] %v2918_v47  ;;  %4915 = vst [vmem:[#allocation46_spill] sm:$0xff] %v2920_v48  ;;  %v390_v48 = vsel %vm388_vm2, %v2707_v60, %v2701_v58  ;;  %v406_v47 = vsel %vm388_vm2, %v2699_v57, %v2705_v59  ;;  %v435_v58 = vsel %vm428_vm3, %v2719_v1, %v2717_v63  ;;  %vm571_vm2 = vcmp.lt.s32.totalorder %v2874_v37, 45 }
 0x178   : > { %1218 = vrot.lane.b32.xlu1 %v2637_v55, %s2386_s2  ;;  %1216 = vrot.lane.b32.xlu0 %v2627_v53, %s2386_s2  ;;  %s2976_s2 = sld [smem:[#allocation4 + $0xd]]  ;;  %v436_v60 = vsel %vm428_vm3, %v2717_v63, %v2719_v1  ;;  %v411_v63 = vmul.f32 %v409_v50, %v389_v41  ;;  %v429_v1 = vsel %vm428_vm3, %v2713_v62, %v2711_v61 }
 0x17a   : > { %v2954_v49 = vpop.permute.xlu1 %806  ;;  %v2956_v45 = vpop.permute.xlu0 %804 }
 0x17b   : > { %4919 = vst [vmem:[#allocation50_spill] sm:$0xff] %v2954_v49  ;;  %4920 = vst [vmem:[#allocation51_spill] sm:$0xff] %v2956_v45  ;;  %v414_v49 = vmul.f32 %v413_v0, %v407_v40  ;;  %v410_v45 = vmul.f32 %v409_v50, %v390_v48  ;;  %v415_v40 = vmul.f32 %v413_v0, %v406_v47  ;;  %v4926_v50 = vstv %s2860_s11  ;;  %s3063_s11 = sld [smem:[#allocation4 + $0x12]] }
 0x17c   : > { %1240 = vrot.lane.b32.xlu1 %v2641_v56, %s4822_s12  ;;  %1238 = vrot.lane.b32.xlu0 %v2631_v54, %s4822_s12  ;;  %s3011_s12 = sld [smem:[#allocation9 + $0xf]]  ;;  %v430_v0 = vsel %vm428_vm3, %v2711_v61, %v2713_v62  ;;  %v465_v47 = vsel %vm457_vm6, %v2729_v4, %v2731_v6  ;;  %v443_v41 = vmul.f32 %v4926_v50, %v436_v60  ;;  %vm3136_vm3 = vmand %vm349_vm4, %vm4841_vm9  ;;  %vm600_vm9 = vcmp.lt.s32.totalorder %v2874_v37, 35 }
 0x17d   : > { %v4927_v42 = vmov %v4926_v50  ;;  %v464_v62 = vsel %vm457_vm6, %v2731_v6, %v2729_v4  ;;  %v3053_v57 = vadd.f32 %v414_v49, %v410_v45  ;;  %v4929_v4 = vstv %s2857_s24  ;;  %s3117_s24 = sld [smem:[#allocation4 + $0x13]] }
 0x17e   : > { %v3007_v59 = vpop.permute.xlu1 %828  ;;  %v3016_v44 = vpop.permute.xlu0 %826  ;;  %v444_v61 = vmul.f32 %v4927_v42, %v435_v58  ;;  %v459_v42 = vsel %vm457_vm6, %v2723_v2, %v2725_v3  ;;  %v439_v6 = vmul.f32 %v4929_v4, %v430_v0  ;;  %v4930_v49 = vmov %v4929_v4 }
 0x17f   : > { %4921 = vst [vmem:[#allocation52_spill] sm:$0xff] %v3007_v59  ;;  %4922 = vst [vmem:[#allocation53_spill] sm:$0xff] %v3016_v44  ;;  %v440_v45 = vmul.f32 %v4930_v49, %v429_v1  ;;  %v458_v48 = vsel %vm457_vm6, %v2725_v3, %v2723_v2  ;;  %v4931_v59 = vstv %s2865_s22  ;;  %v417_v1 = vadd.f32 %v415_v40, %v411_v63  ;;  %s3195_s22 = sld [smem:[#allocation9 + $0x13]] }
 0x180   : > { %1247 = vrot.lane.b32.xlu1 %v2637_v55, %s4925_s13  ;;  %1245 = vrot.lane.b32.xlu0 %v2627_v53, %s4925_s13  ;;  %v472_v58 = vmul.f32 %v4931_v59, %v465_v47  ;;  %v4935_v0 = vmov %v4931_v59  ;;  %s2388_s13 = smov 112   ;;  %v3094_v59 = vadd.f32 %v443_v41, %v439_v6  ;;  %v4936_v49 = vstv %s2862_s20  ;;  %s3162_s20 = sld [smem:[#allocation4 + $0x18]] }
 0x181   : > { %v473_v4 = vmul.f32 %v4935_v0, %v464_v62  ;;  %v446_v47 = vadd.f32 %v444_v61, %v440_v45  ;;  %v4939_v62 = vmov %v4936_v49  ;;  %vm4852_vm6 = vcmp.lt.s32.totalorder %v2909_v46, 15 }
 0x182   : > { %v3061_v50 = vpop.permute.xlu1 %835  ;;  %v3077_v60 = vpop.permute.xlu0 %833  ;;  %v469_v0 = vmul.f32 %v4939_v62, %v458_v48  ;;  %v3130_v62 = vsel %vm4850_vm8, %v417_v1, 0.0  ;;  %v521_v48 = vsel %vm513_vm12, %v2753_v13, %v2755_v14  ;;  %v487_v1 = vsel %vm486_vm11, %v2737_v8, %v2735_v7  ;;  %vm3295_vm5 = vmand %vm349_vm4, %vm4852_vm6 }
 0x183   : > { %4928 = vst [vmem:[#allocation56_spill] sm:$0xff] %v3061_v50  ;;  %4932 = vst [vmem:[#allocation57_spill] sm:$0xff] %v3077_v60  ;;  %v468_v50 = vmul.f32 %v4936_v49, %v459_v42  ;;  %v3150_v40 = vsel %vm4839_vm10, %v446_v47, 0.0  ;;  %v520_v47 = vsel %vm513_vm12, %v2755_v14, %v2753_v13  ;;  %vm4853_vm10 = vcmp.lt.s32.totalorder %v2909_v46, 14 }
 0x184   : > { %1269 = vrot.lane.b32.xlu1 %v2641_v56, %s2388_s13  ;;  %1267 = vrot.lane.b32.xlu0 %v2631_v54, %s2388_s13  ;;  %v475_v42 = vadd.f32 %v473_v4, %v469_v0  ;;  %v488_v4 = vsel %vm486_vm11, %v2735_v7, %v2737_v8  ;;  %v494_v0 = vsel %vm486_vm11, %v2741_v9, %v2743_v10  ;;  %v4946_v8 = vstv %s2867_s19  ;;  %s3253_s19 = sld [smem:[#allocation4 + $0x14]]  ;;  %vm3321_vm6 = vmand %vm349_vm4, %vm4853_vm10 }
 0x185   : > { %v3122_v49 = vadd.f32 %v472_v58, %v468_v50  ;;  %v493_v13 = vsel %vm486_vm11, %v2743_v10, %v2741_v9  ;;  %v515_v14 = vsel %vm513_vm12, %v2747_v11, %v2749_v12  ;;  %v497_v9 = vmul.f32 %v4946_v8, %v488_v4 }
 0x186   : > { %v3115_v6 = vpop.permute.xlu1 %857  ;;  %v3125_v2 = vpop.permute.xlu0 %855  ;;  %v3201_v7 = vsel %vm4845_vm13, %v475_v42, 0.0  ;;  %v4947_v10 = vstv %s2876_s25  ;;  %v514_v3 = vsel %vm513_vm12, %v2749_v12, %v2747_v11  ;;  %vm4861_vm11 = vcmp.lt.s32.totalorder %v2909_v46, 13  ;;  %s3270_s25 = sld [smem:[#allocation9 + $0x14]] }
 0x187   : > { %4940 = vst [vmem:[#allocation58_spill] sm:$0xff] %v3115_v6  ;;  %4941 = vst [vmem:[#allocation59_spill] sm:$0xff] %v3125_v2  ;;  %v501_v50 = vmul.f32 %v4947_v10, %v494_v0  ;;  %v4948_v42 = vstv %s2880_s4  ;;  %vm368_vm13 = vcmp.lt.s32.totalorder %v2925_v5, 14  ;;  %v549_v11 = vsel %vm542_vm15, %v2767_v18, %v2765_v17  ;;  %s2390_s4 = smov 110  }
 0x188   : > { %1276 = vrot.lane.b32.xlu1 %v2637_v55, %s2388_s13  ;;  %1274 = vrot.lane.b32.xlu0 %v2627_v53, %s2388_s13  ;;  %s3197_s13 = sld [smem:[#allocation9 + $0x18]]  ;;  %v528_v45 = vmul.f32 %v4948_v42, %v521_v48  ;;  %v4949_v2 = vmov %v4948_v42  ;;  %v550_v12 = vsel %vm542_vm15, %v2765_v17, %v2767_v18  ;;  %v4950_v0 = vmov %v4946_v8  ;;  %vm3351_vm8 = vmand %vm349_vm4, %vm4861_vm11 }
 0x189   : > { %v529_v4 = vmul.f32 %v4949_v2, %v520_v47  ;;  %v498_v48 = vmul.f32 %v4950_v0, %v487_v1  ;;  %v4951_v8 = vmov %v4947_v10  ;;  %v4952_v47 = vstv %s2878_s26  ;;  %s3272_s26 = sld [smem:[#allocation4 + $0x15]] }
 0x18a   : > { %v3173_v58 = vpop.permute.xlu1 %864  ;;  %v3193_v41 = vpop.permute.xlu0 %862  ;;  %v502_v2 = vmul.f32 %v4951_v8, %v493_v13  ;;  %v524_v10 = vmul.f32 %v4952_v47, %v515_v14  ;;  %v543_v60 = vsel %vm542_vm15, %v2761_v16, %v2759_v15  ;;  %v544_v17 = vsel %vm542_vm15, %v2759_v15, %v2761_v16  ;;  %4954 = sst [smem:[#allocation62_spill]] %s3253_s19  ;;  %s3551_s19 = sld [smem:[#allocation4 + $0x1b]] }
 0x18b   : > { %4944 = vst [vmem:[#allocation60_spill] sm:$0xff] %v3173_v58  ;;  %4945 = vst [vmem:[#allocation61_spill] sm:$0xff] %v3193_v41  ;;  %v4953_v41 = vmov %v4952_v47  ;;  %v579_v18 = vsel %vm571_vm2, %v2777_v21, %v2779_v22  ;;  %vm372_vm12 = vcmp.lt.s32.totalorder %v2925_v5, 13  ;;  %v578_v15 = vsel %vm571_vm2, %v2779_v22, %v2777_v21 }
 0x18c   : > { %1296 = vrot.lane.b32.xlu1 %v2641_v56, %s2389_s18  ;;  %1294 = vrot.lane.b32.xlu0 %v2631_v54, %s2389_s18  ;;  %v525_v58 = vmul.f32 %v4953_v41, %v514_v3  ;;  %v503_v3 = vadd.f32 %v501_v50, %v497_v9  ;;  %v4955_v41 = vstv %s2885_s27  ;;  %v530_v16 = vadd.f32 %v528_v45, %v524_v10  ;;  %4957 = sst [smem:[#allocation63_spill]] %s3270_s25  ;;  %s3336_s27 = sld [smem:[#allocation9 + $0x16]] }
 0x18d   : > { %v557_v13 = vmul.f32 %v4955_v41, %v550_v12  ;;  %v4956_v14 = vmov %v4955_v41  ;;  %v573_v50 = vsel %vm571_vm2, %v2771_v19, %v2773_v20  ;;  %v1080_v9 = vstv %s3162_s20  ;;  %s4988_s20 = sld [smem:[#allocation47_spill]]  ;;  %s3553_s25 = sld [smem:[#allocation9 + $0x1b]] }
 0x18e   : > { %v3234_v42 = vpop.permute.xlu1 %886  ;;  %v3251_v1 = vpop.permute.xlu0 %884  ;;  %v558_v0 = vmul.f32 %v4956_v14, %v549_v11  ;;  %v531_v8 = vadd.f32 %v529_v4, %v525_v58  ;;  %v4958_v21 = vstv %s2882_s5  ;;  %v572_v58 = vsel %vm571_vm2, %v2773_v20, %v2771_v19  ;;  %s3315_s5 = sld [smem:[#allocation4 + $0x16]] }
 0x18f   : > { %v553_v22 = vmul.f32 %v4958_v21, %v544_v17  ;;  %v4959_v11 = vmov %v4958_v21  ;;  %v4960_v4 = vstv %s2890_s7  ;;  %vm4862_vm15 = vcmp.ge.s32.totalorder %v2874_v37, 32  ;;  %s4985_s7 = sld [smem:[#allocation43_spill]] }
 0x190   : > { %1303 = vrot.lane.b32.xlu1 %v2637_v55, %s2389_s18  ;;  %1301 = vrot.lane.b32.xlu0 %v2627_v53, %s2389_s18  ;;  %v554_v45 = vmul.f32 %v4959_v11, %v543_v60  ;;  %v586_v12 = vmul.f32 %v4960_v4, %v579_v18  ;;  %v3289_v10 = vadd.f32 %v502_v2, %v498_v48  ;;  %vm658_vm2 = vcmp.lt.s32.totalorder %v2874_v37, 33  ;;  %s3305_s18 = sld [smem:[#allocation9 + $0x15]] }
 0x191   : > { %v4963_v19 = vmov %v4960_v4  ;;  %v1083_v48 = vstv %s3197_s13  ;;  %v3310_v2 = vsel %vm349_vm4, %v503_v3, 0.0  ;;  %v559_v41 = vadd.f32 %v557_v13, %v553_v22  ;;  %s4994_s13 = sld [smem:[#allocation44_spill]] }
 0x192   : > { %v3287_v47 = vpop.permute.xlu1 %893  ;;  %v587_v20 = vmul.f32 %v4963_v19, %v578_v15  ;;  %v3302_v17 = vpop.permute.xlu0 %891  ;;  %v560_v14 = vadd.f32 %v558_v0, %v554_v45  ;;  %v4964_v21 = vstv %s2888_s30  ;;  %v607_v13 = vsel %vm600_vm9, %v2791_v26, %v2789_v25  ;;  %s3446_s30 = sld [smem:[#allocation4 + $0x17]] }
 0x193   : > { %v582_v11 = vmul.f32 %v4964_v21, %v573_v50  ;;  %v4967_v4 = vmov %v4964_v21  ;;  %v608_v0 = vsel %vm600_vm9, %v2789_v25, %v2791_v26  ;;  %v1081_v50 = vmul.f32 %v1080_v9, %v2623_v52 }
 0x194   : > { %1325 = vrot.lane.b32.xlu1 %v2641_v56, %s2390_s4  ;;  %v583_v3 = vmul.f32 %v4967_v4, %v572_v58  ;;  %1323 = vrot.lane.b32.xlu0 %v2631_v54, %s2390_s4  ;;  %v534_v22 = vsel %vm3295_vm5, %v530_v16, 0.0  ;;  %v535_v45 = vsel %vm364_vm7, %v531_v8, 0.0  ;;  %vm687_vm10 = vcmp.lt.s32.totalorder %v2874_v37, 32 }
 0x195   : > { %v588_v58 = vadd.f32 %v586_v12, %v582_v11  ;;  %v1084_v25 = vmul.f32 %v1083_v48, %v2621_v51  ;;  %v601_v16 = vsel %vm600_vm9, %v2785_v24, %v2783_v23  ;;  %v602_v51 = vsel %vm600_vm9, %v2783_v23, %v2785_v24 }
 0x196   : > { %v3344_v19 = vpop.permute.xlu1 %913  ;;  %v589_v26 = vadd.f32 %v587_v20, %v583_v3  ;;  %v3363_v8 = vpop.permute.xlu0 %911  ;;  %v563_v12 = vsel %vm3321_vm6, %v559_v41, 0.0  ;;  %v564_v60 = vsel %vm368_vm13, %v560_v14, 0.0  ;;  %v4970_v20 = vstv %s2901_s0  ;;  %s2391_s0 = smov 109   ;;  %v5028_v41 = vld [vmem:[#allocation38_spill] sm:$0xff] }
 0x197   : > { %v615_v48 = vmul.f32 %v4970_v20, %v608_v0  ;;  %v4971_v21 = vmov %v4970_v20  ;;  %v4972_v23 = vsel %vm3083_vm14, %v3053_v57, 0.0  ;;  %v3382_v4 = vadd.f32 %v535_v45, %v3130_v62 }
 0x198   : > { %v616_v11 = vmul.f32 %v4971_v21, %v607_v13  ;;  %1332 = vrot.lane.b32.xlu1 %v2637_v55, %s2390_s4  ;;  %v3379_v24 = vadd.f32 %v534_v22, %v4972_v23  ;;  %vm714_vm4 = vcmp.lt.s32.totalorder %v2874_v37, 31  ;;  %1330 = vrot.lane.b32.xlu0 %v2627_v53, %s2390_s4  ;;  %v592_v15 = vsel %vm3351_vm8, %v588_v58, 0.0  ;;  %s3511_s4 = sld [smem:[#allocation9 + $0x19]] }
 0x199   : > { %4973 = vst [vmem:[#allocation64_spill] sm:$0xff] %v3382_v4  ;;  %v4974_v3 = vstv %s2899_s8  ;;  %v3396_v22 = vadd.f32 %v1084_v25, %v1081_v50  ;;  %v4977_v62 = vsel %vm3105_vm0, %v3094_v59, 0.0  ;;  %v3405_v20 = vadd.f32 %v564_v60, %v3150_v40  ;;  %s3481_s8 = sld [smem:[#allocation9 + $0x17]]  ;;  %v5033_v40 = vld [vmem:[#allocation36_spill] sm:$0xff]  ;;  %v5046_v4 = vld [vmem:[#allocation52_spill] sm:$0xff] }
 0x19a   : > { %v611_v44 = vmul.f32 %v4974_v3, %v602_v51  ;;  %v4975_v13 = vmov %v4974_v3  ;;  %v3394_v0 = vpop.permute.xlu1 %920  ;;  %v3402_v45 = vadd.f32 %v563_v12, %v4977_v62  ;;  %v593_v58 = vsel %vm372_vm12, %v589_v26, 0.0  ;;  %v3409_v52 = vpop.permute.xlu0 %918 }
 0x19b   : > { %v612_v57 = vmul.f32 %v4975_v13, %v601_v16  ;;  %4976 = vst [vmem:[#allocation65_spill] sm:$0xff] %v3396_v22  ;;  %v666_v59 = vsel %vm658_vm2, %v2813_v33, %v2815_v34  ;;  %v4978_v63 = vsel %vm3136_vm3, %v3122_v49, 0.0  ;;  %vm4979_vm5 = vcmp.ge.s32.totalorder %v2909_v46, 3 }
 0x19c   : > { %v3412_v51 = vadd.f32 %v615_v48, %v611_v44  ;;  %1354 = vrot.lane.b32.xlu1 %v2641_v56, %s2391_s0  ;;  %v3425_v25 = vadd.f32 %v592_v15, %v4978_v63  ;;  %vm3431_vm8 = vmand %vm4862_vm15, %vm4979_vm5  ;;  %vm4982_vm9 = vcmp.lt.s32.totalorder %v2874_v37, 34  ;;  %v665_v61 = vsel %vm658_vm2, %v2815_v34, %v2813_v33  ;;  %1352 = vrot.lane.b32.xlu0 %v2631_v54, %s2391_s0 }
 0x19d   : > { %v618_v50 = vadd.f32 %v616_v11, %v612_v57  ;;  %v631_v12 = vsel %vm4982_vm9, %v2795_v27, %v2797_v28  ;;  %v3449_v60 = vadd.f32 %v593_v58, %v3201_v7  ;;  %vm4983_vm14 = vmmov %vm4982_vm9  ;;  %v660_v34 = vsel %vm658_vm2, %v2807_v31, %v2809_v32 }
 0x19e   : > { %v630_v48 = vsel %vm4983_vm14, %v2797_v28, %v2795_v27  ;;  %vm4984_vm0 = vmmov %vm4982_vm9  ;;  %v3463_v21 = vpop.permute.xlu1 %942  ;;  %v659_v27 = vsel %vm658_vm2, %v2809_v32, %v2807_v31  ;;  %v4987_v28 = vstv %s2913_s16  ;;  %v695_v23 = vsel %vm687_vm10, %v2825_v38, %v2827_v39  ;;  %v3479_v15 = vpop.permute.xlu0 %940  ;;  %s3509_s16 = sld [smem:[#allocation4 + $0x19]] }
 0x19f   : > { %v637_v33 = vsel %vm4984_vm0, %v2801_v29, %v2803_v30  ;;  %vm4986_vm3 = vmmov %vm4984_vm0  ;;  %v673_v11 = vmul.f32 %v4987_v28, %v666_v59  ;;  %vm4989_vm6 = vcmp.ge.s32.totalorder %v2925_v5, 3  ;;  %v4990_v31 = vstv %s2903_s1  ;;  %s2392_s1 = smov 99  }
 0x1a0   : > { %v636_v7 = vsel %vm4986_vm3, %v2803_v30, %v2801_v29  ;;  %v621_v29 = vsel %vm3431_vm8, %v3412_v51, 0.0  ;;  %v622_v30 = vsel %vm4989_vm6, %v618_v50, 0.0  ;;  %v640_v32 = vmul.f32 %v4990_v31, %v631_v12  ;;  %1361 = vrot.lane.b32.xlu1 %v2637_v55, %s2391_s0  ;;  %1359 = vrot.lane.b32.xlu0 %v2627_v53, %s2391_s0  ;;  %s3526_s0 = sld [smem:[#allocation4 + $0x1a]] }
 0x1a1   : > { %v4991_v3 = vmov %v4987_v28  ;;  %vm743_vm2 = vcmp.lt.s32.totalorder %v2874_v37, 30  ;;  %v4992_v13 = vstv %s2905_s10  ;;  %v4993_v62 = vstv %s4985_s7  ;;  %s5000_s10 = sld [smem:[#allocation49_spill]]  ;;  %s3540_s7 = sld [smem:[#allocation9 + $0x1a]] }
 0x1a2   : > { %v674_v44 = vmul.f32 %v4991_v3, %v665_v61  ;;  %v644_v57 = vmul.f32 %v4992_v13, %v637_v33  ;;  %v669_v58 = vmul.f32 %v4993_v62, %v660_v34  ;;  %v689_v51 = vsel %vm687_vm10, %v2819_v35, %v2821_v36  ;;  %v4998_v34 = vld [vmem:[#allocation33_spill] sm:$0xff] }
 0x1a3   : > { %v694_v50 = vsel %vm687_vm10, %v2827_v39, %v2825_v38  ;;  %v4995_v59 = vmov %v4992_v13  ;;  %v4996_v26 = vmov %v4993_v62  ;;  %v4997_v61 = vstv %s4988_s20  ;;  %v3524_v39 = vpop.permute.xlu1 %949  ;;  %s4325_s20 = sld [smem:[#allocation9 + $0x20]] }
 0x1a4   : > { %v645_v63 = vmul.f32 %v4995_v59, %v636_v7  ;;  %v670_v12 = vmul.f32 %v4996_v26, %v659_v27  ;;  %v702_v33 = vmul.f32 %v4997_v61, %v695_v23  ;;  %v722_v38 = vsel %vm714_vm4, %v4998_v34, %v2839_v43  ;;  %v3538_v23 = vpop.permute.xlu0 %947  ;;  %v5003_v59 = vld [vmem:[#allocation32_spill] sm:$0xff]  ;;  %v5004_v26 = vld [vmem:[#allocation31_spill] sm:$0xff]  ;;  %1383 = vrot.lane.b32.xlu1 %v2641_v56, %s2392_s1 }
 0x1a5   : > { %vm772_vm5 = vcmp.lt.s32.totalorder %v2874_v37, 29  ;;  %v4999_v28 = vmov %v4990_v31  ;;  %v675_v3 = vadd.f32 %v673_v11, %v669_v58  ;;  %v688_v7 = vsel %vm687_vm10, %v2821_v36, %v2819_v35  ;;  %1381 = vrot.lane.b32.xlu0 %v2631_v54, %s2392_s1 }
 0x1a6   : > { %v641_v31 = vmul.f32 %v4999_v28, %v630_v48  ;;  %v721_v27 = vsel %vm714_vm4, %v2839_v43, %v4998_v34  ;;  %v676_v13 = vadd.f32 %v674_v44, %v670_v12  ;;  %v5001_v62 = vstv %s4994_s13  ;;  %s4350_s13 = sld [smem:[#allocation4 + $0x21]] }
 0x1a7   : > { %v698_v48 = vmul.f32 %v5001_v62, %v689_v51  ;;  %v5002_v11 = vmov %v4997_v61  ;;  %v716_v35 = vsel %vm714_vm4, %v5004_v26, %v5003_v59  ;;  %v3555_v36 = vadd.f32 %v644_v57, %v640_v32  ;;  %v5039_v32 = vld [vmem:[#allocation56_spill] sm:$0xff] }
 0x1a8   : > { %v703_v58 = vmul.f32 %v5002_v11, %v694_v50  ;;  %vm5006_vm10 = vcmp.ge.s32.totalorder %v2909_v46, 1  ;;  %v715_v44 = vsel %vm714_vm4, %v5003_v59, %v5004_v26  ;;  %v5009_v51 = vstv %s5000_s10  ;;  %v3586_v11 = vpop.permute.xlu1 %971  ;;  %1390 = vrot.lane.b32.xlu1 %v2637_v55, %s2392_s1  ;;  %s4381_s10 = sld [smem:[#allocation4 + $0x22]] }
 0x1a9   : > { %vm3561_vm8 = vmand %vm4862_vm15, %vm5006_vm10  ;;  %v729_v50 = vmul.f32 %v5009_v51, %v722_v38  ;;  %vm801_vm9 = vcmp.lt.s32.totalorder %v2874_v37, 19  ;;  %vm5010_vm14 = vcmp.ge.s32.totalorder %v2909_v46, 2  ;;  %v647_v12 = vadd.f32 %v645_v63, %v641_v31  ;;  %v3597_v63 = vpop.permute.xlu0 %969  ;;  %1388 = vrot.lane.b32.xlu0 %v2627_v53, %s2392_s1  ;;  %v5038_v31 = vld [vmem:[#allocation57_spill] sm:$0xff]  ;;  %s2405_s1 = smov 77  }
 0x1aa   : > { %vm3578_vm0 = vmand %vm4862_vm15, %vm5010_vm14  ;;  %v5013_v61 = vmov %v5001_v62  ;;  %v704_v28 = vadd.f32 %v702_v33, %v698_v48  ;;  %v5014_v62 = vmov %v5009_v51  ;;  %v3589_v59 = vadd.f32 %v621_v29, %v3310_v2 }
 0x1ab   : > { %v699_v34 = vmul.f32 %v5013_v61, %v688_v7  ;;  %v730_v38 = vmul.f32 %v5014_v62, %v721_v27  ;;  %v3592_v26 = vadd.f32 %v622_v30, %v3289_v10  ;;  %v5015_v51 = vstv %s5005_s29  ;;  %v5023_v61 = vld [vmem:[#allocation35_spill] sm:$0xff]  ;;  %s2393_s29 = smov 98  }
 0x1ac   : > { %v725_v9 = vmul.f32 %v5015_v51, %v716_v35  ;;  %vm830_vm4 = vcmp.lt.s32.totalorder %v2874_v37, 18  ;;  %v679_v33 = vsel %vm3561_vm8, %v675_v3, 0.0  ;;  %vm5016_vm3 = vcmp.ge.s32.totalorder %v2925_v5, 1  ;;  %v3627_v43 = vpop.permute.xlu1 %978  ;;  %1412 = vrot.lane.b32.xlu1 %v2641_v56, %s2393_s29 }
 0x1ad   : > { %v680_v7 = vsel %vm5016_vm3, %v676_v13, 0.0  ;;  %v705_v27 = vadd.f32 %v703_v58, %v699_v34  ;;  %v5017_v2 = vmov %v5015_v51  ;;  %vm5018_vm6 = vcmp.ge.s32.totalorder %v2925_v5, 2  ;;  %v5024_v34 = vld [vmem:[#allocation34_spill] sm:$0xff]  ;;  %v3641_v62 = vpop.permute.xlu0 %976  ;;  %1410 = vrot.lane.b32.xlu0 %v2631_v54, %s2393_s29 }
 0x1ae   : > { %v726_v29 = vmul.f32 %v5017_v2, %v715_v44  ;;  %v731_v30 = vadd.f32 %v729_v50, %v725_v9  ;;  %v3615_v3 = vsel %vm5018_vm6, %v647_v12, 0.0  ;;  %v706_v13 = vsel %vm4862_vm15, %v704_v28, 0.0  ;;  %v5025_v2 = vld [vmem:[#allocation41_spill] sm:$0xff] }
 0x1af   : > { %5019 = vst [vmem:[#allocation33_spill] sm:$0xff] %v3615_v3  ;;  %vm5020_vm10 = vcmp.lt.s32.totalorder %v2909_v46, 15  ;;  %v3631_v50 = vadd.f32 %v679_v33, %v3402_v45  ;;  %v3634_v12 = vadd.f32 %v680_v7, %v3405_v20  ;;  %v745_v28 = vsel %vm743_vm2, %v5024_v34, %v5023_v61  ;;  %v5026_v45 = vld [vmem:[#allocation40_spill] sm:$0xff]  ;;  %v5032_v44 = vld [vmem:[#allocation37_spill] sm:$0xff] }
 0x1b0   : > { %vm3623_vm8 = vmand %vm4862_vm15, %vm5020_vm10  ;;  %v732_v9 = vadd.f32 %v730_v38, %v726_v29  ;;  %vm357_vm14 = vcmp.ge.s32.totalorder %v2874_v37, 16  ;;  %v3645_v51 = vadd.f32 %v705_v27, %v3449_v60  ;;  %v780_v20 = vsel %vm772_vm5, %v5026_v45, %v5025_v2  ;;  %v5027_v27 = vld [vmem:[#allocation39_spill] sm:$0xff]  ;;  %v3681_v33 = vpop.permute.xlu1 %1000  ;;  %1419 = vrot.lane.b32.xlu1 %v2637_v55, %s2393_s29  ;;  %v5045_v3 = vld [vmem:[#allocation53_spill] sm:$0xff] }
 0x1b1   : > { %v3655_v29 = vadd.f32 %v706_v13, %v3425_v25  ;;  %v735_v10 = vsel %vm3623_vm8, %v731_v30, 0.0  ;;  %v744_v60 = vsel %vm743_vm2, %v5023_v61, %v5024_v34  ;;  %v774_v38 = vsel %vm772_vm5, %v5028_v41, %v5027_v27  ;;  %v5030_v61 = vld [vmem:[#allocation51_spill] sm:$0xff]  ;;  %v5031_v34 = vld [vmem:[#allocation50_spill] sm:$0xff]  ;;  %v3698_v35 = vpop.permute.xlu0 %998  ;;  %1417 = vrot.lane.b32.xlu0 %v2627_v53, %s2393_s29  ;;  %s4412_s29 = sld [smem:[#allocation4 + $0x23]] }
 0x1b2   : > { %vm888_vm3 = vcmp.lt.s32.totalorder %v2874_v37, 16  ;;  %v736_v25 = vsel %vm364_vm7, %v732_v9, 0.0  ;;  %v5029_v13 = vstv %s2950_s21  ;;  %v779_v58 = vsel %vm772_vm5, %v5025_v2, %v5026_v45 }
 0x1b3   : > { %v754_v30 = vmul.f32 %v5029_v13, %v745_v28  ;;  %v809_v7 = vsel %vm801_vm9, %v5031_v34, %v5030_v61  ;;  %v751_v9 = vsel %vm743_vm2, %v5033_v40, %v5032_v44  ;;  %v773_v28 = vsel %vm772_vm5, %v5027_v27, %v5028_v41  ;;  %v5036_v27 = vld [vmem:[#allocation46_spill] sm:$0xff] }
 0x1b4   : > { %v5034_v2 = vstv %s2978_s23  ;;  %v808_v13 = vsel %vm801_vm9, %v5030_v61, %v5031_v34  ;;  %vm944_vm6 = vcmp.lt.s32.totalorder %v2874_v37, 14  ;;  %v750_v48 = vsel %vm743_vm2, %v5032_v44, %v5033_v40  ;;  %vm3757_vm2 = vmand %vm4862_vm15, %vm4861_vm11 }
 0x1b5   : > { %v787_v45 = vmul.f32 %v5034_v2, %v780_v20  ;;  %v5035_v49 = vstv %s2976_s2  ;;  %v5037_v20 = vld [vmem:[#allocation45_spill] sm:$0xff]  ;;  %v838_v61 = vsel %vm830_vm4, %v5039_v32, %v5038_v31  ;;  %v5040_v34 = vstv %s2978_s23  ;;  %s2394_s23 = smov 97  }
 0x1b6   : > { %v783_v41 = vmul.f32 %v5035_v49, %v774_v38  ;;  %v803_v2 = vsel %vm801_vm9, %v5037_v20, %v5036_v27  ;;  %v788_v14 = vmul.f32 %v5040_v34, %v779_v58  ;;  %v802_v40 = vsel %vm801_vm9, %v5036_v27, %v5037_v20  ;;  %v3738_v27 = vpop.permute.xlu1 %1007  ;;  %1441 = vrot.lane.b32.xlu1 %v2641_v56, %s2394_s23 }
 0x1b7   : > { %v5041_v49 = vstv %s2993_s28  ;;  %v837_v38 = vsel %vm830_vm4, %v5038_v31, %v5039_v32  ;;  %v5042_v16 = vstv %s2952_s17  ;;  %v5043_v58 = vstv %s2976_s2  ;;  %1439 = vrot.lane.b32.xlu0 %v2631_v54, %s2394_s23  ;;  %s2398_s28 = smov 93   ;;  %s5121_s2 = sld [smem:[#allocation62_spill]] }
 0x1b8   : > { %v816_v44 = vmul.f32 %v5041_v49, %v809_v7  ;;  %v758_v6 = vmul.f32 %v5042_v16, %v751_v9  ;;  %v784_v34 = vmul.f32 %v5043_v58, %v773_v28  ;;  %v5044_v18 = vmov %v5041_v49 }
 0x1b9   : > { %v817_v22 = vmul.f32 %v5044_v18, %v808_v13  ;;  %v832_v7 = vsel %vm830_vm4, %v5046_v4, %v5045_v3  ;;  %v789_v20 = vadd.f32 %v787_v45, %v783_v41  ;;  %v5047_v49 = vstv %s2991_s3  ;;  %v3748_v18 = vpop.permute.xlu0 %1005  ;;  %s2395_s3 = smov 96  }
 0x1ba   : > { %v812_v32 = vmul.f32 %v5047_v49, %v803_v2  ;;  %v831_v16 = vsel %vm830_vm4, %v5045_v3, %v5046_v4  ;;  %v5048_v31 = vstv %s3011_s12  ;;  %v737_v28 = vadd.f32 %v735_v10, %v3589_v59  ;;  %1448 = vrot.lane.b32.xlu1 %v2637_v55, %s2394_s23  ;;  %s2396_s12 = smov 95  }
 0x1bb   : > { %v845_v9 = vmul.f32 %v5048_v31, %v838_v61  ;;  %v5049_v13 = vstv %s2950_s21  ;;  %v5052_v41 = vmov %v5047_v49  ;;  %v5053_v3 = vmov %v5048_v31  ;;  %1446 = vrot.lane.b32.xlu0 %v2627_v53, %s2394_s23  ;;  %s4122_s21 = sld [smem:[#allocation9 + $0x1c]]  ;;  %s4414_s23 = sld [smem:[#allocation9 + $0x23]] }
 0x1bc   : > { %v755_v58 = vmul.f32 %v5049_v13, %v744_v60  ;;  %v813_v4 = vmul.f32 %v5052_v41, %v802_v40  ;;  %v846_v2 = vmul.f32 %v5053_v3, %v837_v38  ;;  %vm915_vm5 = vcmp.lt.s32.totalorder %v2874_v37, 15 }
 0x1bd   : > { %v738_v59 = vadd.f32 %v736_v25, %v3592_v26  ;;  %v790_v10 = vadd.f32 %v788_v14, %v784_v34  ;;  %v818_v60 = vadd.f32 %v816_v44, %v812_v32  ;;  %v5054_v61 = vstv %s3009_s15  ;;  %v3790_v25 = vpop.permute.xlu1 %1027  ;;  %s5102_s15 = sld [smem:[#allocation55_spill]] }
 0x1be   : > { %v841_v49 = vmul.f32 %v5054_v61, %v832_v7  ;;  %v5055_v31 = vstv %s2952_s17  ;;  %vm5056_vm9 = vcmp.ge.s32.totalorder %v2909_v46, 3  ;;  %v819_v38 = vadd.f32 %v817_v22, %v813_v4  ;;  %v3801_v7 = vpop.permute.xlu0 %1025  ;;  %1470 = vrot.lane.b32.xlu1 %v2641_v56, %s2395_s3  ;;  %s5113_s17 = sld [smem:[#allocation63_spill]] }
 0x1bf   : > { %v759_v13 = vmul.f32 %v5055_v31, %v750_v48  ;;  %vm3779_vm4 = vmand %vm357_vm14, %vm5056_vm9  ;;  %v5059_v41 = vmov %v5054_v61  ;;  %v896_v14 = vsel %vm888_vm3, %v3287_v47, %v3302_v17  ;;  %vm1002_vm10 = vcmp.lt.s32.totalorder %v2874_v37, 3  ;;  %1468 = vrot.lane.b32.xlu0 %v2631_v54, %s2395_s3 }
 0x1c0   : > { %v842_v26 = vmul.f32 %v5059_v41, %v831_v16  ;;  %v3792_v48 = vadd.f32 %v758_v6, %v754_v30  ;;  %v793_v44 = vsel %vm3757_vm2, %v789_v20, 0.0  ;;  %v847_v34 = vadd.f32 %v845_v9, %v841_v49 }
 0x1c1   : > { %vm859_vm8 = vcmp.lt.s32.totalorder %v2874_v37, 17  ;;  %v895_v22 = vsel %vm888_vm3, %v3302_v17, %v3287_v47  ;;  %vm1056_vm9 = vcmp.lt.s32.totalorder %v2874_v37, 1  ;;  %vm5060_vm11 = vcmp.ge.s32.totalorder %v2909_v46, 2 }
 0x1c2   : > { %vm3808_vm15 = vmand %vm357_vm14, %vm5060_vm11  ;;  %v848_v30 = vadd.f32 %v846_v2, %v842_v26  ;;  %v890_v20 = vsel %vm888_vm3, %v3234_v42, %v3251_v1  ;;  %v951_v47 = vsel %vm944_vm6, %v3538_v23, %v3524_v39  ;;  %v952_v17 = vsel %vm944_vm6, %v3524_v39, %v3538_v23  ;;  %v3860_v41 = vpop.permute.xlu0 %1032  ;;  %1477 = vrot.lane.b32.xlu1 %v2637_v55, %s2395_s3 }
 0x1c3   : > { %v794_v32 = vsel %vm372_vm12, %v790_v10, 0.0  ;;  %v822_v16 = vsel %vm3779_vm4, %v818_v60, 0.0  ;;  %v889_v9 = vsel %vm888_vm3, %v3251_v1, %v3234_v42  ;;  %v5063_v45 = vstv %s3039_s14  ;;  %v3850_v1 = vpop.permute.xlu1 %1034  ;;  %1475 = vrot.lane.b32.xlu0 %v2627_v53, %s2395_s3  ;;  %s2397_s14 = smov 94   ;;  %s4439_s3 = sld [smem:[#allocation4 + $0x24]] }
 0x1c4   : > { %v903_v4 = vmul.f32 %v5063_v45, %v896_v14  ;;  %vm5064_vm11 = vcmp.ge.s32.totalorder %v2925_v5, 3  ;;  %v5065_v23 = vmov %v5063_v45  ;;  %v945_v2 = vsel %vm944_vm6, %v3479_v15, %v3463_v21 }
 0x1c5   : > { %v823_v39 = vsel %vm5064_vm11, %v819_v38, 0.0  ;;  %v904_v3 = vmul.f32 %v5065_v23, %v895_v22  ;;  %v946_v42 = vsel %vm944_vm6, %v3463_v21, %v3479_v15  ;;  %v851_v10 = vsel %vm3808_vm15, %v847_v34, 0.0 }
 0x1c6   : > { %v5066_v60 = vstv %s3037_s6  ;;  %v5067_v49 = vstv %s3195_s22  ;;  %v3862_v26 = vadd.f32 %v759_v13, %v755_v58  ;;  %v795_v14 = vadd.f32 %v793_v44, %v3631_v50  ;;  %v1053_v23 = vpop.permute.xlu0 %1052  ;;  %1497 = vrot.lane.b32.xlu1 %v2641_v56, %s2396_s12  ;;  %s5118_s6 = sld [smem:[#allocation54_spill]]  ;;  %s4229_s22 = sld [smem:[#allocation9 + $0x1d]] }
 0x1c7   : > { %v899_v61 = vmul.f32 %v5066_v60, %v890_v20  ;;  %v959_v31 = vmul.f32 %v5067_v49, %v952_v17  ;;  %v5068_v40 = vmov %v5067_v49  ;;  %vm5069_vm3 = vcmp.ge.s32.totalorder %v2925_v5, 2  ;;  %1495 = vrot.lane.b32.xlu0 %v2631_v54, %s2396_s12 }
 0x1c8   : > { %v960_v38 = vmul.f32 %v5068_v40, %v951_v47  ;;  %v852_v21 = vsel %vm5069_vm3, %v848_v30, 0.0  ;;  %v5070_v15 = vmov %v5066_v60  ;;  %v796_v34 = vadd.f32 %v794_v32, %v3634_v12  ;;  %v1055_v30 = vpop.permute.xlu1 %1054 }
 0x1c9   : > { %v900_v22 = vmul.f32 %v5070_v15, %v889_v9  ;;  %v905_v6 = vadd.f32 %v903_v4, %v899_v61  ;;  %v5071_v20 = vstv %s3117_s24  ;;  %vm1103_vm15 = vcmp.lt.s32.totalorder %v2874_v37, 127  ;;  %s4227_s24 = sld [smem:[#allocation4 + $0x1d]] }
 0x1ca   : > { %v955_v17 = vmul.f32 %v5071_v20, %v946_v42  ;;  %v5072_v47 = vmov %v5071_v20  ;;  %v3878_v50 = vadd.f32 %v822_v16, %v3655_v29  ;;  %v3881_v58 = vadd.f32 %v823_v39, %v3645_v51  ;;  %v5074_v42 = vld [vmem:[#allocation61_spill] sm:$0xff]  ;;  %v1060_v15 = vpop.permute.xlu0 %1059  ;;  %1504 = vrot.lane.b32.xlu1 %v2637_v55, %s2396_s12 }
 0x1cb   : > { %v956_v45 = vmul.f32 %v5072_v47, %v945_v2  ;;  %v853_v13 = vadd.f32 %v851_v10, %v737_v28  ;;  %v906_v44 = vadd.f32 %v904_v3, %v900_v22  ;;  %v854_v9 = vadd.f32 %v852_v21, %v738_v59  ;;  %v5073_v2 = vld [vmem:[#allocation60_spill] sm:$0xff]  ;;  %1502 = vrot.lane.b32.xlu0 %v2627_v53, %s2396_s12  ;;  %s4441_s12 = sld [smem:[#allocation9 + $0x24]] }
 0x1cc   : > { %v917_v12 = vsel %vm915_vm5, %v3344_v19, %v3363_v8  ;;  %v961_v32 = vadd.f32 %v959_v31, %v955_v17  ;;  %v3891_v29 = vsel %vm859_vm8, %v5074_v42, %v5073_v2  ;;  %v3897_v51 = vsel %vm859_vm8, %v5073_v2, %v5074_v42  ;;  %v1062_v49 = vpop.permute.xlu1 %1061 }
 0x1cd   : > { %v962_v4 = vadd.f32 %v960_v38, %v956_v45  ;;  %vm5075_vm6 = vcmp.lt.s32.totalorder %v2909_v46, 14  ;;  %v1009_v59 = vsel %vm1002_vm10, %v3748_v18, %v3738_v27  ;;  %v1010_v16 = vsel %vm1002_vm10, %v3738_v27, %v3748_v18 }
 0x1ce   : > { %vm3903_vm2 = vmand %vm357_vm14, %vm5075_vm6  ;;  %vm1029_vm4 = vcmp.lt.s32.totalorder %v2874_v37, 2  ;;  %v907_v39 = vsel %vm357_vm14, %v905_v6, 0.0  ;;  %v916_v3 = vsel %vm915_vm5, %v3363_v8, %v3344_v19  ;;  %v1003_v27 = vsel %vm1002_vm10, %v3698_v35, %v3681_v33  ;;  %1526 = vrot.lane.b32.xlu1 %v2641_v56, %s2397_s14 }
 0x1cf   : > { %v1004_v18 = vsel %vm1002_vm10, %v3681_v33, %v3698_v35  ;;  %v3932_v10 = vadd.f32 %v906_v44, %v796_v34  ;;  %v5078_v60 = vstv %s3063_s11  ;;  %v1057_v19 = vsel %vm1056_vm9, %v1053_v23, %v1055_v30  ;;  %1524 = vrot.lane.b32.xlu0 %v2631_v54, %s2397_s14  ;;  %s2399_s11 = smov 83  }
 0x1d0   : > { %v3936_v61 = vmul.f32 %v5078_v60, %v917_v12  ;;  %v1058_v8 = vsel %vm1056_vm9, %v1055_v30, %v1053_v23  ;;  %v965_v35 = vsel %vm3903_vm2, %v961_v32, 0.0  ;;  %v966_v33 = vsel %vm368_vm13, %v962_v4, 0.0 }
 0x1d1   : > { %v5079_v31 = vstv %s3305_s18  ;;  %v5081_v22 = vstv %s3272_s26  ;;  %v1063_v17 = vsel %vm1056_vm9, %v1060_v15, %v1062_v49  ;;  %v1064_v47 = vsel %vm1056_vm9, %v1062_v49, %v1060_v15  ;;  %s4263_s26 = sld [smem:[#allocation9 + $0x1e]]  ;;  %s2401_s18 = smov 81  }
 0x1d2   : > { %v1017_v40 = vmul.f32 %v5079_v31, %v1010_v16  ;;  %v5080_v38 = vmov %v5079_v31  ;;  %v1013_v34 = vmul.f32 %v5081_v22, %v1004_v18  ;;  %v5082_v6 = vmov %v5081_v22  ;;  %v1102_v18 = vpop.permute.xlu1 %1101  ;;  %1533 = vrot.lane.b32.xlu1 %v2637_v55, %s2397_s14 }
 0x1d3   : > { %v1018_v21 = vmul.f32 %v5080_v38, %v1009_v59  ;;  %v1014_v20 = vmul.f32 %v5082_v6, %v1003_v27  ;;  %v5083_v45 = vstv %s3446_s30  ;;  %v5085_v32 = vstv %s3481_s8  ;;  %1531 = vrot.lane.b32.xlu0 %v2627_v53, %s2397_s14  ;;  %s2402_s30 = smov 80   ;;  %s4323_s8 = sld [smem:[#allocation4 + $0x20]] }
 0x1d4   : > { %v1067_v44 = vmul.f32 %v5083_v45, %v1058_v8  ;;  %v5084_v30 = vmov %v5083_v45  ;;  %v1071_v4 = vmul.f32 %v5085_v32, %v1064_v47  ;;  %v5086_v23 = vmov %v5085_v32  ;;  %s4467_s14 = sld [smem:[#allocation4 + $0x25]] }
 0x1d5   : > { %v1068_v12 = vmul.f32 %v5084_v30, %v1057_v19  ;;  %v1072_v2 = vmul.f32 %v5086_v23, %v1063_v17  ;;  %vm1130_vm10 = vcmp.lt.s32.totalorder %v2874_v37, 126  ;;  %v909_v42 = vadd.f32 %v907_v39, %v795_v14  ;;  %v1100_v14 = vpop.permute.xlu0 %1099 }
 0x1d6   : > { %v5087_v28 = vmov %v5078_v60  ;;  %v922_v16 = vsel %vm915_vm5, %v3409_v52, %v3394_v0  ;;  %v923_v27 = vsel %vm915_vm5, %v3394_v0, %v3409_v52  ;;  %v1019_v60 = vadd.f32 %v1017_v40, %v1013_v34  ;;  %1555 = vrot.lane.b32.xlu1 %v2641_v56, %s2398_s28 }
 0x1d7   : > { %v927_v59 = vmul.f32 %v5087_v28, %v916_v3  ;;  %v1020_v19 = vadd.f32 %v1018_v21, %v1014_v20  ;;  %v1073_v8 = vadd.f32 %v1071_v4, %v1067_v44  ;;  %v1074_v49 = vadd.f32 %v1072_v2, %v1068_v12  ;;  %1553 = vrot.lane.b32.xlu0 %v2631_v54, %s2398_s28 }
 0x1d8   : > { %v967_v39 = vadd.f32 %v965_v35, %v853_v13  ;;  %v968_v3 = vadd.f32 %v966_v33, %v854_v9  ;;  %v1104_v31 = vsel %vm1103_vm15, %v1100_v14, %v1102_v18  ;;  %v1105_v38 = vsel %vm1103_vm15, %v1102_v18, %v1100_v14 }
 0x1d9   : > { %v1036_v0 = vsel %vm1029_vm4, %v3860_v41, %v3850_v1  ;;  %v1037_v52 = vsel %vm1029_vm4, %v3850_v1, %v3860_v41  ;;  %vm5088_vm5 = vcmp.ge.s32.totalorder %v2909_v46, 1  ;;  %vm5089_vm9 = vcmp.ge.s32.totalorder %v2925_v5, 1  ;;  %v1109_v41 = vpop.permute.xlu1 %1108  ;;  %v1107_v17 = vpop.permute.xlu0 %1106 }
 0x1da   : > { %v1075_v13 = vsel %vm5088_vm5, %v1073_v8, 0.0  ;;  %v1076_v9 = vsel %vm5089_vm9, %v1074_v49, 0.0  ;;  %v5090_v35 = vstv %s3065_s9  ;;  %vm973_vm11 = vcmp.lt.s32.totalorder %v2874_v37, 13  ;;  %s4120_s9 = sld [smem:[#allocation4 + $0x1c]]  ;;  %1562 = vrot.lane.b32.xlu1 %v2637_v55, %s2398_s28 }
 0x1db   : > { %v930_v33 = vmul.f32 %v5090_v35, %v923_v27  ;;  %v5091_v40 = vmov %v5090_v35  ;;  %v4002_v15 = vadd.f32 %v1075_v13, %v967_v39  ;;  %v4004_v1 = vadd.f32 %v1076_v9, %v968_v3  ;;  %v5106_v9 = vld [vmem:[#allocation58_spill] sm:$0xff]  ;;  %v5107_v35 = vld [vmem:[#allocation59_spill] sm:$0xff]  ;;  %1560 = vrot.lane.b32.xlu0 %v2627_v53, %s2398_s28  ;;  %s4496_s28 = sld [smem:[#allocation9 + $0x26]] }
 0x1dc   : > { %v931_v21 = vmul.f32 %v5091_v40, %v922_v16  ;;  %vm5092_vm3 = vcmp.ge.s32.totalorder %v2909_v46, 3  ;;  %vm5093_vm6 = vcmp.ge.s32.totalorder %v2925_v5, 3  ;;  %v1030_v6 = vsel %vm1029_vm4, %v3801_v7, %v3790_v25 }
 0x1dd   : > { %v1021_v22 = vsel %vm5092_vm3, %v1019_v60, 0.0  ;;  %v1022_v34 = vsel %vm5093_vm6, %v1020_v19, 0.0  ;;  %v1031_v20 = vsel %vm1029_vm4, %v3790_v25, %v3801_v7  ;;  %v5094_v47 = vstv %s3336_s27  ;;  %v1129_v39 = vpop.permute.xlu1 %1128  ;;  %s4294_s27 = sld [smem:[#allocation9 + $0x1f]] }
 0x1de   : > { %v1044_v45 = vmul.f32 %v5094_v47, %v1037_v52  ;;  %v5095_v44 = vmov %v5094_v47  ;;  %v1110_v12 = vsel %vm1103_vm15, %v1107_v17, %v1109_v41  ;;  %v1111_v32 = vsel %vm1103_vm15, %v1109_v41, %v1107_v17  ;;  %v1127_v52 = vpop.permute.xlu0 %1126  ;;  %1584 = vrot.lane.b32.xlu1 %v2641_v56, %s2399_s11 }
 0x1df   : > { %v1045_v30 = vmul.f32 %v5095_v44, %v1036_v0  ;;  %v5096_v4 = vstv %s3509_s16  ;;  %v5098_v7 = vstv %s3511_s4  ;;  %vm1157_vm2 = vcmp.lt.s32.totalorder %v2874_v37, 125  ;;  %1582 = vrot.lane.b32.xlu0 %v2631_v54, %s2399_s11  ;;  %s2403_s16 = smov 79   ;;  %s4352_s4 = sld [smem:[#allocation9 + $0x21]] }
 0x1e0   : > { %v1114_v23 = vmul.f32 %v5096_v4, %v1104_v31  ;;  %v5097_v2 = vmov %v5096_v4  ;;  %v1118_v28 = vmul.f32 %v5098_v7, %v1110_v12  ;;  %v5099_v16 = vmov %v5098_v7 }
 0x1e1   : > { %v1115_v25 = vmul.f32 %v5097_v2, %v1105_v38  ;;  %v1119_v27 = vmul.f32 %v5099_v16, %v1111_v32  ;;  %v932_v18 = vadd.f32 %v930_v33, %v3936_v61  ;;  %v933_v60 = vadd.f32 %v931_v21, %v927_v59 }
 0x1e2   : > { %v5100_v19 = vstv %s3315_s5  ;;  %v1023_v3 = vadd.f32 %v1021_v22, %v909_v42  ;;  %v1024_v31 = vadd.f32 %v1022_v34, %v3932_v10  ;;  %v1120_v38 = vadd.f32 %v1118_v28, %v1114_v23  ;;  %v1134_v12 = vpop.permute.xlu0 %1133  ;;  %1591 = vrot.lane.b32.xlu1 %v2637_v55, %s2399_s11  ;;  %s4292_s5 = sld [smem:[#allocation4 + $0x1f]] }
 0x1e3   : > { %v1040_v8 = vmul.f32 %v5100_v19, %v1031_v20  ;;  %v5101_v49 = vmov %v5100_v19  ;;  %v1121_v0 = vadd.f32 %v1119_v27, %v1115_v25  ;;  %vm5103_vm15 = vcmp.lt.s32.totalorder %v2909_v46, 15  ;;  %1589 = vrot.lane.b32.xlu0 %v2627_v53, %s2399_s11  ;;  %s4555_s11 = sld [smem:[#allocation4 + $0x29]] }
 0x1e4   : > { %v1041_v14 = vmul.f32 %v5101_v49, %v1030_v6  ;;  %vm4047_vm4 = vmand %vm357_vm14, %vm5103_vm15  ;;  %v1131_v42 = vsel %vm1130_vm10, %v1127_v52, %v1129_v39  ;;  %v1132_v10 = vsel %vm1130_vm10, %v1129_v39, %v1127_v52  ;;  %v860_v33 = vsel %vm859_vm8, %v5107_v35, %v5106_v9 }
 0x1e5   : > { %v1046_v59 = vadd.f32 %v1044_v45, %v1040_v8  ;;  %v861_v40 = vsel %vm859_vm8, %v5106_v9, %v5107_v35  ;;  %vm5108_vm5 = vmmov %vm5103_vm15  ;;  %v1123_v41 = vsel %vm364_vm7, %v1121_v0, 0.0  ;;  %v5109_v22 = vstv %s5102_s15  ;;  %v1136_v45 = vpop.permute.xlu1 %1135  ;;  %s4469_s15 = sld [smem:[#allocation9 + $0x25]] }
 0x1e6   : > { %v1047_v13 = vadd.f32 %v1045_v30, %v1041_v14  ;;  %v1122_v21 = vsel %vm5108_vm5, %v1120_v38, 0.0  ;;  %v874_v34 = vmul.f32 %v5109_v22, %v3897_v51  ;;  %v5110_v6 = vmov %v5109_v22  ;;  %v1154_v0 = vpop.permute.xlu0 %1153 }
 0x1e7   : > { %v875_v20 = vmul.f32 %v5110_v6, %v3891_v29  ;;  %v4075_v17 = vadd.f32 %v1122_v21, %v1023_v3  ;;  %v4077_v47 = vadd.f32 %v1123_v41, %v1024_v31  ;;  %v936_v44 = vsel %vm4047_vm4, %v932_v18, 0.0 }
 0x1e8   : > { %v937_v30 = vsel %vm364_vm7, %v933_v60, 0.0  ;;  %v980_v51 = vsel %vm973_vm11, %v3641_v62, %v3627_v43  ;;  %v981_v29 = vsel %vm973_vm11, %v3627_v43, %v3641_v62  ;;  %vm5111_vm8 = vcmp.ge.s32.totalorder %v2909_v46, 2 }
 0x1e9   : > { %v1048_v32 = vsel %vm5111_vm8, %v1046_v59, 0.0  ;;  %vm5112_vm9 = vcmp.ge.s32.totalorder %v2925_v5, 2  ;;  %v1137_v23 = vsel %vm1130_vm10, %v1134_v12, %v1136_v45  ;;  %v1138_v2 = vsel %vm1130_vm10, %v1136_v45, %v1134_v12  ;;  %v1156_v14 = vpop.permute.xlu1 %1155 }
 0x1ea   : > { %v1049_v4 = vsel %vm5112_vm9, %v1047_v13, 0.0  ;;  %v5114_v25 = vstv %s3526_s0  ;;  %v5116_v28 = vstv %s3540_s7  ;;  %vm1184_vm3 = vcmp.lt.s32.totalorder %v2874_v37, 115  ;;  %s2404_s0 = smov 78   ;;  %s4383_s7 = sld [smem:[#allocation9 + $0x22]] }
 0x1eb   : > { %v1141_v43 = vmul.f32 %v5114_v25, %v1131_v42  ;;  %v5115_v62 = vmov %v5114_v25  ;;  %v1145_v16 = vmul.f32 %v5116_v28, %v1137_v23  ;;  %v5117_v27 = vmov %v5116_v28 }
 0x1ec   : > { %v1142_v7 = vmul.f32 %v5115_v62, %v1132_v10  ;;  %v1146_v18 = vmul.f32 %v5117_v27, %v1138_v2  ;;  %v938_v60 = vadd.f32 %v936_v44, %v3878_v50  ;;  %v939_v19 = vadd.f32 %v937_v30, %v3881_v58 }
 0x1ed   : > { %v974_v8 = vsel %vm973_vm11, %v3597_v63, %v3586_v11  ;;  %v975_v49 = vsel %vm973_vm11, %v3586_v11, %v3597_v63  ;;  %v5119_v50 = vstv %s5113_s17  ;;  %v1147_v31 = vadd.f32 %v1145_v16, %v1141_v43  ;;  %s4494_s17 = sld [smem:[#allocation4 + $0x26]] }
 0x1ee   : > { %v988_v39 = vmul.f32 %v5119_v50, %v981_v29  ;;  %v5120_v58 = vmov %v5119_v50  ;;  %v1148_v38 = vadd.f32 %v1146_v18, %v1142_v7  ;;  %vm5122_vm10 = vcmp.lt.s32.totalorder %v2909_v46, 14 }
 0x1ef   : > { %v989_v3 = vmul.f32 %v5120_v58, %v980_v51  ;;  %vm5123_vm6 = vcmp.ge.s32.totalorder %v2874_v37, 32  ;;  %v1050_v63 = vadd.f32 %v1048_v32, %v938_v60  ;;  %v1051_v52 = vadd.f32 %v1049_v4, %v939_v19  ;;  %vm5128_vm15 = vmmov %vm5122_vm10  ;;  %v1161_v32 = vpop.permute.xlu0 %1160  ;;  %v5139_v60 = vld [vmem:[#allocation64_spill] sm:$0xff]  ;;  %v5140_v19 = vld [vmem:[#allocation33_spill] sm:$0xff] }
 0x1f0   : > { %vm4132_vm11 = vmand %vm5123_vm6, %vm5122_vm10  ;;  %v1158_v61 = vsel %vm1157_vm2, %v1154_v0, %v1156_v14  ;;  %v1159_v59 = vsel %vm1157_vm2, %v1156_v14, %v1154_v0  ;;  %v5126_v13 = vstv %s5118_s6  ;;  %v1149_v35 = vsel %vm5128_vm15, %v1147_v31, 0.0  ;;  %s2030_s6 = sld [smem:[#allocation4 + $0x27]] }
 0x1f1   : > { %v870_v42 = vmul.f32 %v5126_v13, %v861_v40  ;;  %v5127_v10 = vmov %v5126_v13  ;;  %v1150_v21 = vsel %vm368_vm13, %v1148_v38, 0.0  ;;  %v5129_v41 = vstv %s5121_s2  ;;  %s4538_s2 = sld [smem:[#allocation9 + $0x28]] }
 0x1f2   : > { %v871_v9 = vmul.f32 %v5127_v10, %v860_v33  ;;  %v984_v22 = vmul.f32 %v5129_v41, %v975_v49  ;;  %v5130_v6 = vmov %v5129_v41  ;;  %v4154_v44 = vadd.f32 %v1149_v35, %v1050_v63  ;;  %v1163_v33 = vpop.permute.xlu1 %1162  ;;  %v5147_v41 = vld [vmem:[#allocation29_spill] sm:$0xff] }
 0x1f3   : > { %v985_v45 = vmul.f32 %v5130_v6, %v974_v8  ;;  %v4156_v30 = vadd.f32 %v1150_v21, %v1051_v52  ;;  %v764_v40 = vsel %vm4132_vm11, %v3792_v48, 0.0  ;;  %v765_v51 = vsel %vm368_vm13, %v3862_v26, 0.0  ;;  %v5146_v21 = vld [vmem:[#allocation42_spill] sm:$0xff] }
 0x1f4   : > { %v876_v29 = vadd.f32 %v874_v34, %v870_v42  ;;  %v877_v12 = vadd.f32 %v875_v20, %v871_v9  ;;  %vm5131_vm4 = vcmp.ge.s32.totalorder %v2909_v46, 1  ;;  %v990_v23 = vadd.f32 %v988_v39, %v984_v22  ;;  %v5148_v22 = vld [vmem:[#allocation65_spill] sm:$0xff] }
 0x1f5   : > { %vm4168_vm5 = vmand %vm357_vm14, %vm5131_vm4  ;;  %v991_v2 = vadd.f32 %v989_v3, %v985_v45  ;;  %v1164_v48 = vsel %vm1157_vm2, %v1161_v32, %v1163_v33  ;;  %v1165_v26 = vsel %vm1157_vm2, %v1163_v33, %v1161_v32  ;;  %v5134_v34 = vstv %s3551_s19  ;;  %v1181_v3 = vpop.permute.xlu0 %1180  ;;  %v5149_v45 = vld [vmem:[#allocation30_spill] sm:$0xff]  ;;  %s2400_s19 = smov 82  }
 0x1f6   : > { %v1168_v20 = vmul.f32 %v5134_v34, %v1158_v61  ;;  %v5135_v25 = vmov %v5134_v34  ;;  %v5136_v62 = vstv %s3553_s25  ;;  %v5138_v27 = vsel %vm3578_vm0, %v3555_v36, 0.0  ;;  %v1183_v14 = vpop.permute.xlu1 %1182  ;;  %1613 = vrot.lane.b32.xlu1 %v2641_v56, %s2400_s19  ;;  %1611 = vrot.lane.b32.xlu0 %v2631_v54, %s2400_s19  ;;  %s4261_s25 = sld [smem:[#allocation4 + $0x1e]] }
 0x1f7   : > { %v1169_v43 = vmul.f32 %v5135_v25, %v1159_v59  ;;  %v1172_v7 = vmul.f32 %v5136_v62, %v1164_v48  ;;  %v5137_v28 = vmov %v5136_v62  ;;  %v652_v18 = vadd.f32 %v5138_v27, %v3379_v24 }
 0x1f8   : > { %v1173_v16 = vmul.f32 %v5137_v28, %v1165_v26  ;;  %v653_v8 = vadd.f32 %v5140_v19, %v5139_v60  ;;  %vm5141_vm2 = vcmp.lt.s32.totalorder %v2909_v46, 13  ;;  %v1194_v50 = vstv %s4120_s9  ;;  %s2031_s9 = sld [smem:[#allocation9 + $0x27]] }
 0x1f9   : > { %vm4197_vm8 = vmand %vm357_vm14, %vm5141_vm2  ;;  %v1198_v39 = vstv %s4122_s21  ;;  %v880_v57 = vsel %vm4168_vm5, %v876_v29, 0.0  ;;  %vm5144_vm0 = vcmp.ge.s32.totalorder %v2925_v5, 1  ;;  %v1174_v36 = vadd.f32 %v1172_v7, %v1168_v20  ;;  %s2032_s21 = sld [smem:[#allocation4 + $0x28]] }
 0x1fa   : > { %v881_v24 = vsel %vm5144_vm0, %v877_v12, 0.0  ;;  %v1175_v58 = vadd.f32 %v1173_v16, %v1169_v43  ;;  %v766_v31 = vadd.f32 %v764_v40, %v652_v18  ;;  %v767_v38 = vadd.f32 %v765_v51, %v653_v8  ;;  %vm5145_vm14 = vmmov %vm5141_vm2  ;;  %v1190_v35 = vpop.permute.xlu1 %1189  ;;  %v1188_v40 = vpop.permute.xlu0 %1187  ;;  %1620 = vrot.lane.b32.xlu1 %v2637_v55, %s2400_s19  ;;  %1618 = vrot.lane.b32.xlu0 %v2627_v53, %s2400_s19  ;;  %s4581_s19 = sld [smem:[#allocation9 + $0x2a]] }
 0x1fb   : > { %v1185_v0 = vsel %vm1184_vm3, %v1181_v3, %v1183_v14  ;;  %v1186_v11 = vsel %vm1184_vm3, %v1183_v14, %v1181_v3  ;;  %v994_v63 = vsel %vm4197_vm8, %v990_v23, 0.0  ;;  %v995_v52 = vsel %vm372_vm12, %v991_v2, 0.0 }
 0x1fc   : > { %v1176_v61 = vsel %vm5145_vm14, %v1174_v36, 0.0  ;;  %v1177_v59 = vsel %vm372_vm12, %v1175_v58, 0.0  ;;  %v882_v13 = vadd.f32 %v880_v57, %v766_v31  ;;  %v883_v42 = vadd.f32 %v881_v24, %v767_v38 }
 0x1fd   : > { %v4222_v10 = vadd.f32 %v1176_v61, %v4002_v15  ;;  %v4225_v9 = vadd.f32 %v1177_v59, %v4004_v1  ;;  %vm362_vm9 = vcmp.lt.s32.totalorder %v5146_v21, 240  ;;  %v1090_v6 = vrot.slane %v5148_v22, %v5147_v41 }
 0x1fe   : > { %v1094_v33 = vrot.slane %v5148_v22, %v5149_v45  ;;  %vm1213_vm10 = vcmp.lt.s32.totalorder %v2874_v37, 114  ;;  %v996_v15 = vadd.f32 %v994_v63, %v882_v13  ;;  %v997_v51 = vadd.f32 %v995_v52, %v883_v42  ;;  %v1212_v2 = vpop.permute.xlu1 %1211  ;;  %v1210_v34 = vpop.permute.xlu0 %1209  ;;  %1642 = vrot.lane.b32.xlu1 %v2641_v56, %s2401_s18  ;;  %1640 = vrot.lane.b32.xlu0 %v2631_v54, %s2401_s18  ;;  %vm1262_vm14 = vmand %vm362_vm9, %vm5144_vm0 }
 0x1ff   : > { %v1191_v1 = vsel %vm1184_vm3, %v1188_v40, %v1190_v35  ;;  %v1192_v29 = vsel %vm1184_vm3, %v1190_v35, %v1188_v40  ;;  %v1195_v12 = vmul.f32 %v1194_v50, %v1185_v0  ;;  %v1196_v32 = vmul.f32 %v1194_v50, %v1186_v11  ;;  %vm1376_vm0 = vmand %vm362_vm9, %vm372_vm12 }
 0x200   : > { %v1199_v4 = vmul.f32 %v1198_v39, %v1191_v1  ;;  %v1200_v23 = vmul.f32 %v1198_v39, %v1192_v29  ;;  %vm5150_vm6 = vcmp.ge.s32.totalorder %v2925_v5, 3  ;;  %v1097_v20 = vadd.f32 %v1090_v6, %v996_v15 }
 0x201   : > { %vm1204_vm11 = vmand %vm362_vm9, %vm5150_vm6  ;;  %v1098_v25 = vadd.f32 %v1094_v33, %v997_v51  ;;  %v1214_v43 = vsel %vm1213_vm10, %v1210_v34, %v1212_v2  ;;  %v1215_v62 = vsel %vm1213_vm10, %v1212_v2, %v1210_v34  ;;  %vm5151_vm3 = vcmp.ge.s32.totalorder %v2909_v46, 3 }
 0x202   : > { %v1201_v48 = vadd.f32 %v1199_v4, %v1195_v12  ;;  %v1202_v26 = vadd.f32 %v1200_v23, %v1196_v32  ;;  %v1223_v18 = vstv %s4227_s24  ;;  %v1219_v60 = vpop.permute.xlu1 %1218  ;;  %v1227_v19 = vstv %s4229_s22  ;;  %v1217_v8 = vpop.permute.xlu0 %1216  ;;  %1649 = vrot.lane.b32.xlu1 %v2637_v55, %s2401_s18  ;;  %1647 = vrot.lane.b32.xlu0 %v2627_v53, %s2401_s18  ;;  %s4557_s24 = sld [smem:[#allocation9 + $0x29]]  ;;  %s4579_s22 = sld [smem:[#allocation4 + $0x2a]] }
 0x203   : > { %v1220_v49 = vsel %vm1213_vm10, %v1217_v8, %v1219_v60  ;;  %v1221_v14 = vsel %vm1213_vm10, %v1219_v60, %v1217_v8  ;;  %vm1242_vm15 = vcmp.lt.s32.totalorder %v2874_v37, 113  ;;  %v1224_v50 = vmul.f32 %v1223_v18, %v1214_v43  ;;  %s4626_s18 = sld [smem:[#allocation4 + $0x2c]] }
 0x204   : > { %v1205_v7 = vsel %vm5151_vm3, %v1201_v48, 0.0  ;;  %v1206_v28 = vsel %vm1204_vm11, %v1202_v26, 0.0  ;;  %v1225_v39 = vmul.f32 %v1223_v18, %v1215_v62  ;;  %v1228_v57 = vmul.f32 %v1227_v19, %v1220_v49  ;;  %vm1318_vm3 = vmand %vm362_vm9, %vm364_vm7 }
 0x205   : > { %v4255_v16 = vadd.f32 %v1205_v7, %v1097_v20  ;;  %v4257_v27 = vadd.f32 %v1206_v28, %v1098_v25  ;;  %v1229_v24 = vmul.f32 %v1227_v19, %v1221_v14  ;;  %vm5152_vm4 = vcmp.ge.s32.totalorder %v2925_v5, 2 }
 0x206   : > { %vm1233_vm5 = vmand %vm362_vm9, %vm5152_vm4  ;;  %v1241_v36 = vpop.permute.xlu1 %1240  ;;  %v1230_v58 = vadd.f32 %v1228_v57, %v1224_v50  ;;  %v1239_v31 = vpop.permute.xlu0 %1238  ;;  %vm5153_vm2 = vcmp.ge.s32.totalorder %v2909_v46, 2  ;;  %v1252_v59 = vstv %s4261_s25  ;;  %v1256_v42 = vstv %s4263_s26  ;;  %1671 = vrot.lane.b32.xlu1 %v2641_v56, %s2402_s30  ;;  %1669 = vrot.lane.b32.xlu0 %v2631_v54, %s2402_s30  ;;  %s4598_s25 = sld [smem:[#allocation4 + $0x2b]] }
 0x207   : > { %v1231_v3 = vadd.f32 %v1229_v24, %v1225_v39  ;;  %v1243_v38 = vsel %vm1242_vm15, %v1239_v31, %v1241_v36  ;;  %v1244_v0 = vsel %vm1242_vm15, %v1241_v36, %v1239_v31  ;;  %vm1271_vm8 = vcmp.lt.s32.totalorder %v2874_v37, 112  ;;  %s4600_s26 = sld [smem:[#allocation9 + $0x2b]] }
 0x208   : > { %v1234_v11 = vsel %vm5153_vm2, %v1230_v58, 0.0  ;;  %vm5154_vm10 = vcmp.ge.s32.totalorder %v2909_v46, 1  ;;  %v1281_v2 = vstv %s4292_s5  ;;  %v1285_v26 = vstv %s4294_s27  ;;  %s4628_s5 = sld [smem:[#allocation9 + $0x2c]]  ;;  %s4645_s27 = sld [smem:[#allocation4 + $0x2d]] }
 0x209   : > { %v1235_v63 = vsel %vm1233_vm5, %v1231_v3, 0.0  ;;  %v4285_v52 = vadd.f32 %v1234_v11, %v4075_v17  ;;  %v1253_v17 = vmul.f32 %v1252_v59, %v1243_v38  ;;  %vm1298_vm6 = vcmp.lt.s32.totalorder %v2874_v37, 111  ;;  %vm1347_vm5 = vmand %vm362_vm9, %vm368_vm13 }
 0x20a   : > { %v4288_v61 = vadd.f32 %v1235_v63, %v4077_v47  ;;  %v1248_v13 = vpop.permute.xlu1 %1247  ;;  %v1246_v35 = vpop.permute.xlu0 %1245  ;;  %v1254_v47 = vmul.f32 %v1252_v59, %v1244_v0  ;;  %1678 = vrot.lane.b32.xlu1 %v2637_v55, %s2402_s30  ;;  %1676 = vrot.lane.b32.xlu0 %v2627_v53, %s2402_s30  ;;  %v1308_v39 = vstv %s4323_s8  ;;  %v1312_v24 = vstv %s4325_s20  ;;  %s4647_s30 = sld [smem:[#allocation9 + $0x2d]]  ;;  %s4664_s8 = sld [smem:[#allocation4 + $0x2e]] }
 0x20b   : > { %v1249_v41 = vsel %vm1242_vm15, %v1246_v35, %v1248_v13  ;;  %v1250_v22 = vsel %vm1242_vm15, %v1248_v13, %v1246_v35  ;;  %vm1327_vm11 = vcmp.lt.s32.totalorder %v2874_v37, 110  ;;  %vm5155_vm15 = vcmp.lt.s32.totalorder %v2909_v46, 15  ;;  %s2045_s20 = sld [smem:[#allocation9 + $0x2e]] }
 0x20c   : > { %v1257_v6 = vmul.f32 %v1256_v42, %v1249_v41  ;;  %v1258_v45 = vmul.f32 %v1256_v42, %v1250_v22  ;;  %vm1356_vm4 = vcmp.lt.s32.totalorder %v2874_v37, 109  ;;  %vm5156_vm2 = vcmp.lt.s32.totalorder %v2909_v46, 14 }
 0x20e   : > { %v1270_v33 = vpop.permute.xlu1 %1269  ;;  %v1259_v40 = vadd.f32 %v1257_v6, %v1253_v17  ;;  %v1260_v15 = vadd.f32 %v1258_v45, %v1254_v47  ;;  %v1268_v51 = vpop.permute.xlu0 %1267  ;;  %1698 = vrot.lane.b32.xlu1 %v2641_v56, %s2403_s16  ;;  %1696 = vrot.lane.b32.xlu0 %v2631_v54, %s2403_s16  ;;  %v1337_v47 = vstv %s4350_s13  ;;  %v1341_v45 = vstv %s4352_s4  ;;  %s4681_s13 = sld [smem:[#allocation9 + $0x2f]]  ;;  %s4695_s4 = sld [smem:[#allocation4 + $0x30]] }
 0x20f   : > { %v1272_v1 = vsel %vm1271_vm8, %v1268_v51, %v1270_v33  ;;  %v1273_v29 = vsel %vm1271_vm8, %v1270_v33, %v1268_v51 }
 0x210   : > { %v1263_v12 = vsel %vm5154_vm10, %v1259_v40, 0.0  ;;  %v1264_v32 = vsel %vm1262_vm14, %v1260_v15, 0.0  ;;  %vm5157_vm14 = vcmp.lt.s32.totalorder %v2909_v46, 13  ;;  %vm1414_vm10 = vcmp.lt.s32.totalorder %v2874_v37, 98 }
 0x211   : > { %v4316_v4 = vadd.f32 %v1263_v12, %v4154_v44  ;;  %v4319_v23 = vadd.f32 %v1264_v32, %v4156_v30  ;;  %v1282_v44 = vmul.f32 %v1281_v2, %v1272_v1  ;;  %v1283_v30 = vmul.f32 %v1281_v2, %v1273_v29 }
 0x212   : > { %v1277_v48 = vpop.permute.xlu1 %1276  ;;  %v1275_v34 = vpop.permute.xlu0 %1274  ;;  %1705 = vrot.lane.b32.xlu1 %v2637_v55, %s2403_s16  ;;  %1703 = vrot.lane.b32.xlu0 %v2627_v53, %s2403_s16  ;;  %s4679_s16 = sld [smem:[#allocation4 + $0x2f]] }
 0x213   : > { %v1278_v20 = vsel %vm1271_vm8, %v1275_v34, %v1277_v48  ;;  %v1279_v25 = vsel %vm1271_vm8, %v1277_v48, %v1275_v34  ;;  %vm1385_vm8 = vcmp.lt.s32.totalorder %v2874_v37, 99 }
 0x214   : > { %v1286_v43 = vmul.f32 %v1285_v26, %v1278_v20  ;;  %v1287_v62 = vmul.f32 %v1285_v26, %v1279_v25  ;;  %v1366_v25 = vstv %s4381_s10  ;;  %s5176_s10 = sld [smem:[#allocation26_spill]] }
 0x216   : > { %v1297_v7 = vpop.permute.xlu1 %1296  ;;  %v1288_v28 = vadd.f32 %v1286_v43, %v1282_v44  ;;  %v1289_v18 = vadd.f32 %v1287_v62, %v1283_v30  ;;  %v1295_v60 = vpop.permute.xlu0 %1294  ;;  %1727 = vrot.lane.b32.xlu1 %v2641_v56, %s2404_s0  ;;  %1725 = vrot.lane.b32.xlu0 %v2631_v54, %s2404_s0  ;;  %v1370_v30 = vstv %s4383_s7  ;;  %s5177_s7 = sld [smem:[#allocation19_spill]] }
 0x217   : > { %v1299_v19 = vsel %vm1298_vm6, %v1295_v60, %v1297_v7  ;;  %v1300_v8 = vsel %vm1298_vm6, %v1297_v7, %v1295_v60 }
 0x218   : > { %v1291_v49 = vsel %vm362_vm9, %v1289_v18, 0.0  ;;  %v4342_v14 = vadd.f32 %v1288_v28, %v4222_v10  ;;  %v1310_v3 = vmul.f32 %v1308_v39, %v1300_v8  ;;  %vm366_vm9 = vcmp.lt.s32.totalorder %v5146_v21, 224 }
 0x219   : > { %v4346_v50 = vadd.f32 %v1291_v49, %v4225_v9  ;;  %v1309_v9 = vmul.f32 %v1308_v39, %v1299_v19 }
 0x21a   : > { %v1304_v57 = vpop.permute.xlu1 %1303  ;;  %v1302_v36 = vpop.permute.xlu0 %1301  ;;  %1734 = vrot.lane.b32.xlu1 %v2637_v55, %s2404_s0  ;;  %1732 = vrot.lane.b32.xlu0 %v2627_v53, %s2404_s0  ;;  %s4697_s0 = sld [smem:[#allocation9 + $0x30]] }
 0x21b   : > { %v1305_v58 = vsel %vm1298_vm6, %v1302_v36, %v1304_v57  ;;  %v1306_v10 = vsel %vm1298_vm6, %v1304_v57, %v1302_v36  ;;  %vm5158_vm6 = vcmp.ge.s32.totalorder %v2925_v5, 3 }
 0x21c   : > { %v1313_v31 = vmul.f32 %v1312_v24, %v1305_v58  ;;  %v1314_v38 = vmul.f32 %v1312_v24, %v1306_v10  ;;  %v1395_v58 = vstv %s4412_s29  ;;  %s1953_s29 = sshll.u32 %s5176_s10, 1 }
 0x21e   : > { %v1326_v0 = vpop.permute.xlu1 %1325  ;;  %v1315_v11 = vadd.f32 %v1313_v31, %v1309_v9  ;;  %v1316_v63 = vadd.f32 %v1314_v38, %v1310_v3  ;;  %v1324_v59 = vpop.permute.xlu0 %1323  ;;  %1756 = vrot.lane.b32.xlu1 %v2641_v56, %s2405_s1  ;;  %1754 = vrot.lane.b32.xlu0 %v2631_v54, %s2405_s1  ;;  %v1399_v9 = vstv %s4414_s23  ;;  %s2058_s23 = sshll.u32 %s5177_s7, 5 }
 0x21f   : > { %v1328_v13 = vsel %vm1327_vm11, %v1324_v59, %v1326_v0  ;;  %v1329_v42 = vsel %vm1327_vm11, %v1326_v0, %v1324_v59 }
 0x220   : > { %v1319_v35 = vsel %vm5155_vm15, %v1315_v11, 0.0  ;;  %v1320_v41 = vsel %vm1318_vm3, %v1316_v63, 0.0  ;;  %vm5159_vm3 = vcmp.ge.s32.totalorder %v2909_v46, 3  ;;  %vm1443_vm15 = vcmp.lt.s32.totalorder %v2874_v37, 97 }
 0x221   : > { %v4374_v22 = vadd.f32 %v1319_v35, %v4255_v16  ;;  %v4377_v17 = vadd.f32 %v1320_v41, %v4257_v27  ;;  %v1338_v16 = vmul.f32 %v1337_v47, %v1328_v13  ;;  %v1339_v27 = vmul.f32 %v1337_v47, %v1329_v42 }
 0x222   : > { %v1333_v6 = vpop.permute.xlu1 %1332  ;;  %v1331_v33 = vpop.permute.xlu0 %1330  ;;  %1763 = vrot.lane.b32.xlu1 %v2637_v55, %s2405_s1  ;;  %1761 = vrot.lane.b32.xlu0 %v2627_v53, %s2405_s1 }
 0x223   : > { %v1334_v40 = vsel %vm1327_vm11, %v1331_v33, %v1333_v6  ;;  %v1335_v15 = vsel %vm1327_vm11, %v1333_v6, %v1331_v33  ;;  %vm1405_vm11 = vmand %vm366_vm9, %vm5158_vm6  ;;  %vm1499_vm6 = vcmp.lt.s32.totalorder %v2874_v37, 95 }
 0x224   : > { %v1342_v51 = vmul.f32 %v1341_v45, %v1334_v40  ;;  %v1343_v1 = vmul.f32 %v1341_v45, %v1335_v15  ;;  %v1424_v40 = vstv %s4439_s3  ;;  %s227_s3 = scalar_lea.vmem [#allocation11], %s1953_s29 }
 0x226   : > { %v1355_v29 = vpop.permute.xlu1 %1354  ;;  %v1344_v12 = vadd.f32 %v1342_v51, %v1338_v16  ;;  %v1345_v32 = vadd.f32 %v1343_v1, %v1339_v27  ;;  %v1353_v2 = vpop.permute.xlu0 %1352  ;;  %v1428_v16 = vstv %s4441_s12  ;;  %s1835_s12 = sshll.u32 %s227_s3, 4  ;;  %s4731_s12 = int_to_ptr.vmem [resolvable:$true] %s1835_s12 }
 0x227   : > { %v1357_v56 = vsel %vm1356_vm4, %v1353_v2, %v1355_v29  ;;  %v1358_v48 = vsel %vm1356_vm4, %v1355_v29, %v1353_v2 }
 0x228   : > { %v1348_v54 = vsel %vm5156_vm2, %v1344_v12, 0.0  ;;  %v1349_v26 = vsel %vm1347_vm5, %v1345_v32, 0.0  ;;  %vm5161_vm2 = vcmp.ge.s32.totalorder %v2909_v46, 2 }
 0x229   : > { %v4405_v34 = vadd.f32 %v1348_v54, %v4285_v52  ;;  %v4408_v20 = vadd.f32 %v1349_v26, %v4288_v61  ;;  %v1367_v52 = vmul.f32 %v1366_v25, %v1357_v56  ;;  %v1368_v61 = vmul.f32 %v1366_v25, %v1358_v48 }
 0x22a   : > { %v1362_v44 = vpop.permute.xlu1 %1361  ;;  %v1360_v55 = vpop.permute.xlu0 %1359 }
 0x22b   : > { %v1363_v43 = vsel %vm1356_vm4, %v1360_v55, %v1362_v44  ;;  %v1364_v53 = vsel %vm1356_vm4, %v1362_v44, %v1360_v55  ;;  %vm5160_vm4 = vcmp.ge.s32.totalorder %v2925_v5, 2 }
 0x22c   : > { %v1371_v62 = vmul.f32 %v1370_v30, %v1363_v43  ;;  %v1372_v7 = vmul.f32 %v1370_v30, %v1364_v53  ;;  %vm1434_vm5 = vmand %vm366_vm9, %vm5160_vm4  ;;  %v1453_v43 = vstv %s4467_s14 }
 0x22d   : > { %vm1548_vm4 = vmand %vm366_vm9, %vm368_vm13 }
 0x22e   : > { %v1384_v28 = vpop.permute.xlu1 %1383  ;;  %v1373_v18 = vadd.f32 %v1371_v62, %v1367_v52  ;;  %v1374_v60 = vadd.f32 %v1372_v7, %v1368_v61  ;;  %v1382_v19 = vpop.permute.xlu0 %1381  ;;  %v1457_v52 = vstv %s4469_s15 }
 0x22f   : > { %v1386_v8 = vsel %vm1385_vm8, %v1382_v19, %v1384_v28  ;;  %v1387_v49 = vsel %vm1385_vm8, %v1384_v28, %v1382_v19 }
 0x230   : > { %v1377_v39 = vsel %vm5157_vm14, %v1373_v18, 0.0  ;;  %v1378_v57 = vsel %vm1376_vm0, %v1374_v60, 0.0  ;;  %v1397_v38 = vmul.f32 %v1395_v58, %v1387_v49  ;;  %vm5162_vm0 = vcmp.ge.s32.totalorder %v2925_v5, 1 }
 0x231   : > { %v4432_v24 = vadd.f32 %v1377_v39, %v4316_v4  ;;  %v4435_v36 = vadd.f32 %v1378_v57, %v4319_v23  ;;  %v1396_v23 = vmul.f32 %v1395_v58, %v1386_v8  ;;  %vm1463_vm14 = vmand %vm366_vm9, %vm5162_vm0  ;;  %vm1586_vm0 = vcmp.lt.s32.totalorder %v2874_v37, 83 }
 0x232   : > { %v1391_v10 = vpop.permute.xlu1 %1390  ;;  %v1389_v3 = vpop.permute.xlu0 %1388 }
 0x233   : > { %v1392_v31 = vsel %vm1385_vm8, %v1389_v3, %v1391_v10  ;;  %v1393_v4 = vsel %vm1385_vm8, %v1391_v10, %v1389_v3  ;;  %vm1472_vm8 = vcmp.lt.s32.totalorder %v2874_v37, 96 }
 0x234   : > { %v1400_v0 = vmul.f32 %v1399_v9, %v1392_v31  ;;  %v1401_v11 = vmul.f32 %v1399_v9, %v1393_v4  ;;  %v1482_v31 = vstv %s4494_s17  ;;  %s5180_s17 = sld [smem:[#allocation69_spill]] }
 0x236   : > { %v1413_v63 = vpop.permute.xlu1 %1412  ;;  %v1402_v59 = vadd.f32 %v1400_v0, %v1396_v23  ;;  %v1403_v13 = vadd.f32 %v1401_v11, %v1397_v38  ;;  %v1411_v42 = vpop.permute.xlu0 %1410  ;;  %v1486_v23 = vstv %s4496_s28 }
 0x237   : > { %v1415_v35 = vsel %vm1414_vm10, %v1411_v42, %v1413_v63  ;;  %v1416_v41 = vsel %vm1414_vm10, %v1413_v63, %v1411_v42 }
 0x238   : > { %v1406_v47 = vsel %vm5159_vm3, %v1402_v59, 0.0  ;;  %v1407_v6 = vsel %vm1405_vm11, %v1403_v13, 0.0  ;;  %vm1528_vm11 = vcmp.lt.s32.totalorder %v2874_v37, 94  ;;  %vm1519_vm3 = vmand %vm366_vm9, %vm364_vm7 }
 0x239   : > { %v4460_v45 = vadd.f32 %v1406_v47, %v4342_v14  ;;  %v4463_v33 = vadd.f32 %v1407_v6, %v4346_v50  ;;  %v1425_v14 = vmul.f32 %v1424_v40, %v1415_v35  ;;  %v1426_v50 = vmul.f32 %v1424_v40, %v1416_v41 }
 0x23a   : > { %v1420_v15 = vpop.permute.xlu1 %1419  ;;  %v1418_v27 = vpop.permute.xlu0 %1417  ;;  %s5181_s28 = smov %s5180_s17 }
 0x23b   : > { %v1421_v51 = vsel %vm1414_vm10, %v1418_v27, %v1420_v15  ;;  %v1422_v1 = vsel %vm1414_vm10, %v1420_v15, %v1418_v27  ;;  %vm5163_vm10 = vcmp.ge.s32.totalorder %v2909_v46, 1  ;;  %v1509_v27 = vstv %s2030_s6  ;;  %s4729_s6 = scalar_lea.hbm %s5180_s17, %s2058_s23 }
 0x23c   : > { %v1429_v29 = vmul.f32 %v1428_v16, %v1421_v51  ;;  %v1430_v12 = vmul.f32 %v1428_v16, %v1422_v1  ;;  %v1513_v1 = vstv %s2031_s9  ;;  %s1821_s9 = scalar_lea.sflag [#allocation6], %s5176_s10 }
 0x23e   : > { %v1442_v32 = vpop.permute.xlu1 %1441  ;;  %v1431_v2 = vadd.f32 %v1429_v29, %v1425_v14  ;;  %v1432_v56 = vadd.f32 %v1430_v12, %v1426_v50  ;;  %v1440_v48 = vpop.permute.xlu0 %1439 }
 0x23f   : > { %v1444_v54 = vsel %vm1443_vm15, %v1440_v48, %v1442_v32  ;;  %v1445_v26 = vsel %vm1443_vm15, %v1442_v32, %v1440_v48 }
 0x240   : > { %v1435_v25 = vsel %vm5161_vm2, %v1431_v2, 0.0  ;;  %v1436_v44 = vsel %vm1434_vm5, %v1432_v56, 0.0  ;;  %vm1557_vm5 = vcmp.lt.s32.totalorder %v2874_v37, 93  ;;  %vm5165_vm2 = vcmp.lt.s32.totalorder %v2909_v46, 14 }
 0x241   : > { %v4487_v30 = vadd.f32 %v1435_v25, %v4374_v22  ;;  %v4490_v55 = vadd.f32 %v1436_v44, %v4377_v17  ;;  %v1454_v22 = vmul.f32 %v1453_v43, %v1444_v54  ;;  %v1455_v17 = vmul.f32 %v1453_v43, %v1445_v26 }
 0x242   : > { %v1449_v53 = vpop.permute.xlu1 %1448  ;;  %v1447_v61 = vpop.permute.xlu0 %1446 }
 0x243   : > { %v1450_v62 = vsel %vm1443_vm15, %v1447_v61, %v1449_v53  ;;  %v1451_v7 = vsel %vm1443_vm15, %v1449_v53, %v1447_v61  ;;  %vm5164_vm15 = vcmp.lt.s32.totalorder %v2909_v46, 15  ;;  %v1538_v61 = vstv %s2032_s21  ;;  %s2260_s21 = scalar_lea.vmem %s4731_s12, 32 }
 0x244   : > { %v1458_v28 = vmul.f32 %v1457_v52, %v1450_v62  ;;  %v1459_v18 = vmul.f32 %v1457_v52, %v1451_v7  ;;  %v1542_v7 = vstv %s4538_s2  ;;  %p2261_p1 = scmp.ne.s32.totalorder %s4731_s12, %s2260_s21  ;;  %s2406_s2 = smov [#allocation11]  }
 0x246   : > { %v1471_v60 = vpop.permute.xlu1 %1470  ;;  %v1460_v19 = vadd.f32 %v1458_v28, %v1454_v22  ;;  %v1461_v8 = vadd.f32 %v1459_v18, %v1455_v17  ;;  %v1469_v49 = vpop.permute.xlu0 %1468  ;;  %p2262_p4 = pnand %p2261_p1, %p2532_p8 }
 0x247   : > { %v1473_v39 = vsel %vm1472_vm8, %v1469_v49, %v1471_v60  ;;  %v1474_v57 = vsel %vm1472_vm8, %v1471_v60, %v1469_v49 }
 0x248   : > { %v1464_v58 = vsel %vm5163_vm10, %v1460_v19, 0.0  ;;  %v1465_v10 = vsel %vm1463_vm14, %v1461_v8, 0.0  ;;  %v1483_v63 = vmul.f32 %v1482_v31, %v1473_v39  ;;  %vm5166_vm14 = vcmp.lt.s32.totalorder %v2909_v46, 13  ;;  %p2263_p6 = pneg %p2262_p4 }
 0x249   : > { %v4514_v9 = vadd.f32 %v1464_v58, %v4405_v34  ;;  %v4517_v3 = vadd.f32 %v1465_v10, %v4408_v20  ;;  %v1484_v34 = vmul.f32 %v1482_v31, %v1474_v57  ;;  %v1567_v10 = vstv %s4555_s11  ;;  %s2264_s11 = sshll.u32 %s2406_s2, 4  ;;  %s2265_s11 = int_to_ptr.vmem [resolvable:$false] %s2264_s11 }
 0x24a   : > { %v1478_v4 = vpop.permute.xlu1 %1477  ;;  %v1476_v38 = vpop.permute.xlu0 %1475  ;;  %v1571_v31 = vstv %s4557_s24  ;;  %vm5167_vm10 = vcmp.ge.s32.totalorder %v2925_v5, 3  ;;  %s2266_s24 = scalar_lea.vmem %s2265_s11, 64  ;;  %p2267_p9 = scmp.lt.s32.totalorder %s4731_s12, %s2265_s11 }
 0x24b   : > { %v1479_v0 = vsel %vm1472_vm8, %v1476_v38, %v1478_v4  ;;  %v1480_v11 = vsel %vm1472_vm8, %v1478_v4, %v1476_v38  ;;  %vm1577_vm8 = vmand %vm366_vm9, %vm372_vm12  ;;  %p2268_p0 = scmp.lt.s32.totalorder %s2266_s24, %s2260_s21 }
 0x24c   : > { %v1487_v59 = vmul.f32 %v1486_v23, %v1479_v0  ;;  %v1488_v13 = vmul.f32 %v1486_v23, %v1480_v11 }
 0x24d   : > { %p2269_p11 = por %p2268_p0, %p2267_p9 }
 0x24e   : > { %v1498_v20 = vpop.permute.xlu1 %1497  ;;  %v1489_v42 = vadd.f32 %v1487_v59, %v1483_v63  ;;  %v1490_v35 = vadd.f32 %v1488_v13, %v1484_v34  ;;  %v1496_v41 = vpop.permute.xlu0 %1495 }
 0x24f   : > { %v1500_v47 = vsel %vm1499_vm6, %v1496_v41, %v1498_v20  ;;  %v1501_v6 = vsel %vm1499_vm6, %v1498_v20, %v1496_v41  ;;  %p2270_p5 = pnand %p2269_p11, %p2263_p6 }
 0x250   : > { %v1492_v40 = vsel %vm366_vm9, %v1490_v35, 0.0  ;;  %v4533_v15 = vadd.f32 %v1489_v42, %v4432_v24  ;;  %v1510_v24 = vmul.f32 %v1509_v27, %v1500_v47  ;;  %v1511_v12 = vmul.f32 %v1509_v27, %v1501_v6 }
 0x251   : > { %v4536_v16 = vadd.f32 %v1492_v40, %v4435_v36  ;;  %v1596_v27 = vstv %s4579_s22  ;;  %vm370_vm9 = vcmp.lt.s32.totalorder %v5146_v21, 208 }
 0x252   : > { %v1505_v51 = vpop.permute.xlu1 %1504  ;;  %v1503_v14 = vpop.permute.xlu0 %1502 }
 0x253   : > { %v1506_v50 = vsel %vm1499_vm6, %v1503_v14, %v1505_v51  ;;  %v1507_v29 = vsel %vm1499_vm6, %v1505_v51, %v1503_v14  ;;  %v1600_v51 = vstv %s4581_s19  ;;  %vm1606_vm6 = vmand %vm370_vm9, %vm5167_vm10  ;;  %vm5172_vm10 = vcmp.ge.s32.totalorder %v2909_v46, 1 }
 0x254   : > { %v1514_v32 = vmul.f32 %v1513_v1, %v1506_v50  ;;  %v1515_v36 = vmul.f32 %v1513_v1, %v1507_v29 }
 0x256   : > { %v1527_v2 = vpop.permute.xlu1 %1526  ;;  %v1516_v56 = vadd.f32 %v1514_v32, %v1510_v24  ;;  %v1517_v48 = vadd.f32 %v1515_v36, %v1511_v12  ;;  %v1525_v54 = vpop.permute.xlu0 %1524 }
 0x257   : > { %v1529_v26 = vsel %vm1528_vm11, %v1525_v54, %v1527_v2  ;;  %v1530_v25 = vsel %vm1528_vm11, %v1527_v2, %v1525_v54 }
 0x258   : > { %v1520_v44 = vsel %vm5164_vm15, %v1516_v56, 0.0  ;;  %v1521_v43 = vsel %vm1519_vm3, %v1517_v48, 0.0  ;;  %v1539_v18 = vmul.f32 %v1538_v61, %v1529_v26  ;;  %v1540_v60 = vmul.f32 %v1538_v61, %v1530_v25 }
 0x259   : > { %v4560_v53 = vadd.f32 %v1520_v44, %v4460_v45  ;;  %v4563_v52 = vadd.f32 %v1521_v43, %v4463_v33  ;;  %vm5168_vm3 = vcmp.ge.s32.totalorder %v2909_v46, 3  ;;  %v1625_v61 = vstv %s4598_s25 }
 0x25a   : > { %v1534_v62 = vpop.permute.xlu1 %1533  ;;  %v1532_v22 = vpop.permute.xlu0 %1531  ;;  %vm5169_vm15 = vcmp.ge.s32.totalorder %v2925_v5, 2 }
 0x25b   : > { %v1535_v17 = vsel %vm1528_vm11, %v1532_v22, %v1534_v62  ;;  %v1536_v28 = vsel %vm1528_vm11, %v1534_v62, %v1532_v22  ;;  %vm1615_vm11 = vcmp.lt.s32.totalorder %v2874_v37, 82  ;;  %v1629_v62 = vstv %s4600_s26 }
 0x25c   : > { %v1543_v19 = vmul.f32 %v1542_v7, %v1535_v17  ;;  %v1544_v45 = vmul.f32 %v1542_v7, %v1536_v28 }
 0x25e   : > { %v1556_v33 = vpop.permute.xlu1 %1555  ;;  %v1545_v8 = vadd.f32 %v1543_v19, %v1539_v18  ;;  %v1546_v49 = vadd.f32 %v1544_v45, %v1540_v60  ;;  %v1554_v39 = vpop.permute.xlu0 %1553 }
 0x25f   : > { %v1558_v38 = vsel %vm1557_vm5, %v1554_v39, %v1556_v33  ;;  %v1559_v0 = vsel %vm1557_vm5, %v1556_v33, %v1554_v39 }
 0x260   : > { %v1549_v57 = vsel %vm5165_vm2, %v1545_v8, 0.0  ;;  %v1550_v58 = vsel %vm1548_vm4, %v1546_v49, 0.0  ;;  %v1568_v13 = vmul.f32 %v1567_v10, %v1558_v38  ;;  %v1569_v20 = vmul.f32 %v1567_v10, %v1559_v0  ;;  %vm1635_vm4 = vmand %vm370_vm9, %vm5169_vm15 }
 0x261   : > { %v4584_v4 = vadd.f32 %v1549_v57, %v4487_v30  ;;  %v4587_v23 = vadd.f32 %v1550_v58, %v4490_v55  ;;  %vm5170_vm2 = vcmp.ge.s32.totalorder %v2909_v46, 2  ;;  %v1654_v38 = vstv %s4626_s18 }
 0x262   : > { %v1563_v11 = vpop.permute.xlu1 %1562  ;;  %v1561_v63 = vpop.permute.xlu0 %1560  ;;  %v1658_v0 = vstv %s4628_s5  ;;  %vm5173_vm15 = vcmp.lt.s32.totalorder %v2909_v46, 15 }
 0x263   : > { %v1564_v34 = vsel %vm1557_vm5, %v1561_v63, %v1563_v11  ;;  %v1565_v59 = vsel %vm1557_vm5, %v1563_v11, %v1561_v63  ;;  %vm1644_vm5 = vcmp.lt.s32.totalorder %v2874_v37, 81 }
 0x264   : > { %v1572_v42 = vmul.f32 %v1571_v31, %v1564_v34  ;;  %v1573_v35 = vmul.f32 %v1571_v31, %v1565_v59 }
 0x266   : > { %v1585_v30 = vpop.permute.xlu1 %1584  ;;  %v1574_v55 = vadd.f32 %v1572_v42, %v1568_v13  ;;  %v1575_v41 = vadd.f32 %v1573_v35, %v1569_v20  ;;  %v1583_v47 = vpop.permute.xlu0 %1582 }
 0x267   : > { %v1587_v50 = vsel %vm1586_vm0, %v1583_v47, %v1585_v30  ;;  %v1588_v29 = vsel %vm1586_vm0, %v1585_v30, %v1583_v47 }
 0x268   : > { %v1578_v6 = vsel %vm5166_vm14, %v1574_v55, 0.0  ;;  %v1579_v40 = vsel %vm1577_vm8, %v1575_v41, 0.0  ;;  %v1598_v36 = vmul.f32 %v1596_v27, %v1588_v29  ;;  %vm5171_vm8 = vcmp.ge.s32.totalorder %v2925_v5, 1 }
 0x269   : > { %v4603_v1 = vadd.f32 %v1578_v6, %v4514_v9  ;;  %v4606_v14 = vadd.f32 %v1579_v40, %v4517_v3  ;;  %v1597_v3 = vmul.f32 %v1596_v27, %v1587_v50  ;;  %vm1673_vm14 = vcmp.lt.s32.totalorder %v2874_v37, 80 }
 0x26a   : > { %v1592_v24 = vpop.permute.xlu1 %1591  ;;  %v1590_v12 = vpop.permute.xlu0 %1589  ;;  %v1683_v50 = vstv %s4645_s27  ;;  %v1687_v29 = vstv %s4647_s30 }
 0x26b   : > { %v1593_v32 = vsel %vm1586_vm0, %v1590_v12, %v1592_v24  ;;  %v1594_v9 = vsel %vm1586_vm0, %v1592_v24, %v1590_v12  ;;  %vm1664_vm0 = vmand %vm370_vm9, %vm5171_vm8 }
 0x26c   : > { %v1601_v2 = vmul.f32 %v1600_v51, %v1593_v32  ;;  %v1602_v56 = vmul.f32 %v1600_v51, %v1594_v9 }
 0x26e   : > { %v1614_v48 = vpop.permute.xlu1 %1613  ;;  %v1603_v54 = vadd.f32 %v1601_v2, %v1597_v3  ;;  %v1604_v26 = vadd.f32 %v1602_v56, %v1598_v36  ;;  %v1612_v25 = vpop.permute.xlu0 %1611 }
 0x26f   : > { %v1616_v17 = vsel %vm1615_vm11, %v1612_v25, %v1614_v48  ;;  %v1617_v28 = vsel %vm1615_vm11, %v1614_v48, %v1612_v25 }
 0x270   : > { %v1607_v44 = vsel %vm5168_vm3, %v1603_v54, 0.0  ;;  %v1608_v43 = vsel %vm1606_vm6, %v1604_v26, 0.0  ;;  %v1626_v33 = vmul.f32 %v1625_v61, %v1616_v17  ;;  %v1627_v8 = vmul.f32 %v1625_v61, %v1617_v28 }
 0x271   : > { %v4631_v7 = vadd.f32 %v1607_v44, %v4533_v15  ;;  %v4634_v22 = vadd.f32 %v1608_v43, %v4536_v16  ;;  %vm1700_vm6 = vcmp.lt.s32.totalorder %v2874_v37, 79  ;;  %v1710_v17 = vstv %s4664_s8 }
 0x272   : > { %v1621_v18 = vpop.permute.xlu1 %1620  ;;  %v1619_v60 = vpop.permute.xlu0 %1618  ;;  %vm1729_vm3 = vcmp.lt.s32.totalorder %v2874_v37, 78 }
 0x273   : > { %v1622_v19 = vsel %vm1615_vm11, %v1619_v60, %v1621_v18  ;;  %v1623_v45 = vsel %vm1615_vm11, %v1621_v18, %v1619_v60  ;;  %vm1720_vm11 = vmand %vm370_vm9, %vm364_vm7 }
 0x274   : > { %v1630_v49 = vmul.f32 %v1629_v62, %v1622_v19  ;;  %v1631_v39 = vmul.f32 %v1629_v62, %v1623_v45  ;;  %v1714_v45 = vstv %s2045_s20  ;;  %vm1749_vm7 = vmand %vm370_vm9, %vm368_vm13 }
 0x275   : > { %vm1778_vm13 = vmand %vm370_vm9, %vm372_vm12 }
 0x276   : > { %v1643_v15 = vpop.permute.xlu1 %1642  ;;  %v1632_v16 = vadd.f32 %v1630_v49, %v1626_v33  ;;  %v1633_v57 = vadd.f32 %v1631_v39, %v1627_v8  ;;  %v1641_v58 = vpop.permute.xlu0 %1640 }
 0x277   : > { %v1645_v34 = vsel %vm1644_vm5, %v1641_v58, %v1643_v15  ;;  %v1646_v59 = vsel %vm1644_vm5, %v1643_v15, %v1641_v58 }
 0x278   : > { %v1636_v10 = vsel %vm5170_vm2, %v1632_v16, 0.0  ;;  %v1637_v31 = vsel %vm1635_vm4, %v1633_v57, 0.0  ;;  %v1655_v30 = vmul.f32 %v1654_v38, %v1645_v34  ;;  %v1656_v55 = vmul.f32 %v1654_v38, %v1646_v59 }
 0x279   : > { %v4650_v11 = vadd.f32 %v1636_v10, %v4560_v53  ;;  %v4653_v63 = vadd.f32 %v1637_v31, %v4563_v52  ;;  %v1743_v34 = vstv %s4681_s13  ;;  %vm1758_vm4 = vcmp.lt.s32.totalorder %v2874_v37, 77 }
 0x27a   : > { %v1650_v13 = vpop.permute.xlu1 %1649  ;;  %v1648_v20 = vpop.permute.xlu0 %1647  ;;  %vm5175_vm2 = vcmp.lt.s32.totalorder %v2909_v46, 13 }
 0x27b   : > { %v1651_v42 = vsel %vm1644_vm5, %v1648_v20, %v1650_v13  ;;  %v1652_v35 = vsel %vm1644_vm5, %v1650_v13, %v1648_v20  ;;  %vm5174_vm5 = vcmp.lt.s32.totalorder %v2909_v46, 14 }
 0x27c   : > { %v1659_v41 = vmul.f32 %v1658_v0, %v1651_v42  ;;  %v1660_v47 = vmul.f32 %v1658_v0, %v1652_v35  ;;  %v1739_v0 = vstv %s4679_s16 }
 0x27e   : > { %v1672_v53 = vpop.permute.xlu1 %1671  ;;  %v1661_v52 = vadd.f32 %v1659_v41, %v1655_v30  ;;  %v1662_v6 = vadd.f32 %v1660_v47, %v1656_v55  ;;  %v1670_v40 = vpop.permute.xlu0 %1669 }
 0x27f   : > { %v1674_v32 = vsel %vm1673_vm14, %v1670_v40, %v1672_v53  ;;  %v1675_v9 = vsel %vm1673_vm14, %v1672_v53, %v1670_v40 }
 0x280   : > { %v1665_v27 = vsel %vm5172_vm10, %v1661_v52, 0.0  ;;  %v1666_v51 = vsel %vm1664_vm0, %v1662_v6, 0.0  ;;  %v1684_v48 = vmul.f32 %v1683_v50, %v1674_v32  ;;  %v1685_v54 = vmul.f32 %v1683_v50, %v1675_v9 }
 0x281   : > { %v4667_v24 = vadd.f32 %v1665_v27, %v4584_v4  ;;  %v4670_v12 = vadd.f32 %v1666_v51, %v4587_v23  ;;  %v1772_v32 = vstv %s4697_s0 }
 0x282   : > { %v1679_v3 = vpop.permute.xlu1 %1678  ;;  %v1677_v36 = vpop.permute.xlu0 %1676 }
 0x283   : > { %v1680_v2 = vsel %vm1673_vm14, %v1677_v36, %v1679_v3  ;;  %v1681_v56 = vsel %vm1673_vm14, %v1679_v3, %v1677_v36 }
 0x284   : > { %v1688_v26 = vmul.f32 %v1687_v29, %v1680_v2  ;;  %v1689_v25 = vmul.f32 %v1687_v29, %v1681_v56  ;;  %v1768_v29 = vstv %s4695_s4 }
 0x286   : > { %v1699_v44 = vpop.permute.xlu1 %1698  ;;  %v1690_v43 = vadd.f32 %v1688_v26, %v1684_v48  ;;  %v1691_v61 = vadd.f32 %v1689_v25, %v1685_v54  ;;  %v1697_v4 = vpop.permute.xlu0 %1696 }
 0x287   : > { %v1701_v18 = vsel %vm1700_vm6, %v1697_v4, %v1699_v44  ;;  %v1702_v60 = vsel %vm1700_vm6, %v1699_v44, %v1697_v4 }
 0x288   : > { %v1693_v23 = vsel %vm370_vm9, %v1691_v61, 0.0  ;;  %v4676_v62 = vadd.f32 %v1690_v43, %v4603_v1  ;;  %v1711_v39 = vmul.f32 %v1710_v17, %v1701_v18  ;;  %v1712_v1 = vmul.f32 %v1710_v17, %v1702_v60 }
 0x289   : > { %v4684_v28 = vadd.f32 %v1693_v23, %v4606_v14 }
 0x28a   : > { %v1706_v19 = vpop.permute.xlu1 %1705  ;;  %v1704_v33 = vpop.permute.xlu0 %1703 }
 0x28b   : > { %v1707_v8 = vsel %vm1700_vm6, %v1704_v33, %v1706_v19  ;;  %v1708_v49 = vsel %vm1700_vm6, %v1706_v19, %v1704_v33 }
 0x28c   : > { %v1715_v15 = vmul.f32 %v1714_v45, %v1707_v8  ;;  %v1716_v16 = vmul.f32 %v1714_v45, %v1708_v49 }
 0x28e   : > { %v1728_v14 = vpop.permute.xlu1 %1727  ;;  %v1717_v57 = vadd.f32 %v1715_v15, %v1711_v39  ;;  %v1718_v58 = vadd.f32 %v1716_v16, %v1712_v1  ;;  %v1726_v10 = vpop.permute.xlu0 %1725 }
 0x28f   : > { %v1730_v20 = vsel %vm1729_vm3, %v1726_v10, %v1728_v14  ;;  %v1731_v42 = vsel %vm1729_vm3, %v1728_v14, %v1726_v10 }
 0x290   : > { %v1721_v31 = vsel %vm5173_vm15, %v1717_v57, 0.0  ;;  %v1722_v38 = vsel %vm1720_vm11, %v1718_v58, 0.0  ;;  %v1740_v47 = vmul.f32 %v1739_v0, %v1730_v20  ;;  %v1741_v53 = vmul.f32 %v1739_v0, %v1731_v42 }
 0x291   : > { %v1723_v59 = vadd.f32 %v1721_v31, %v4631_v7  ;;  %v1724_v13 = vadd.f32 %v1722_v38, %v4634_v22 }
 0x292   : > { %v1735_v35 = vpop.permute.xlu1 %1734  ;;  %v1733_v30 = vpop.permute.xlu0 %1732 }
 0x293   : > { %v1736_v55 = vsel %vm1729_vm3, %v1733_v30, %v1735_v35  ;;  %v1737_v41 = vsel %vm1729_vm3, %v1735_v35, %v1733_v30 }
 0x294   : > { %v1744_v52 = vmul.f32 %v1743_v34, %v1736_v55  ;;  %v1745_v6 = vmul.f32 %v1743_v34, %v1737_v41 }
 0x296   : > { %v1757_v7 = vpop.permute.xlu1 %1756  ;;  %v1746_v40 = vadd.f32 %v1744_v52, %v1740_v47  ;;  %v1747_v22 = vadd.f32 %v1745_v6, %v1741_v53  ;;  %v1755_v27 = vpop.permute.xlu0 %1754 }
 0x297   : > { %v1759_v36 = vsel %vm1758_vm4, %v1755_v27, %v1757_v7  ;;  %v1760_v2 = vsel %vm1758_vm4, %v1757_v7, %v1755_v27 }
 0x298   : > { %v1750_v51 = vsel %vm5174_vm5, %v1746_v40, 0.0  ;;  %v1751_v50 = vsel %vm1749_vm7, %v1747_v22, 0.0  ;;  %v1769_v37 = vmul.f32 %v1768_v29, %v1759_v36  ;;  %v1770_v43 = vmul.f32 %v1768_v29, %v1760_v2 }
 0x299   : > { %v1752_v9 = vadd.f32 %v1750_v51, %v4650_v11  ;;  %v1753_v3 = vadd.f32 %v1751_v50, %v4653_v63 }
 0x29a   : > { %v1764_v56 = vpop.permute.xlu1 %1763  ;;  %v1762_v48 = vpop.permute.xlu0 %1761 }
 0x29b   : > { %v1785_v54 = vadd.f32 %v1752_v9, %v1723_v59  ;;  %v1786_v26 = vadd.f32 %v1753_v3, %v1724_v13  ;;  %v1765_v25 = vsel %vm1758_vm4, %v1762_v48, %v1764_v56  ;;  %v1766_v44 = vsel %vm1758_vm4, %v1764_v56, %v1762_v48 }
 0x29c   : > { %v1773_v61 = vmul.f32 %v1772_v32, %v1765_v25  ;;  %v1774_v4 = vmul.f32 %v1772_v32, %v1766_v44 }
 0x29e   : > { %v1775_v11 = vadd.f32 %v1773_v61, %v1769_v37  ;;  %v1776_v23 = vadd.f32 %v1774_v4, %v1770_v43 }
 0x2a0   : > { %v1779_v63 = vsel %vm5175_vm2, %v1775_v11, 0.0  ;;  %v1780_v17 = vsel %vm1778_vm13, %v1776_v23, 0.0 }
 0x2a1   : > { %v1781_v18 = vadd.f32 %v1779_v63, %v4667_v24  ;;  %v1782_v60 = vadd.f32 %v1780_v17, %v4670_v12 }
 0x2a3   : > { %v1783_v19 = vadd.f32 %v1781_v18, %v4676_v62  ;;  %v1784_v45 = vadd.f32 %v1782_v60, %v4684_v28  ;;  %v5179_v28 = vld [vmem:[#allocation28_spill] sm:$0xff] }
 0x2a5   : > { %v1787_v33 = vadd.f32 %v1785_v54, %v1783_v19  ;;  %v1788_v5 = vadd.f32 %v1786_v26, %v1784_v45 }
 0x2a7   : > { %v2050_v21 = vmul.f32 -1.442695, %v1787_v33  ;;  %v2051_v8 = vmul.f32 -1.442695, %v1788_v5 }
 0x2a9   : > { %2194 = vpow2.f32 %v2050_v21 }
 0x2aa   : > { %2196 = vpow2.f32 %v2051_v8 }
 0x2b3   : > { %v2195_v49 = vpop.eup %2194 }
 0x2b4   : > { %v2197_v46 = vpop.eup %2196  ;;  %v1795_v39 = vadd.f32 1.0, %v2195_v49 }
 0x2b5   : > { %v1796_v1 = vadd.f32 1.0, %v2197_v46 }
 0x2b6   : > { %2198 = vrcp.f32 %v1795_v39 }
 0x2b7   : > { %2200 = vrcp.f32 %v1796_v1 }
 0x2c0   : > { %v2199_v24 = vpop.eup %2198 }
 0x2c1   : > { %v2201_v12 = vpop.eup %2200 }
 0x2c2   : > { %v1803_v62 = vcombine.low %v2199_v24, %v2201_v12 }
 0x2c4   : > { %v1810_v15 = vrot.slane %v1803_v62, %v5179_v28 }
 0x2c6   : > { %v1817_v16 = vrot.slane %v1810_v15, %v5179_v28 }
 0x2c8   : > { %1819 = vst.msk [vmem:[%s227_s3] sm:$0x3] %vm2598_vm1, %v1817_v16 }
 0x2c9   : > { %2273 = shalt.err (!%p2270_p5)
}
 0x2ca   : > { %s2274_s22 = scalar_lea.hbm %s4729_s6, 32  ;;  %s2278_s26 = scalar_lea.hbm %s5181_s28, 64 }
 0x2cb   : > { %p2275_p10 = scmp.ne.s32.totalorder %s4729_s6, %s2274_s22  ;;  %p2279_p7 = scmp.lt.u32.totalorder %s4729_s6, %s5181_s28 }
 0x2cc   : > { %p2280_p12 = scmp.lt.u32.totalorder %s2278_s26, %s2274_s22  ;;  %p2282_p1 = scmp.lt.u32.totalorder %s2274_s22, %s4729_s6 }
 0x2cd   : > { %p2276_p13 = pnand %p2275_p10, %p2532_p8 }
 0x2ce   : > { %p2281_p2 = por %p2280_p12, %p2279_p7 }
 0x2cf   : > { %p2277_p3 = pneg %p2276_p13 }
 0x2d0   : > { %p2283_p4 = por %p2282_p1, %p2281_p2 }
 0x2d2   : > { %p2284_p6 = pnand %p2283_p4, %p2277_p3 }
 0x2d4   : > { %2287 = shalt.err (!%p2284_p6)
}
 0x2d5   : > { %2069 = dma.vmem_to_hbm [thread:$0]  (%p2532_p8), %s4731_s12, 32, %s4729_s6, %s1821_s9  }
 0x2d6 PF: > { %s5183_s27 = sld [smem:[#allocation16_spill]]  ;;  %s5184_s30 = sld [smem:[#allocation22_spill]] }
 0x2d7   : > { %s5185_s8 = sld [smem:[#allocation21_spill]] }
 0x2dc   : > { %s1847_s20 = sand.u32 1, %s5183_s27   ;;  %p5186_p9 = scmp.ne.s32.totalorder %s5184_s30, 0 }
 0x2dd   : > { %p5187_p0 = scmp.ge.s32.totalorder %s5185_s8, 2  ;;  %s1848_s16 = scalar_lea.sflag [#allocation6], %s1847_s20 }
 0x2df   : > { %p2083_p11 = pnand %p5187_p0, %p5186_p9 }
 0x2e1   : > { %2325 = dma.done.wait (!%p2083_p11), %s1848_s16, 32  }
 0x2e2   : > { %2327 = vsyncadd (!%p2083_p11), %s1848_s16, 4294967264  ;;  %s21_s17 = sadd.s32 1, %s5185_s8   ;;  %s5188_s12 = sld [smem:[#allocation17_spill]] }
 0x2e3   : > { %p18_p5 = scmp.ge.s32.totalorder %s21_s17, 4   ;;  %s5189_s13 = sld [smem:[#allocation18_spill]] }
 0x2e4   : > { %s5190_s14 = sld [smem:[#allocation25_spill]]  ;;  %s5191_s15 = sld [smem:[#allocation20_spill]] }
 0x2e5   : > { %s5192_s16 = sld [smem:[#allocation23_spill]]  ;;  %20 = sbr.rel (!%p18_p5) target bundleno = 13 (0xd), region = 95 }
 0x2ec   :  { %1853 = vsyncpa [#allocation5], 1 }
 0x2ed   :  { %1855 = vsyncpa [#allocation5 + $0x1], 1 }
 0x2ee   :  { %1856 = vsyncpa [#allocation6], 1 }
 0x2ef   :  { %1858 = vsyncpa [#allocation6 + $0x1], 1 }
 0x2f0   :  { %1859 = vsyncpa [#allocation7], 1 }
 0x2f1   :  { %1861 = vsyncpa [#allocation7 + $0x1], 1 }
 0x2f2   :  { %1862 = vsyncpa [#allocation8], 1 }
 0x2f3   :  { %1864 = vsyncpa [#allocation8 + $0x1], 1 }

</bundles_post_ra>
